<compile_context>
chip_gen: v6e
topology: v6e:2x2x1
jax: 0.10.0
libtpu: 0.0.40
codegen_flags: <defaults>
</compile_context>

<pallas_src>
import functools

import jax
import jax.numpy as jnp
from jax import lax
from jax.experimental import pallas as pl
from jax.experimental.pallas import tpu as pltpu

# ----------------------------------------------------------------------------
# Static architecture constants (28x28x1 -> 12x12x32 -> 4x4x64 -> 1024 -> 10)
# ----------------------------------------------------------------------------
IN_H = IN_W = 28
K1 = 5                 # conv1 kernel size
C1 = 32                # conv1 output channels
K2 = 5                 # conv2 kernel size
C2 = 64                # conv2 output channels
OH2 = OW2 = 4          # conv2 output spatial size
P2 = K2 * K2           # 25 conv2 taps
PIX2 = OH2 * OW2       # 16 conv2 output pixels
FC_IN = PIX2 * C2      # 1024
FC1 = 1024
NCLS = 10
NCLS_PAD = 128         # lane-dense fc2 output (sliced back to 10 in the wrapper)


# ----------------------------------------------------------------------------
# The single fused Pallas kernel: conv1+BN+ReLU, conv2+BN+ReLU, flatten,
# fc1+ReLU, fc2 — all intermediates stay in VMEM.
# ----------------------------------------------------------------------------
def _net_kernel(ep_ref, w1_ref, b1_ref, w2_ref, b2_ref,
                wfc1_ref, bfc1_ref, wfc2_ref, bfc2_ref,
                out_ref, t_s, y2_s, flat_s, *, n):
    rows2 = PIX2 * n                       # 32 rows = (conv2 pixel, sample)

    # ---- conv1 (+ folded BN1) + ReLU --------------------------------------
    # ep rows are ordered (p=(ki,kj), pixel=(i,j), sample); each row holds the
    # 5x5 raw-input patch feeding conv1 output position (2i+ki, 2j+kj).
    ep = ep_ref[...].astype(jnp.bfloat16)
    t = jnp.dot(ep, w1_ref[...], preferred_element_type=jnp.float32)
    t_s[...] = jnp.maximum(t + b1_ref[...], 0.0)          # (P2*rows2, C1)

    # ---- conv2 (+ folded BN2) + ReLU: 25 shifted matmul-accumulates -------
    acc2 = jnp.zeros((rows2, C2), jnp.float32)
    for p in range(P2):
        chunk = t_s[p * rows2:(p + 1) * rows2, :].astype(jnp.bfloat16)
        wblk = w2_ref[p * C1:(p + 1) * C1, :]
        acc2 = acc2 + jnp.dot(chunk, wblk, preferred_element_type=jnp.float32)
    y2_s[...] = jnp.maximum(acc2 + b2_ref[...], 0.0)       # rows = (pixel, n)

    # ---- flatten: redistribute (pixel, sample) rows into (sample, lanes) ---
    # fc1's columns were pre-permuted to this (pixel, channel) order, so this
    # replaces the NHWC->NCHW transpose + view of the original model.
    for k in range(PIX2):
        flat_s[:, k * C2:(k + 1) * C2] = y2_s[k * n:(k + 1) * n, :]

    # ---- fc1 + ReLU (one big K=1024 matmul) --------------------------------
    h = jnp.dot(flat_s[...].astype(jnp.bfloat16), wfc1_ref[...],
                preferred_element_type=jnp.float32)
    h = jnp.maximum(h + bfc1_ref[...], 0.0)

    # ---- fc2 (output padded to 128 lanes for a dense store) ----------------
    out = jnp.dot(h.astype(jnp.bfloat16), wfc2_ref[...],
                  preferred_element_type=jnp.float32)
    out_ref[...] = out + bfc2_ref[...]


# ----------------------------------------------------------------------------
# Forward pass: one gather on the raw input + ONE pallas_call.
# ----------------------------------------------------------------------------
@jax.jit
def net_forward(prep, x_nchw):
    n = x_nchw.shape[0]
    x = x_nchw[:, 0, :, :]                                  # (n, 28, 28)

    # Composite im2col on the RAW input only (no intermediate materialized):
    # row ((ki*5+kj)*16 + i*4 + j)*n + nn  holds  x[nn, 4i+2ki+k1i, 4j+2kj+k1j]
    # i.e. the conv1 receptive field of conv1-output (2i+ki, 2j+kj), which is
    # exactly conv2 tap (ki,kj) of conv2 output pixel (i,j).
    i = jnp.arange(OH2)
    k2 = jnp.arange(K2)
    k1 = jnp.arange(K1)
    hh = 4 * i[:, None, None] + 2 * k2[None, :, None] + k1[None, None, :]  # (4,5,5)
    ep = x[:, hh[:, :, :, None, None, None], hh[None, None, None, :, :, :]]
    ep = jnp.transpose(ep, (2, 5, 1, 4, 0, 3, 6))           # (ki,kj,i,j,n,k1i,k1j)
    ep = ep.reshape(P2 * PIX2 * n, K1 * K1)                 # (800, 25)

    n_rows = P2 * PIX2 * n
    kernel = functools.partial(_net_kernel, n=n)
    out = pl.pallas_call(
        kernel,
        out_shape=jax.ShapeDtypeStruct((n, NCLS_PAD), jnp.float32),
        grid=(1,),
        in_specs=[
            pl.BlockSpec((n_rows, K1 * K1), lambda g: (0, 0)),   # ep
            pl.BlockSpec((K1 * K1, C1), lambda g: (0, 0)),       # w1 (BN folded)
            pl.BlockSpec((1, C1), lambda g: (0, 0)),             # b1 (BN folded)
            pl.BlockSpec((P2 * C1, C2), lambda g: (0, 0)),       # w2 (BN folded)
            pl.BlockSpec((1, C2), lambda g: (0, 0)),             # b2 (BN folded)
            pl.BlockSpec((FC_IN, FC1), lambda g: (0, 0)),        # fc1 weight
            pl.BlockSpec((1, FC1), lambda g: (0, 0)),            # fc1 bias
            pl.BlockSpec((FC1, NCLS_PAD), lambda g: (0, 0)),     # fc2 weight (padded)
            pl.BlockSpec((1, NCLS_PAD), lambda g: (0, 0)),       # fc2 bias (padded)
        ],
        out_specs=pl.BlockSpec((n, NCLS_PAD), lambda g: (0, 0)),
        scratch_shapes=[
            pltpu.VMEM((n_rows, C1), jnp.float32),               # conv1 activations
            pltpu.VMEM((PIX2 * n, C2), jnp.float32),             # conv2 activations
            pltpu.VMEM((n, FC_IN), jnp.float32),                 # flattened features
        ],
        compiler_params=pltpu.CompilerParams(
            dimension_semantics=("arbitrary",)),
    )(ep, prep["w1"], prep["b1"], prep["w2"], prep["b2"],
      prep["wfc1"], prep["bfc1"], prep["wfc2"], prep["bfc2"])
    return out[:, :NCLS]


# ----------------------------------------------------------------------------
# One-time parameter preprocessing (hoisted out of the forward path)
# ----------------------------------------------------------------------------
def prepare_params(p, eps=1e-5):
    # conv1: fold BN scale into weights, BN shift + conv bias into bias.
    s1 = p["bn1_gamma"] / jnp.sqrt(p["bn1_var"] + eps)
    b1f = (p["b1"] - p["bn1_mean"]) * s1 + p["bn1_beta"]
    w1m = jnp.transpose(p["w1"], (2, 3, 1, 0)).reshape(K1 * K1, C1)      # rows (k1i,k1j)
    w1f = (w1m * s1[None, :]).astype(jnp.bfloat16)

    # conv2: same fold; rows ordered (ki, kj, in_channel).
    s2 = p["bn2_gamma"] / jnp.sqrt(p["bn2_var"] + eps)
    b2f = (p["b2"] - p["bn2_mean"]) * s2 + p["bn2_beta"]
    w2m = jnp.transpose(p["w2"], (2, 3, 1, 0)).reshape(P2 * C1, C2)
    w2f = (w2m * s2[None, :]).astype(jnp.bfloat16)

    # fc1: pre-transpose and permute input columns from PyTorch's NCHW flatten
    # order (c*16 + pixel) to the kernel's (pixel*64 + c) layout.
    wfc1 = jnp.transpose(p["lw1"].reshape(FC1, C2, PIX2), (2, 1, 0))
    wfc1 = wfc1.reshape(FC_IN, FC1).astype(jnp.bfloat16)

    # fc2: pre-transpose and pad output lanes 10 -> 128 (dense stores).
    wfc2 = jnp.pad(p["lw2"].T, ((0, 0), (0, NCLS_PAD - NCLS))).astype(jnp.bfloat16)
    bfc2 = jnp.pad(p["lb2"], (0, NCLS_PAD - NCLS))

    return {
        "w1": w1f, "b1": b1f.reshape(1, C1).astype(jnp.float32),
        "w2": w2f, "b2": b2f.reshape(1, C2).astype(jnp.float32),
        "wfc1": wfc1, "bfc1": p["lb1"].reshape(1, FC1).astype(jnp.float32),
        "wfc2": wfc2, "bfc2": bfc2.reshape(1, NCLS_PAD).astype(jnp.float32),
    }


# ----------------------------------------------------------------------------
# Deterministic parameters (eval-mode BN stats included)
# ----------------------------------------------------------------------------
def make_params(key):
    ks = jax.random.split(key, 12)
    p = {}
    p["w1"] = jax.random.normal(ks[0], (32, 1, 5, 5), jnp.float32) * 0.05
    p["b1"] = jax.random.normal(ks[1], (32,), jnp.float32) * 0.05
    p["bn1_gamma"] = 1.0 + 0.1 * jax.random.normal(ks[2], (32,), jnp.float32)
    p["bn1_beta"] = 0.1 * jax.random.normal(ks[3], (32,), jnp.float32)
    p["bn1_mean"] = 0.1 * jax.random.normal(ks[4], (32,), jnp.float32)
    p["bn1_var"] = jnp.abs(jax.random.normal(ks[5], (32,), jnp.float32)) + 0.5
    p["w2"] = jax.random.normal(ks[6], (64, 32, 5, 5), jnp.float32) * 0.02
    p["b2"] = jax.random.normal(ks[7], (64,), jnp.float32) * 0.02
    p["bn2_gamma"] = 1.0 + 0.1 * jax.random.normal(ks[8], (64,), jnp.float32)
    p["bn2_beta"] = 0.1 * jax.random.normal(ks[9], (64,), jnp.float32)
    p["bn2_mean"] = 0.1 * jax.random.normal(ks[10], (64,), jnp.float32)
    p["bn2_var"] = jnp.abs(jax.random.normal(ks[11], (64,), jnp.float32)) + 0.5
    kl = jax.random.split(jax.random.fold_in(key, 1), 4)
    p["lw1"] = jax.random.normal(kl[0], (1024, 64 * 4 * 4), jnp.float32) * 0.02
    p["lb1"] = jax.random.normal(kl[1], (1024,), jnp.float32) * 0.02
    p["lw2"] = jax.random.normal(kl[2], (10, 1024), jnp.float32) * 0.02
    p["lb2"] = jax.random.normal(kl[3], (10,), jnp.float32) * 0.02
    return p


# ----------------------------------------------------------------------------
# Pure-JAX reference (mirrors the PyTorch module, eval mode) for a sanity check
# ----------------------------------------------------------------------------
def reference_forward(p, x_nchw, eps=1e-5):
    def bn(y, g, b, m, v):
        g, b, m, v = (a[None, :, None, None] for a in (g, b, m, v))
        return (y - m) / jnp.sqrt(v + eps) * g + b

    dn = ("NCHW", "OIHW", "NCHW")
    y = lax.conv_general_dilated(x_nchw, p["w1"], (2, 2), "VALID",
                                 dimension_numbers=dn) + p["b1"][None, :, None, None]
    y = jnp.maximum(bn(y, p["bn1_gamma"], p["bn1_beta"], p["bn1_mean"], p["bn1_var"]), 0.0)
    y = lax.conv_general_dilated(y, p["w2"], (2, 2), "VALID",
                                 dimension_numbers=dn) + p["b2"][None, :, None, None]
    y = jnp.maximum(bn(y, p["bn2_gamma"], p["bn2_beta"], p["bn2_mean"], p["bn2_var"]), 0.0)
    flat = y.reshape(y.shape[0], -1)                       # PyTorch .view(-1, 64*4*4)
    h = jnp.maximum(flat @ p["lw1"].T + p["lb1"], 0.0)
    return h @ p["lw2"].T + p["lb2"]


if __name__ == "__main__":
    key = jax.random.PRNGKey(0)
    pkey, xkey = jax.random.split(key)
    params = make_params(pkey)
    prep = prepare_params(params)          # one-time weight folding / reordering

    # MNIST-shaped input is required by the module's hard-coded view(-1, 64*4*4).
    x = jax.random.normal(xkey, (2, 1, 28, 28), jnp.float32)

    logits = net_forward(prep, x)
    jax.block_until_ready(logits)
    assert logits.shape == (2, 10), logits.shape

    ref = reference_forward(params, x)
    assert jnp.allclose(logits, ref, atol=5e-2, rtol=5e-2), \
        float(jnp.max(jnp.abs(logits - ref)))
    print("KERNEL_OK")
</pallas_src>

<mosaic_0001>
module attributes {stable_mosaic.version = 11 : i64} {
  func.func @_net_kernel(%arg0: i32, %arg1: memref<800x25xf32, #tpu.memory_space<vmem>>, %arg2: memref<25x32xbf16, #tpu.memory_space<vmem>>, %arg3: memref<1x32xf32, #tpu.memory_space<vmem>>, %arg4: memref<800x64xbf16, #tpu.memory_space<vmem>>, %arg5: memref<1x64xf32, #tpu.memory_space<vmem>>, %arg6: memref<1024x1024xbf16, #tpu.memory_space<vmem>>, %arg7: memref<1x1024xf32, #tpu.memory_space<vmem>>, %arg8: memref<1024x128xbf16, #tpu.memory_space<vmem>>, %arg9: memref<1x128xf32, #tpu.memory_space<vmem>>, %arg10: memref<2x128xf32, #tpu.memory_space<vmem>>, %arg11: memref<800x32xf32, #tpu.memory_space<vmem>>, %arg12: memref<32x64xf32, #tpu.memory_space<vmem>>, %arg13: memref<2x1024xf32, #tpu.memory_space<vmem>>) attributes {dimension_semantics = [#tpu.dimension_semantics<arbitrary>], iteration_bounds = array<i64: 1>, scalar_prefetch = 0 : i64, scratch_operands = 3 : i64, tpu.core_type = #tpu.core_type<tc>, window_params = [{pipeline_mode = #tpu.pipeline_mode<synchronous>, transform_indices = @transform_0, window_bounds = array<i64: 800, 25>}, {pipeline_mode = #tpu.pipeline_mode<synchronous>, transform_indices = @transform_1, window_bounds = array<i64: 25, 32>}, {pipeline_mode = #tpu.pipeline_mode<synchronous>, transform_indices = @transform_2, window_bounds = array<i64: 1, 32>}, {pipeline_mode = #tpu.pipeline_mode<synchronous>, transform_indices = @transform_3, window_bounds = array<i64: 800, 64>}, {pipeline_mode = #tpu.pipeline_mode<synchronous>, transform_indices = @transform_4, window_bounds = array<i64: 1, 64>}, {pipeline_mode = #tpu.pipeline_mode<synchronous>, transform_indices = @transform_5, window_bounds = array<i64: 1024, 1024>}, {pipeline_mode = #tpu.pipeline_mode<synchronous>, transform_indices = @transform_6, window_bounds = array<i64: 1, 1024>}, {pipeline_mode = #tpu.pipeline_mode<synchronous>, transform_indices = @transform_7, window_bounds = array<i64: 1024, 128>}, {pipeline_mode = #tpu.pipeline_mode<synchronous>, transform_indices = @transform_8, window_bounds = array<i64: 1, 128>}, {pipeline_mode = #tpu.pipeline_mode<synchronous>, transform_indices = @transform_9, window_bounds = array<i64: 2, 128>}]} {
    %c0 = arith.constant 0 : index
    %c0_0 = arith.constant 0 : index
    %0 = vector.load %arg1[%c0, %c0_0] : memref<800x25xf32, #tpu.memory_space<vmem>>, vector<800x25xf32>
    %1 = arith.truncf %0 : vector<800x25xf32> to vector<800x25xbf16>
    %c0_1 = arith.constant 0 : index
    %c0_2 = arith.constant 0 : index
    %2 = vector.load %arg2[%c0_1, %c0_2] : memref<25x32xbf16, #tpu.memory_space<vmem>>, vector<25x32xbf16>
    %cst = arith.constant dense<0.000000e+00> : vector<800x32xf32>
    %3 = tpu.matmul %1, %2, %cst {dimension_numbers = #tpu.dot_dimension_numbers<[1], [0], [0], [1], [0, 0, 1, 1], [], []>} : vector<800x25xbf16>, vector<25x32xbf16>, vector<800x32xf32> -> vector<800x32xf32>
    %c0_3 = arith.constant 0 : index
    %c0_4 = arith.constant 0 : index
    %4 = vector.load %arg3[%c0_3, %c0_4] : memref<1x32xf32, #tpu.memory_space<vmem>>, vector<1x32xf32>
    %5 = vector.broadcast %4 : vector<1x32xf32> to vector<800x32xf32>
    %6 = arith.addf %3, %5 : vector<800x32xf32>
    %cst_5 = arith.constant 0.000000e+00 : f32
    %7 = vector.broadcast %cst_5 : f32 to vector<800x32xf32>
    %8 = arith.maximumf %6, %7 : vector<800x32xf32>
    %c0_6 = arith.constant 0 : index
    %c0_7 = arith.constant 0 : index
    %9 = vector.load %arg11[%c0_6, %c0_7] : memref<800x32xf32, #tpu.memory_space<vmem>>, vector<800x32xf32>
    tpu.vector_store %arg11[%c0_6, %c0_7], %8 {strides = array<i32>} : memref<800x32xf32, #tpu.memory_space<vmem>>, vector<800x32xf32>,
    %cst_8 = arith.constant 0.000000e+00 : f32
    %10 = vector.broadcast %cst_8 : f32 to vector<32x64xf32>
    %c0_9 = arith.constant 0 : index
    %c0_10 = arith.constant 0 : index
    %11 = vector.load %arg11[%c0_9, %c0_10] : memref<800x32xf32, #tpu.memory_space<vmem>>, vector<32x32xf32>
    %12 = arith.truncf %11 : vector<32x32xf32> to vector<32x32xbf16>
    %c0_11 = arith.constant 0 : index
    %c0_12 = arith.constant 0 : index
    %13 = vector.load %arg4[%c0_11, %c0_12] : memref<800x64xbf16, #tpu.memory_space<vmem>>, vector<32x64xbf16>
    %cst_13 = arith.constant dense<0.000000e+00> : vector<32x64xf32>
    %14 = tpu.matmul %12, %13, %cst_13 {dimension_numbers = #tpu.dot_dimension_numbers<[1], [0], [0], [1], [0, 0, 1, 1], [], []>} : vector<32x32xbf16>, vector<32x64xbf16>, vector<32x64xf32> -> vector<32x64xf32>
    %15 = arith.addf %10, %14 : vector<32x64xf32>
    %c32 = arith.constant 32 : index
    %c0_14 = arith.constant 0 : index
    %16 = vector.load %arg11[%c32, %c0_14] : memref<800x32xf32, #tpu.memory_space<vmem>>, vector<32x32xf32>
    %17 = arith.truncf %16 : vector<32x32xf32> to vector<32x32xbf16>
    %c32_15 = arith.constant 32 : index
    %c0_16 = arith.constant 0 : index
    %18 = vector.load %arg4[%c32_15, %c0_16] : memref<800x64xbf16, #tpu.memory_space<vmem>>, vector<32x64xbf16>
    %cst_17 = arith.constant dense<0.000000e+00> : vector<32x64xf32>
    %19 = tpu.matmul %17, %18, %cst_17 {dimension_numbers = #tpu.dot_dimension_numbers<[1], [0], [0], [1], [0, 0, 1, 1], [], []>} : vector<32x32xbf16>, vector<32x64xbf16>, vector<32x64xf32> -> vector<32x64xf32>
    %20 = arith.addf %15, %19 : vector<32x64xf32>
    %c64 = arith.constant 64 : index
    %c0_18 = arith.constant 0 : index
    %21 = vector.load %arg11[%c64, %c0_18] : memref<800x32xf32, #tpu.memory_space<vmem>>, vector<32x32xf32>
    %22 = arith.truncf %21 : vector<32x32xf32> to vector<32x32xbf16>
    %c64_19 = arith.constant 64 : index
    %c0_20 = arith.constant 0 : index
    %23 = vector.load %arg4[%c64_19, %c0_20] : memref<800x64xbf16, #tpu.memory_space<vmem>>, vector<32x64xbf16>
    %cst_21 = arith.constant dense<0.000000e+00> : vector<32x64xf32>
    %24 = tpu.matmul %22, %23, %cst_21 {dimension_numbers = #tpu.dot_dimension_numbers<[1], [0], [0], [1], [0, 0, 1, 1], [], []>} : vector<32x32xbf16>, vector<32x64xbf16>, vector<32x64xf32> -> vector<32x64xf32>
    %25 = arith.addf %20, %24 : vector<32x64xf32>
    %c96 = arith.constant 96 : index
    %c0_22 = arith.constant 0 : index
    %26 = vector.load %arg11[%c96, %c0_22] : memref<800x32xf32, #tpu.memory_space<vmem>>, vector<32x32xf32>
    %27 = arith.truncf %26 : vector<32x32xf32> to vector<32x32xbf16>
    %c96_23 = arith.constant 96 : index
    %c0_24 = arith.constant 0 : index
    %28 = vector.load %arg4[%c96_23, %c0_24] : memref<800x64xbf16, #tpu.memory_space<vmem>>, vector<32x64xbf16>
    %cst_25 = arith.constant dense<0.000000e+00> : vector<32x64xf32>
    %29 = tpu.matmul %27, %28, %cst_25 {dimension_numbers = #tpu.dot_dimension_numbers<[1], [0], [0], [1], [0, 0, 1, 1], [], []>} : vector<32x32xbf16>, vector<32x64xbf16>, vector<32x64xf32> -> vector<32x64xf32>
    %30 = arith.addf %25, %29 : vector<32x64xf32>
    %c128 = arith.constant 128 : index
    %c0_26 = arith.constant 0 : index
    %31 = vector.load %arg11[%c128, %c0_26] : memref<800x32xf32, #tpu.memory_space<vmem>>, vector<32x32xf32>
    %32 = arith.truncf %31 : vector<32x32xf32> to vector<32x32xbf16>
    %c128_27 = arith.constant 128 : index
    %c0_28 = arith.constant 0 : index
    %33 = vector.load %arg4[%c128_27, %c0_28] : memref<800x64xbf16, #tpu.memory_space<vmem>>, vector<32x64xbf16>
    %cst_29 = arith.constant dense<0.000000e+00> : vector<32x64xf32>
    %34 = tpu.matmul %32, %33, %cst_29 {dimension_numbers = #tpu.dot_dimension_numbers<[1], [0], [0], [1], [0, 0, 1, 1], [], []>} : vector<32x32xbf16>, vector<32x64xbf16>, vector<32x64xf32> -> vector<32x64xf32>
    %35 = arith.addf %30, %34 : vector<32x64xf32>
    %c160 = arith.constant 160 : index
    %c0_30 = arith.constant 0 : index
    %36 = vector.load %arg11[%c160, %c0_30] : memref<800x32xf32, #tpu.memory_space<vmem>>, vector<32x32xf32>
    %37 = arith.truncf %36 : vector<32x32xf32> to vector<32x32xbf16>
    %c160_31 = arith.constant 160 : index
    %c0_32 = arith.constant 0 : index
    %38 = vector.load %arg4[%c160_31, %c0_32] : memref<800x64xbf16, #tpu.memory_space<vmem>>, vector<32x64xbf16>
    %cst_33 = arith.constant dense<0.000000e+00> : vector<32x64xf32>
    %39 = tpu.matmul %37, %38, %cst_33 {dimension_numbers = #tpu.dot_dimension_numbers<[1], [0], [0], [1], [0, 0, 1, 1], [], []>} : vector<32x32xbf16>, vector<32x64xbf16>, vector<32x64xf32> -> vector<32x64xf32>
    %40 = arith.addf %35, %39 : vector<32x64xf32>
    %c192 = arith.constant 192 : index
    %c0_34 = arith.constant 0 : index
    %41 = vector.load %arg11[%c192, %c0_34] : memref<800x32xf32, #tpu.memory_space<vmem>>, vector<32x32xf32>
    %42 = arith.truncf %41 : vector<32x32xf32> to vector<32x32xbf16>
    %c192_35 = arith.constant 192 : index
    %c0_36 = arith.constant 0 : index
    %43 = vector.load %arg4[%c192_35, %c0_36] : memref<800x64xbf16, #tpu.memory_space<vmem>>, vector<32x64xbf16>
    %cst_37 = arith.constant dense<0.000000e+00> : vector<32x64xf32>
    %44 = tpu.matmul %42, %43, %cst_37 {dimension_numbers = #tpu.dot_dimension_numbers<[1], [0], [0], [1], [0, 0, 1, 1], [], []>} : vector<32x32xbf16>, vector<32x64xbf16>, vector<32x64xf32> -> vector<32x64xf32>
    %45 = arith.addf %40, %44 : vector<32x64xf32>
    %c224 = arith.constant 224 : index
    %c0_38 = arith.constant 0 : index
    %46 = vector.load %arg11[%c224, %c0_38] : memref<800x32xf32, #tpu.memory_space<vmem>>, vector<32x32xf32>
    %47 = arith.truncf %46 : vector<32x32xf32> to vector<32x32xbf16>
    %c224_39 = arith.constant 224 : index
    %c0_40 = arith.constant 0 : index
    %48 = vector.load %arg4[%c224_39, %c0_40] : memref<800x64xbf16, #tpu.memory_space<vmem>>, vector<32x64xbf16>
    %cst_41 = arith.constant dense<0.000000e+00> : vector<32x64xf32>
    %49 = tpu.matmul %47, %48, %cst_41 {dimension_numbers = #tpu.dot_dimension_numbers<[1], [0], [0], [1], [0, 0, 1, 1], [], []>} : vector<32x32xbf16>, vector<32x64xbf16>, vector<32x64xf32> -> vector<32x64xf32>
    %50 = arith.addf %45, %49 : vector<32x64xf32>
    %c256 = arith.constant 256 : index
    %c0_42 = arith.constant 0 : index
    %51 = vector.load %arg11[%c256, %c0_42] : memref<800x32xf32, #tpu.memory_space<vmem>>, vector<32x32xf32>
    %52 = arith.truncf %51 : vector<32x32xf32> to vector<32x32xbf16>
    %c256_43 = arith.constant 256 : index
    %c0_44 = arith.constant 0 : index
    %53 = vector.load %arg4[%c256_43, %c0_44] : memref<800x64xbf16, #tpu.memory_space<vmem>>, vector<32x64xbf16>
    %cst_45 = arith.constant dense<0.000000e+00> : vector<32x64xf32>
    %54 = tpu.matmul %52, %53, %cst_45 {dimension_numbers = #tpu.dot_dimension_numbers<[1], [0], [0], [1], [0, 0, 1, 1], [], []>} : vector<32x32xbf16>, vector<32x64xbf16>, vector<32x64xf32> -> vector<32x64xf32>
    %55 = arith.addf %50, %54 : vector<32x64xf32>
    %c288 = arith.constant 288 : index
    %c0_46 = arith.constant 0 : index
    %56 = vector.load %arg11[%c288, %c0_46] : memref<800x32xf32, #tpu.memory_space<vmem>>, vector<32x32xf32>
    %57 = arith.truncf %56 : vector<32x32xf32> to vector<32x32xbf16>
    %c288_47 = arith.constant 288 : index
    %c0_48 = arith.constant 0 : index
    %58 = vector.load %arg4[%c288_47, %c0_48] : memref<800x64xbf16, #tpu.memory_space<vmem>>, vector<32x64xbf16>
    %cst_49 = arith.constant dense<0.000000e+00> : vector<32x64xf32>
    %59 = tpu.matmul %57, %58, %cst_49 {dimension_numbers = #tpu.dot_dimension_numbers<[1], [0], [0], [1], [0, 0, 1, 1], [], []>} : vector<32x32xbf16>, vector<32x64xbf16>, vector<32x64xf32> -> vector<32x64xf32>
    %60 = arith.addf %55, %59 : vector<32x64xf32>
    %c320 = arith.constant 320 : index
    %c0_50 = arith.constant 0 : index
    %61 = vector.load %arg11[%c320, %c0_50] : memref<800x32xf32, #tpu.memory_space<vmem>>, vector<32x32xf32>
    %62 = arith.truncf %61 : vector<32x32xf32> to vector<32x32xbf16>
    %c320_51 = arith.constant 320 : index
    %c0_52 = arith.constant 0 : index
    %63 = vector.load %arg4[%c320_51, %c0_52] : memref<800x64xbf16, #tpu.memory_space<vmem>>, vector<32x64xbf16>
    %cst_53 = arith.constant dense<0.000000e+00> : vector<32x64xf32>
    %64 = tpu.matmul %62, %63, %cst_53 {dimension_numbers = #tpu.dot_dimension_numbers<[1], [0], [0], [1], [0, 0, 1, 1], [], []>} : vector<32x32xbf16>, vector<32x64xbf16>, vector<32x64xf32> -> vector<32x64xf32>
    %65 = arith.addf %60, %64 : vector<32x64xf32>
    %c352 = arith.constant 352 : index
    %c0_54 = arith.constant 0 : index
    %66 = vector.load %arg11[%c352, %c0_54] : memref<800x32xf32, #tpu.memory_space<vmem>>, vector<32x32xf32>
    %67 = arith.truncf %66 : vector<32x32xf32> to vector<32x32xbf16>
    %c352_55 = arith.constant 352 : index
    %c0_56 = arith.constant 0 : index
    %68 = vector.load %arg4[%c352_55, %c0_56] : memref<800x64xbf16, #tpu.memory_space<vmem>>, vector<32x64xbf16>
    %cst_57 = arith.constant dense<0.000000e+00> : vector<32x64xf32>
    %69 = tpu.matmul %67, %68, %cst_57 {dimension_numbers = #tpu.dot_dimension_numbers<[1], [0], [0], [1], [0, 0, 1, 1], [], []>} : vector<32x32xbf16>, vector<32x64xbf16>, vector<32x64xf32> -> vector<32x64xf32>
    %70 = arith.addf %65, %69 : vector<32x64xf32>
    %c384 = arith.constant 384 : index
    %c0_58 = arith.constant 0 : index
    %71 = vector.load %arg11[%c384, %c0_58] : memref<800x32xf32, #tpu.memory_space<vmem>>, vector<32x32xf32>
    %72 = arith.truncf %71 : vector<32x32xf32> to vector<32x32xbf16>
    %c384_59 = arith.constant 384 : index
    %c0_60 = arith.constant 0 : index
    %73 = vector.load %arg4[%c384_59, %c0_60] : memref<800x64xbf16, #tpu.memory_space<vmem>>, vector<32x64xbf16>
    %cst_61 = arith.constant dense<0.000000e+00> : vector<32x64xf32>
    %74 = tpu.matmul %72, %73, %cst_61 {dimension_numbers = #tpu.dot_dimension_numbers<[1], [0], [0], [1], [0, 0, 1, 1], [], []>} : vector<32x32xbf16>, vector<32x64xbf16>, vector<32x64xf32> -> vector<32x64xf32>
    %75 = arith.addf %70, %74 : vector<32x64xf32>
    %c416 = arith.constant 416 : index
    %c0_62 = arith.constant 0 : index
    %76 = vector.load %arg11[%c416, %c0_62] : memref<800x32xf32, #tpu.memory_space<vmem>>, vector<32x32xf32>
    %77 = arith.truncf %76 : vector<32x32xf32> to vector<32x32xbf16>
    %c416_63 = arith.constant 416 : index
    %c0_64 = arith.constant 0 : index
    %78 = vector.load %arg4[%c416_63, %c0_64] : memref<800x64xbf16, #tpu.memory_space<vmem>>, vector<32x64xbf16>
    %cst_65 = arith.constant dense<0.000000e+00> : vector<32x64xf32>
    %79 = tpu.matmul %77, %78, %cst_65 {dimension_numbers = #tpu.dot_dimension_numbers<[1], [0], [0], [1], [0, 0, 1, 1], [], []>} : vector<32x32xbf16>, vector<32x64xbf16>, vector<32x64xf32> -> vector<32x64xf32>
    %80 = arith.addf %75, %79 : vector<32x64xf32>
    %c448 = arith.constant 448 : index
    %c0_66 = arith.constant 0 : index
    %81 = vector.load %arg11[%c448, %c0_66] : memref<800x32xf32, #tpu.memory_space<vmem>>, vector<32x32xf32>
    %82 = arith.truncf %81 : vector<32x32xf32> to vector<32x32xbf16>
    %c448_67 = arith.constant 448 : index
    %c0_68 = arith.constant 0 : index
    %83 = vector.load %arg4[%c448_67, %c0_68] : memref<800x64xbf16, #tpu.memory_space<vmem>>, vector<32x64xbf16>
    %cst_69 = arith.constant dense<0.000000e+00> : vector<32x64xf32>
    %84 = tpu.matmul %82, %83, %cst_69 {dimension_numbers = #tpu.dot_dimension_numbers<[1], [0], [0], [1], [0, 0, 1, 1], [], []>} : vector<32x32xbf16>, vector<32x64xbf16>, vector<32x64xf32> -> vector<32x64xf32>
    %85 = arith.addf %80, %84 : vector<32x64xf32>
    %c480 = arith.constant 480 : index
    %c0_70 = arith.constant 0 : index
    %86 = vector.load %arg11[%c480, %c0_70] : memref<800x32xf32, #tpu.memory_space<vmem>>, vector<32x32xf32>
    %87 = arith.truncf %86 : vector<32x32xf32> to vector<32x32xbf16>
    %c480_71 = arith.constant 480 : index
    %c0_72 = arith.constant 0 : index
    %88 = vector.load %arg4[%c480_71, %c0_72] : memref<800x64xbf16, #tpu.memory_space<vmem>>, vector<32x64xbf16>
    %cst_73 = arith.constant dense<0.000000e+00> : vector<32x64xf32>
    %89 = tpu.matmul %87, %88, %cst_73 {dimension_numbers = #tpu.dot_dimension_numbers<[1], [0], [0], [1], [0, 0, 1, 1], [], []>} : vector<32x32xbf16>, vector<32x64xbf16>, vector<32x64xf32> -> vector<32x64xf32>
    %90 = arith.addf %85, %89 : vector<32x64xf32>
    %c512 = arith.constant 512 : index
    %c0_74 = arith.constant 0 : index
    %91 = vector.load %arg11[%c512, %c0_74] : memref<800x32xf32, #tpu.memory_space<vmem>>, vector<32x32xf32>
    %92 = arith.truncf %91 : vector<32x32xf32> to vector<32x32xbf16>
    %c512_75 = arith.constant 512 : index
    %c0_76 = arith.constant 0 : index
    %93 = vector.load %arg4[%c512_75, %c0_76] : memref<800x64xbf16, #tpu.memory_space<vmem>>, vector<32x64xbf16>
    %cst_77 = arith.constant dense<0.000000e+00> : vector<32x64xf32>
    %94 = tpu.matmul %92, %93, %cst_77 {dimension_numbers = #tpu.dot_dimension_numbers<[1], [0], [0], [1], [0, 0, 1, 1], [], []>} : vector<32x32xbf16>, vector<32x64xbf16>, vector<32x64xf32> -> vector<32x64xf32>
    %95 = arith.addf %90, %94 : vector<32x64xf32>
    %c544 = arith.constant 544 : index
    %c0_78 = arith.constant 0 : index
    %96 = vector.load %arg11[%c544, %c0_78] : memref<800x32xf32, #tpu.memory_space<vmem>>, vector<32x32xf32>
    %97 = arith.truncf %96 : vector<32x32xf32> to vector<32x32xbf16>
    %c544_79 = arith.constant 544 : index
    %c0_80 = arith.constant 0 : index
    %98 = vector.load %arg4[%c544_79, %c0_80] : memref<800x64xbf16, #tpu.memory_space<vmem>>, vector<32x64xbf16>
    %cst_81 = arith.constant dense<0.000000e+00> : vector<32x64xf32>
    %99 = tpu.matmul %97, %98, %cst_81 {dimension_numbers = #tpu.dot_dimension_numbers<[1], [0], [0], [1], [0, 0, 1, 1], [], []>} : vector<32x32xbf16>, vector<32x64xbf16>, vector<32x64xf32> -> vector<32x64xf32>
    %100 = arith.addf %95, %99 : vector<32x64xf32>
    %c576 = arith.constant 576 : index
    %c0_82 = arith.constant 0 : index
    %101 = vector.load %arg11[%c576, %c0_82] : memref<800x32xf32, #tpu.memory_space<vmem>>, vector<32x32xf32>
    %102 = arith.truncf %101 : vector<32x32xf32> to vector<32x32xbf16>
    %c576_83 = arith.constant 576 : index
    %c0_84 = arith.constant 0 : index
    %103 = vector.load %arg4[%c576_83, %c0_84] : memref<800x64xbf16, #tpu.memory_space<vmem>>, vector<32x64xbf16>
    %cst_85 = arith.constant dense<0.000000e+00> : vector<32x64xf32>
    %104 = tpu.matmul %102, %103, %cst_85 {dimension_numbers = #tpu.dot_dimension_numbers<[1], [0], [0], [1], [0, 0, 1, 1], [], []>} : vector<32x32xbf16>, vector<32x64xbf16>, vector<32x64xf32> -> vector<32x64xf32>
    %105 = arith.addf %100, %104 : vector<32x64xf32>
    %c608 = arith.constant 608 : index
    %c0_86 = arith.constant 0 : index
    %106 = vector.load %arg11[%c608, %c0_86] : memref<800x32xf32, #tpu.memory_space<vmem>>, vector<32x32xf32>
    %107 = arith.truncf %106 : vector<32x32xf32> to vector<32x32xbf16>
    %c608_87 = arith.constant 608 : index
    %c0_88 = arith.constant 0 : index
    %108 = vector.load %arg4[%c608_87, %c0_88] : memref<800x64xbf16, #tpu.memory_space<vmem>>, vector<32x64xbf16>
    %cst_89 = arith.constant dense<0.000000e+00> : vector<32x64xf32>
    %109 = tpu.matmul %107, %108, %cst_89 {dimension_numbers = #tpu.dot_dimension_numbers<[1], [0], [0], [1], [0, 0, 1, 1], [], []>} : vector<32x32xbf16>, vector<32x64xbf16>, vector<32x64xf32> -> vector<32x64xf32>
    %110 = arith.addf %105, %109 : vector<32x64xf32>
    %c640 = arith.constant 640 : index
    %c0_90 = arith.constant 0 : index
    %111 = vector.load %arg11[%c640, %c0_90] : memref<800x32xf32, #tpu.memory_space<vmem>>, vector<32x32xf32>
    %112 = arith.truncf %111 : vector<32x32xf32> to vector<32x32xbf16>
    %c640_91 = arith.constant 640 : index
    %c0_92 = arith.constant 0 : index
    %113 = vector.load %arg4[%c640_91, %c0_92] : memref<800x64xbf16, #tpu.memory_space<vmem>>, vector<32x64xbf16>
    %cst_93 = arith.constant dense<0.000000e+00> : vector<32x64xf32>
    %114 = tpu.matmul %112, %113, %cst_93 {dimension_numbers = #tpu.dot_dimension_numbers<[1], [0], [0], [1], [0, 0, 1, 1], [], []>} : vector<32x32xbf16>, vector<32x64xbf16>, vector<32x64xf32> -> vector<32x64xf32>
    %115 = arith.addf %110, %114 : vector<32x64xf32>
    %c672 = arith.constant 672 : index
    %c0_94 = arith.constant 0 : index
    %116 = vector.load %arg11[%c672, %c0_94] : memref<800x32xf32, #tpu.memory_space<vmem>>, vector<32x32xf32>
    %117 = arith.truncf %116 : vector<32x32xf32> to vector<32x32xbf16>
    %c672_95 = arith.constant 672 : index
    %c0_96 = arith.constant 0 : index
    %118 = vector.load %arg4[%c672_95, %c0_96] : memref<800x64xbf16, #tpu.memory_space<vmem>>, vector<32x64xbf16>
    %cst_97 = arith.constant dense<0.000000e+00> : vector<32x64xf32>
    %119 = tpu.matmul %117, %118, %cst_97 {dimension_numbers = #tpu.dot_dimension_numbers<[1], [0], [0], [1], [0, 0, 1, 1], [], []>} : vector<32x32xbf16>, vector<32x64xbf16>, vector<32x64xf32> -> vector<32x64xf32>
    %120 = arith.addf %115, %119 : vector<32x64xf32>
    %c704 = arith.constant 704 : index
    %c0_98 = arith.constant 0 : index
    %121 = vector.load %arg11[%c704, %c0_98] : memref<800x32xf32, #tpu.memory_space<vmem>>, vector<32x32xf32>
    %122 = arith.truncf %121 : vector<32x32xf32> to vector<32x32xbf16>
    %c704_99 = arith.constant 704 : index
    %c0_100 = arith.constant 0 : index
    %123 = vector.load %arg4[%c704_99, %c0_100] : memref<800x64xbf16, #tpu.memory_space<vmem>>, vector<32x64xbf16>
    %cst_101 = arith.constant dense<0.000000e+00> : vector<32x64xf32>
    %124 = tpu.matmul %122, %123, %cst_101 {dimension_numbers = #tpu.dot_dimension_numbers<[1], [0], [0], [1], [0, 0, 1, 1], [], []>} : vector<32x32xbf16>, vector<32x64xbf16>, vector<32x64xf32> -> vector<32x64xf32>
    %125 = arith.addf %120, %124 : vector<32x64xf32>
    %c736 = arith.constant 736 : index
    %c0_102 = arith.constant 0 : index
    %126 = vector.load %arg11[%c736, %c0_102] : memref<800x32xf32, #tpu.memory_space<vmem>>, vector<32x32xf32>
    %127 = arith.truncf %126 : vector<32x32xf32> to vector<32x32xbf16>
    %c736_103 = arith.constant 736 : index
    %c0_104 = arith.constant 0 : index
    %128 = vector.load %arg4[%c736_103, %c0_104] : memref<800x64xbf16, #tpu.memory_space<vmem>>, vector<32x64xbf16>
    %cst_105 = arith.constant dense<0.000000e+00> : vector<32x64xf32>
    %129 = tpu.matmul %127, %128, %cst_105 {dimension_numbers = #tpu.dot_dimension_numbers<[1], [0], [0], [1], [0, 0, 1, 1], [], []>} : vector<32x32xbf16>, vector<32x64xbf16>, vector<32x64xf32> -> vector<32x64xf32>
    %130 = arith.addf %125, %129 : vector<32x64xf32>
    %c768 = arith.constant 768 : index
    %c0_106 = arith.constant 0 : index
    %131 = vector.load %arg11[%c768, %c0_106] : memref<800x32xf32, #tpu.memory_space<vmem>>, vector<32x32xf32>
    %132 = arith.truncf %131 : vector<32x32xf32> to vector<32x32xbf16>
    %c768_107 = arith.constant 768 : index
    %c0_108 = arith.constant 0 : index
    %133 = vector.load %arg4[%c768_107, %c0_108] : memref<800x64xbf16, #tpu.memory_space<vmem>>, vector<32x64xbf16>
    %cst_109 = arith.constant dense<0.000000e+00> : vector<32x64xf32>
    %134 = tpu.matmul %132, %133, %cst_109 {dimension_numbers = #tpu.dot_dimension_numbers<[1], [0], [0], [1], [0, 0, 1, 1], [], []>} : vector<32x32xbf16>, vector<32x64xbf16>, vector<32x64xf32> -> vector<32x64xf32>
    %135 = arith.addf %130, %134 : vector<32x64xf32>
    %c0_110 = arith.constant 0 : index
    %c0_111 = arith.constant 0 : index
    %136 = vector.load %arg5[%c0_110, %c0_111] : memref<1x64xf32, #tpu.memory_space<vmem>>, vector<1x64xf32>
    %137 = vector.broadcast %136 : vector<1x64xf32> to vector<32x64xf32>
    %138 = arith.addf %135, %137 : vector<32x64xf32>
    %cst_112 = arith.constant 0.000000e+00 : f32
    %139 = vector.broadcast %cst_112 : f32 to vector<32x64xf32>
    %140 = arith.maximumf %138, %139 : vector<32x64xf32>
    %c0_113 = arith.constant 0 : index
    %c0_114 = arith.constant 0 : index
    %141 = vector.load %arg12[%c0_113, %c0_114] : memref<32x64xf32, #tpu.memory_space<vmem>>, vector<32x64xf32>
    tpu.vector_store %arg12[%c0_113, %c0_114], %140 {strides = array<i32>} : memref<32x64xf32, #tpu.memory_space<vmem>>, vector<32x64xf32>,
    %c0_115 = arith.constant 0 : index
    %c0_116 = arith.constant 0 : index
    %142 = vector.load %arg12[%c0_115, %c0_116] : memref<32x64xf32, #tpu.memory_space<vmem>>, vector<2x64xf32>
    %c0_117 = arith.constant 0 : index
    %c0_118 = arith.constant 0 : index
    %143 = vector.load %arg13[%c0_117, %c0_118] : memref<2x1024xf32, #tpu.memory_space<vmem>>, vector<2x64xf32>
    tpu.vector_store %arg13[%c0_117, %c0_118], %142 {strides = array<i32>} : memref<2x1024xf32, #tpu.memory_space<vmem>>, vector<2x64xf32>,
    %c2 = arith.constant 2 : index
    %c0_119 = arith.constant 0 : index
    %144 = vector.load %arg12[%c2, %c0_119] : memref<32x64xf32, #tpu.memory_space<vmem>>, vector<2x64xf32>
    %c0_120 = arith.constant 0 : index
    %c64_121 = arith.constant 64 : index
    %145 = vector.load %arg13[%c0_120, %c64_121] : memref<2x1024xf32, #tpu.memory_space<vmem>>, vector<2x64xf32>
    tpu.vector_store %arg13[%c0_120, %c64_121], %144 {strides = array<i32>} : memref<2x1024xf32, #tpu.memory_space<vmem>>, vector<2x64xf32>,
    %c4 = arith.constant 4 : index
    %c0_122 = arith.constant 0 : index
    %146 = vector.load %arg12[%c4, %c0_122] : memref<32x64xf32, #tpu.memory_space<vmem>>, vector<2x64xf32>
    %c0_123 = arith.constant 0 : index
    %c128_124 = arith.constant 128 : index
    %147 = vector.load %arg13[%c0_123, %c128_124] : memref<2x1024xf32, #tpu.memory_space<vmem>>, vector<2x64xf32>
    tpu.vector_store %arg13[%c0_123, %c128_124], %146 {strides = array<i32>} : memref<2x1024xf32, #tpu.memory_space<vmem>>, vector<2x64xf32>,
    %c6 = arith.constant 6 : index
    %c0_125 = arith.constant 0 : index
    %148 = vector.load %arg12[%c6, %c0_125] : memref<32x64xf32, #tpu.memory_space<vmem>>, vector<2x64xf32>
    %c0_126 = arith.constant 0 : index
    %c192_127 = arith.constant 192 : index
    %149 = vector.load %arg13[%c0_126, %c192_127] : memref<2x1024xf32, #tpu.memory_space<vmem>>, vector<2x64xf32>
    tpu.vector_store %arg13[%c0_126, %c192_127], %148 {strides = array<i32>} : memref<2x1024xf32, #tpu.memory_space<vmem>>, vector<2x64xf32>,
    %c8 = arith.constant 8 : index
    %c0_128 = arith.constant 0 : index
    %150 = vector.load %arg12[%c8, %c0_128] : memref<32x64xf32, #tpu.memory_space<vmem>>, vector<2x64xf32>
    %c0_129 = arith.constant 0 : index
    %c256_130 = arith.constant 256 : index
    %151 = vector.load %arg13[%c0_129, %c256_130] : memref<2x1024xf32, #tpu.memory_space<vmem>>, vector<2x64xf32>
    tpu.vector_store %arg13[%c0_129, %c256_130], %150 {strides = array<i32>} : memref<2x1024xf32, #tpu.memory_space<vmem>>, vector<2x64xf32>,
    %c10 = arith.constant 10 : index
    %c0_131 = arith.constant 0 : index
    %152 = vector.load %arg12[%c10, %c0_131] : memref<32x64xf32, #tpu.memory_space<vmem>>, vector<2x64xf32>
    %c0_132 = arith.constant 0 : index
    %c320_133 = arith.constant 320 : index
    %153 = vector.load %arg13[%c0_132, %c320_133] : memref<2x1024xf32, #tpu.memory_space<vmem>>, vector<2x64xf32>
    tpu.vector_store %arg13[%c0_132, %c320_133], %152 {strides = array<i32>} : memref<2x1024xf32, #tpu.memory_space<vmem>>, vector<2x64xf32>,
    %c12 = arith.constant 12 : index
    %c0_134 = arith.constant 0 : index
    %154 = vector.load %arg12[%c12, %c0_134] : memref<32x64xf32, #tpu.memory_space<vmem>>, vector<2x64xf32>
    %c0_135 = arith.constant 0 : index
    %c384_136 = arith.constant 384 : index
    %155 = vector.load %arg13[%c0_135, %c384_136] : memref<2x1024xf32, #tpu.memory_space<vmem>>, vector<2x64xf32>
    tpu.vector_store %arg13[%c0_135, %c384_136], %154 {strides = array<i32>} : memref<2x1024xf32, #tpu.memory_space<vmem>>, vector<2x64xf32>,
    %c14 = arith.constant 14 : index
    %c0_137 = arith.constant 0 : index
    %156 = vector.load %arg12[%c14, %c0_137] : memref<32x64xf32, #tpu.memory_space<vmem>>, vector<2x64xf32>
    %c0_138 = arith.constant 0 : index
    %c448_139 = arith.constant 448 : index
    %157 = vector.load %arg13[%c0_138, %c448_139] : memref<2x1024xf32, #tpu.memory_space<vmem>>, vector<2x64xf32>
    tpu.vector_store %arg13[%c0_138, %c448_139], %156 {strides = array<i32>} : memref<2x1024xf32, #tpu.memory_space<vmem>>, vector<2x64xf32>,
    %c16 = arith.constant 16 : index
    %c0_140 = arith.constant 0 : index
    %158 = vector.load %arg12[%c16, %c0_140] : memref<32x64xf32, #tpu.memory_space<vmem>>, vector<2x64xf32>
    %c0_141 = arith.constant 0 : index
    %c512_142 = arith.constant 512 : index
    %159 = vector.load %arg13[%c0_141, %c512_142] : memref<2x1024xf32, #tpu.memory_space<vmem>>, vector<2x64xf32>
    tpu.vector_store %arg13[%c0_141, %c512_142], %158 {strides = array<i32>} : memref<2x1024xf32, #tpu.memory_space<vmem>>, vector<2x64xf32>,
    %c18 = arith.constant 18 : index
    %c0_143 = arith.constant 0 : index
    %160 = vector.load %arg12[%c18, %c0_143] : memref<32x64xf32, #tpu.memory_space<vmem>>, vector<2x64xf32>
    %c0_144 = arith.constant 0 : index
    %c576_145 = arith.constant 576 : index
    %161 = vector.load %arg13[%c0_144, %c576_145] : memref<2x1024xf32, #tpu.memory_space<vmem>>, vector<2x64xf32>
    tpu.vector_store %arg13[%c0_144, %c576_145], %160 {strides = array<i32>} : memref<2x1024xf32, #tpu.memory_space<vmem>>, vector<2x64xf32>,
    %c20 = arith.constant 20 : index
    %c0_146 = arith.constant 0 : index
    %162 = vector.load %arg12[%c20, %c0_146] : memref<32x64xf32, #tpu.memory_space<vmem>>, vector<2x64xf32>
    %c0_147 = arith.constant 0 : index
    %c640_148 = arith.constant 640 : index
    %163 = vector.load %arg13[%c0_147, %c640_148] : memref<2x1024xf32, #tpu.memory_space<vmem>>, vector<2x64xf32>
    tpu.vector_store %arg13[%c0_147, %c640_148], %162 {strides = array<i32>} : memref<2x1024xf32, #tpu.memory_space<vmem>>, vector<2x64xf32>,
    %c22 = arith.constant 22 : index
    %c0_149 = arith.constant 0 : index
    %164 = vector.load %arg12[%c22, %c0_149] : memref<32x64xf32, #tpu.memory_space<vmem>>, vector<2x64xf32>
    %c0_150 = arith.constant 0 : index
    %c704_151 = arith.constant 704 : index
    %165 = vector.load %arg13[%c0_150, %c704_151] : memref<2x1024xf32, #tpu.memory_space<vmem>>, vector<2x64xf32>
    tpu.vector_store %arg13[%c0_150, %c704_151], %164 {strides = array<i32>} : memref<2x1024xf32, #tpu.memory_space<vmem>>, vector<2x64xf32>,
    %c24 = arith.constant 24 : index
    %c0_152 = arith.constant 0 : index
    %166 = vector.load %arg12[%c24, %c0_152] : memref<32x64xf32, #tpu.memory_space<vmem>>, vector<2x64xf32>
    %c0_153 = arith.constant 0 : index
    %c768_154 = arith.constant 768 : index
    %167 = vector.load %arg13[%c0_153, %c768_154] : memref<2x1024xf32, #tpu.memory_space<vmem>>, vector<2x64xf32>
    tpu.vector_store %arg13[%c0_153, %c768_154], %166 {strides = array<i32>} : memref<2x1024xf32, #tpu.memory_space<vmem>>, vector<2x64xf32>,
    %c26 = arith.constant 26 : index
    %c0_155 = arith.constant 0 : index
    %168 = vector.load %arg12[%c26, %c0_155] : memref<32x64xf32, #tpu.memory_space<vmem>>, vector<2x64xf32>
    %c0_156 = arith.constant 0 : index
    %c832 = arith.constant 832 : index
    %169 = vector.load %arg13[%c0_156, %c832] : memref<2x1024xf32, #tpu.memory_space<vmem>>, vector<2x64xf32>
    tpu.vector_store %arg13[%c0_156, %c832], %168 {strides = array<i32>} : memref<2x1024xf32, #tpu.memory_space<vmem>>, vector<2x64xf32>,
    %c28 = arith.constant 28 : index
    %c0_157 = arith.constant 0 : index
    %170 = vector.load %arg12[%c28, %c0_157] : memref<32x64xf32, #tpu.memory_space<vmem>>, vector<2x64xf32>
    %c0_158 = arith.constant 0 : index
    %c896 = arith.constant 896 : index
    %171 = vector.load %arg13[%c0_158, %c896] : memref<2x1024xf32, #tpu.memory_space<vmem>>, vector<2x64xf32>
    tpu.vector_store %arg13[%c0_158, %c896], %170 {strides = array<i32>} : memref<2x1024xf32, #tpu.memory_space<vmem>>, vector<2x64xf32>,
    %c30 = arith.constant 30 : index
    %c0_159 = arith.constant 0 : index
    %172 = vector.load %arg12[%c30, %c0_159] : memref<32x64xf32, #tpu.memory_space<vmem>>, vector<2x64xf32>
    %c0_160 = arith.constant 0 : index
    %c960 = arith.constant 960 : index
    %173 = vector.load %arg13[%c0_160, %c960] : memref<2x1024xf32, #tpu.memory_space<vmem>>, vector<2x64xf32>
    tpu.vector_store %arg13[%c0_160, %c960], %172 {strides = array<i32>} : memref<2x1024xf32, #tpu.memory_space<vmem>>, vector<2x64xf32>,
    %c0_161 = arith.constant 0 : index
    %c0_162 = arith.constant 0 : index
    %174 = vector.load %arg13[%c0_161, %c0_162] : memref<2x1024xf32, #tpu.memory_space<vmem>>, vector<2x1024xf32>
    %175 = arith.truncf %174 : vector<2x1024xf32> to vector<2x1024xbf16>
    %c0_163 = arith.constant 0 : index
    %c0_164 = arith.constant 0 : index
    %176 = vector.load %arg6[%c0_163, %c0_164] : memref<1024x1024xbf16, #tpu.memory_space<vmem>>, vector<1024x1024xbf16>
    %cst_165 = arith.constant dense<0.000000e+00> : vector<2x1024xf32>
    %177 = tpu.matmul %175, %176, %cst_165 {dimension_numbers = #tpu.dot_dimension_numbers<[1], [0], [0], [1], [0, 0, 1, 1], [], []>} : vector<2x1024xbf16>, vector<1024x1024xbf16>, vector<2x1024xf32> -> vector<2x1024xf32>
    %c0_166 = arith.constant 0 : index
    %c0_167 = arith.constant 0 : index
    %178 = vector.load %arg7[%c0_166, %c0_167] : memref<1x1024xf32, #tpu.memory_space<vmem>>, vector<1x1024xf32>
    %179 = vector.broadcast %178 : vector<1x1024xf32> to vector<2x1024xf32>
    %180 = arith.addf %177, %179 : vector<2x1024xf32>
    %cst_168 = arith.constant 0.000000e+00 : f32
    %181 = vector.broadcast %cst_168 : f32 to vector<2x1024xf32>
    %182 = arith.maximumf %180, %181 : vector<2x1024xf32>
    %183 = arith.truncf %182 : vector<2x1024xf32> to vector<2x1024xbf16>
    %c0_169 = arith.constant 0 : index
    %c0_170 = arith.constant 0 : index
    %184 = vector.load %arg8[%c0_169, %c0_170] : memref<1024x128xbf16, #tpu.memory_space<vmem>>, vector<1024x128xbf16>
    %cst_171 = arith.constant dense<0.000000e+00> : vector<2x128xf32>
    %185 = tpu.matmul %183, %184, %cst_171 {dimension_numbers = #tpu.dot_dimension_numbers<[1], [0], [0], [1], [0, 0, 1, 1], [], []>} : vector<2x1024xbf16>, vector<1024x128xbf16>, vector<2x128xf32> -> vector<2x128xf32>
    %c0_172 = arith.constant 0 : index
    %c0_173 = arith.constant 0 : index
    %186 = vector.load %arg9[%c0_172, %c0_173] : memref<1x128xf32, #tpu.memory_space<vmem>>, vector<1x128xf32>
    %187 = vector.broadcast %186 : vector<1x128xf32> to vector<2x128xf32>
    %188 = arith.addf %185, %187 : vector<2x128xf32>
    %c0_174 = arith.constant 0 : index
    %c0_175 = arith.constant 0 : index
    %189 = vector.load %arg10[%c0_174, %c0_175] : memref<2x128xf32, #tpu.memory_space<vmem>>, vector<2x128xf32>
    tpu.vector_store %arg10[%c0_174, %c0_175], %188 {strides = array<i32>} : memref<2x128xf32, #tpu.memory_space<vmem>>, vector<2x128xf32>,
    return
  }
  func.func @transform_0(%arg0: i32) -> (i32, i32) {
    %c0_i32 = arith.constant 0 : i32
    %c0_i32_0 = arith.constant 0 : i32
    %c0_i32_1 = arith.constant 0 : i32
    return %c0_i32, %c0_i32_0 : i32, i32
  }
  func.func @transform_1(%arg0: i32) -> (i32, i32) {
    %c0_i32 = arith.constant 0 : i32
    %c0_i32_0 = arith.constant 0 : i32
    %c0_i32_1 = arith.constant 0 : i32
    return %c0_i32, %c0_i32_0 : i32, i32
  }
  func.func @transform_2(%arg0: i32) -> (i32, i32) {
    %c0_i32 = arith.constant 0 : i32
    %c0_i32_0 = arith.constant 0 : i32
    %c0_i32_1 = arith.constant 0 : i32
    return %c0_i32, %c0_i32_0 : i32, i32
  }
  func.func @transform_3(%arg0: i32) -> (i32, i32) {
    %c0_i32 = arith.constant 0 : i32
    %c0_i32_0 = arith.constant 0 : i32
    %c0_i32_1 = arith.constant 0 : i32
    return %c0_i32, %c0_i32_0 : i32, i32
  }
  func.func @transform_4(%arg0: i32) -> (i32, i32) {
    %c0_i32 = arith.constant 0 : i32
    %c0_i32_0 = arith.constant 0 : i32
    %c0_i32_1 = arith.constant 0 : i32
    return %c0_i32, %c0_i32_0 : i32, i32
  }
  func.func @transform_5(%arg0: i32) -> (i32, i32) {
    %c0_i32 = arith.constant 0 : i32
    %c0_i32_0 = arith.constant 0 : i32
    %c0_i32_1 = arith.constant 0 : i32
    return %c0_i32, %c0_i32_0 : i32, i32
  }
  func.func @transform_6(%arg0: i32) -> (i32, i32) {
    %c0_i32 = arith.constant 0 : i32
    %c0_i32_0 = arith.constant 0 : i32
    %c0_i32_1 = arith.constant 0 : i32
    return %c0_i32, %c0_i32_0 : i32, i32
  }
  func.func @transform_7(%arg0: i32) -> (i32, i32) {
    %c0_i32 = arith.constant 0 : i32
    %c0_i32_0 = arith.constant 0 : i32
    %c0_i32_1 = arith.constant 0 : i32
    return %c0_i32, %c0_i32_0 : i32, i32
  }
  func.func @transform_8(%arg0: i32) -> (i32, i32) {
    %c0_i32 = arith.constant 0 : i32
    %c0_i32_0 = arith.constant 0 : i32
    %c0_i32_1 = arith.constant 0 : i32
    return %c0_i32, %c0_i32_0 : i32, i32
  }
  func.func @transform_9(%arg0: i32) -> (i32, i32) {
    %c0_i32 = arith.constant 0 : i32
    %c0_i32_0 = arith.constant 0 : i32
    %c0_i32_1 = arith.constant 0 : i32
    return %c0_i32, %c0_i32_0 : i32, i32
  }
}

</mosaic_0001>

<bundles_post_ra>
// kernel: net_forward.1
= control target key start
LH: loop header
LB: loop body
LE: loop exit
PB: predicated region body
PF: predicated region fallthrough
CT: control target
= control target key end

     0   :  { %vm357_vm0 = vcmask 1043456   ;;  %vm358_vm1 = vcmask 1044480   ;;  %v9120_v1 = vmov 65535   ;;  %vm206_vm2 = vcmask 203776   ;;  %s11877_s0 = inlined_call_operand.vmem [shape: f32[800,25], index: 0, kind: input, shape index: {}]   ;;  %s11878_s1 = inlined_call_operand.vmem [shape: bf16[25,32], index: 1, kind: input, shape index: {}]   ;;  %s11879_s2 = inlined_call_operand.vmem [shape: f32[1,32], index: 2, kind: input, shape index: {}]   ;;  %s11880_s3 = inlined_call_operand.vmem [shape: bf16[800,64], index: 3, kind: input, shape index: {}]   ;;  %s11881_s4 = inlined_call_operand.vmem [shape: f32[1,64], index: 4, kind: input, shape index: {}]   ;;  %s11882_s5 = inlined_call_operand.vmem [shape: bf16[1024,1024], index: 5, kind: input, shape index: {}]   ;;  %s11883_s6 = inlined_call_operand.vmem [shape: f32[1,1024], index: 6, kind: input, shape index: {}]   ;;  %s11884_s7 = inlined_call_operand.vmem [shape: bf16[1024,128], index: 7, kind: input, shape index: {}]   ;;  %s11885_s8 = inlined_call_operand.vmem [shape: f32[1,128], index: 8, kind: input, shape index: {}]   ;;  %s11886_s9 = inlined_call_operand.hbm [shape: f32[2,128], index: 9, kind: output, shape index: {}]  }
   0x1   :  { %v8978_v0 = vld [vmem:[%s11878_s1 + $0x8] sm:$0x1f]   ;;  %v359_v2 = vsel %vm357_vm0, 4294967295, %v9120_v1  ;;  %v34_v3 = vld [vmem:[%s11877_s0] sm:$0xff]  ;;  %v36_v9 = vld [vmem:[%s11877_s0 + $0x10] sm:$0xff] }
   0x2   :  { %v35_v4 = vld [vmem:[%s11877_s0 + $0x8] sm:$0xff]  ;;  %v360_v5 = vsel %vm358_vm1, %v359_v2, 0  ;;  %v8979_v8 = vld [vmem:[%s11878_s1] sm:$0xff]   ;;  %v37_v10 = vld [vmem:[%s11877_s0 + $0x18] sm:$0xff] }
   0x3   :  { %v134_v6 = vpack.c.bf16 %v35_v4, %v34_v3  ;;  %v362_v7 = vand.u32 %v8978_v0, %v360_v5  ;;  %v38_v11 = vld [vmem:[%s11877_s0 + $0x20] sm:$0xff]  ;;  %v39_v12 = vld [vmem:[%s11877_s0 + $0x28] sm:$0xff]  ;;  %v135_v13 = vpack.c.bf16 %v37_v10, %v36_v9  ;;  %v40_v15 = vld [vmem:[%s11877_s0 + $0x30] sm:$0xff] }
   0x4   :  { %v136_v14 = vpack.c.bf16 %v39_v12, %v38_v11  ;;  %v41_v16 = vld [vmem:[%s11877_s0 + $0x38] sm:$0xff]  ;;  %v42_v17 = vld [vmem:[%s11877_s0 + $0x40] sm:$0xff]  ;;  %v43_v18 = vld [vmem:[%s11877_s0 + $0x48] sm:$0xff] }
   0x5   :  { %8674 = vmatprep.mubr.msk.bf16.mxu0 %vm206_vm2, %v134_v6  ;;  %8670 = vmatprep.subr.bf16.mxu0 %v362_v7  ;;  %v137_v19 = vpack.c.bf16 %v41_v16, %v40_v15  ;;  %v138_v20 = vpack.c.bf16 %v43_v18, %v42_v17  ;;  %v44_v21 = vld [vmem:[%s11877_s0 + $0x50] sm:$0xff]  ;;  %v45_v22 = vld [vmem:[%s11877_s0 + $0x58] sm:$0xff]  ;;  %v46_v23 = vld [vmem:[%s11877_s0 + $0x60] sm:$0xff] }
   0x6   :  { %8671 = vmatpush3.bf16.msra.mxu0 %v362_v7  ;;  %v47_v24 = vld [vmem:[%s11877_s0 + $0x68] sm:$0xff]  ;;  %v139_v25 = vpack.c.bf16 %v45_v22, %v44_v21  ;;  %v48_v27 = vld [vmem:[%s11877_s0 + $0x70] sm:$0xff]  ;;  %v49_v28 = vld [vmem:[%s11877_s0 + $0x78] sm:$0xff] }
   0x7   :  { %8672 = vmatprep.subr.bf16.mxu0 %v8979_v8  ;;  %v140_v26 = vpack.c.bf16 %v47_v24, %v46_v23  ;;  %v50_v29 = vld [vmem:[%s11877_s0 + $0x80] sm:$0xff]  ;;  %v51_v30 = vld [vmem:[%s11877_s0 + $0x88] sm:$0xff]  ;;  %v141_v31 = vpack.c.bf16 %v49_v28, %v48_v27  ;;  %v52_v33 = vld [vmem:[%s11877_s0 + $0x90] sm:$0xff] }
   0x8   :  { %v142_v32 = vpack.c.bf16 %v51_v30, %v50_v29  ;;  %v53_v34 = vld [vmem:[%s11877_s0 + $0x98] sm:$0xff]  ;;  %v54_v35 = vld [vmem:[%s11877_s0 + $0xa0] sm:$0xff]  ;;  %v55_v36 = vld [vmem:[%s11877_s0 + $0xa8] sm:$0xff] }
   0x9   :  { %v143_v37 = vpack.c.bf16 %v53_v34, %v52_v33  ;;  %v144_v38 = vpack.c.bf16 %v55_v36, %v54_v35  ;;  %v56_v39 = vld [vmem:[%s11877_s0 + $0xb0] sm:$0xff]  ;;  %v57_v40 = vld [vmem:[%s11877_s0 + $0xb8] sm:$0xff]  ;;  %v58_v41 = vld [vmem:[%s11877_s0 + $0xc0] sm:$0xff] }
   0xa   :  { %8673 = vmatpush3.bf16.msra.mxu0 %v8979_v8  ;;  %v59_v42 = vld [vmem:[%s11877_s0 + $0xc8] sm:$0xff]  ;;  %v145_v43 = vpack.c.bf16 %v57_v40, %v56_v39  ;;  %v60_v45 = vld [vmem:[%s11877_s0 + $0xd0] sm:$0xff]  ;;  %v61_v46 = vld [vmem:[%s11877_s0 + $0xd8] sm:$0xff] }
   0xb   :  { %v146_v44 = vpack.c.bf16 %v59_v42, %v58_v41  ;;  %v62_v47 = vld [vmem:[%s11877_s0 + $0xe0] sm:$0xff]  ;;  %v63_v48 = vld [vmem:[%s11877_s0 + $0xe8] sm:$0xff]  ;;  %v147_v49 = vpack.c.bf16 %v61_v46, %v60_v45  ;;  %v64_v51 = vld [vmem:[%s11877_s0 + $0xf0] sm:$0xff] }
   0xc   :  { %v148_v50 = vpack.c.bf16 %v63_v48, %v62_v47  ;;  %v65_v52 = vld [vmem:[%s11877_s0 + $0xf8] sm:$0xff]  ;;  %v66_v53 = vld [vmem:[%s11877_s0 + $0x100] sm:$0xff]  ;;  %v67_v54 = vld [vmem:[%s11877_s0 + $0x108] sm:$0xff] }
   0xd   :  { %8675 = vmatmul.mubr.msk.bf16.vlgmr.msra.gmra.mxu0 %vm206_vm2, %v135_v13  ;;  %v149_v55 = vpack.c.bf16 %v65_v52, %v64_v51  ;;  %v150_v56 = vpack.c.bf16 %v67_v54, %v66_v53  ;;  %v68_v57 = vld [vmem:[%s11877_s0 + $0x110] sm:$0xff]  ;;  %v69_v58 = vld [vmem:[%s11877_s0 + $0x118] sm:$0xff]  ;;  %v70_v59 = vld [vmem:[%s11877_s0 + $0x120] sm:$0xff] }
   0xe   :  { %8678 = vmatprep.mubr.msk.bf16.mxu0 %vm206_vm2, %v136_v14  ;;  %v71_v60 = vld [vmem:[%s11877_s0 + $0x128] sm:$0xff]  ;;  %v151_v61 = vpack.c.bf16 %v69_v58, %v68_v57  ;;  %v72_v63 = vld [vmem:[%s11877_s0 + $0x130] sm:$0xff]  ;;  %v73_v0 = vld [vmem:[%s11877_s0 + $0x138] sm:$0xff] }
   0xf   :  { %v152_v62 = vpack.c.bf16 %v71_v60, %v70_v59  ;;  %v74_v1 = vld [vmem:[%s11877_s0 + $0x140] sm:$0xff]  ;;  %v75_v2 = vld [vmem:[%s11877_s0 + $0x148] sm:$0xff]  ;;  %v153_v3 = vpack.c.bf16 %v73_v0, %v72_v63  ;;  %v76_v5 = vld [vmem:[%s11877_s0 + $0x150] sm:$0xff] }
  0x10   :  { %v154_v4 = vpack.c.bf16 %v75_v2, %v74_v1  ;;  %v77_v6 = vld [vmem:[%s11877_s0 + $0x158] sm:$0xff]  ;;  %v78_v7 = vld [vmem:[%s11877_s0 + $0x160] sm:$0xff]  ;;  %v79_v8 = vld [vmem:[%s11877_s0 + $0x168] sm:$0xff] }
  0x11   :  { %v155_v9 = vpack.c.bf16 %v77_v6, %v76_v5  ;;  %v156_v10 = vpack.c.bf16 %v79_v8, %v78_v7  ;;  %v80_v11 = vld [vmem:[%s11877_s0 + $0x170] sm:$0xff]  ;;  %v81_v12 = vld [vmem:[%s11877_s0 + $0x178] sm:$0xff]  ;;  %v82_v13 = vld [vmem:[%s11877_s0 + $0x180] sm:$0xff] }
  0x12   :  { %v83_v14 = vld [vmem:[%s11877_s0 + $0x188] sm:$0xff]  ;;  %v157_v15 = vpack.c.bf16 %v81_v12, %v80_v11  ;;  %v8980_v16 = vld [vmem:[%s11880_s3 + $0x18] sm:$0xff]   ;;  %v84_v18 = vld [vmem:[%s11877_s0 + $0x190] sm:$0xff] }
  0x13   :  { %v158_v17 = vpack.c.bf16 %v83_v14, %v82_v13  ;;  %8774 = vmatprep.subr.bf16.mxu1 %v8980_v16  ;;  %v87_v21 = vld [vmem:[%s11877_s0 + $0x1a8] sm:$0xff]  ;;  %v8981_v22 = vld [vmem:[%s11880_s3 + $0x10] sm:$0xff]   ;;  %v89_v27 = vld [vmem:[%s11877_s0 + $0x1b8] sm:$0xff] }
  0x14   :  { %8775 = vmatpush3.bf16.msra.mxu1 %v8980_v16  ;;  %v9376_v24 = vld [vmem:[%s11880_s3 + $0x8] sm:$0xff]   ;;  %v90_v28 = vld [vmem:[%s11877_s0 + $0x1c0] sm:$0xff] }
  0x15   :  { %8679 = vmatmul.mubr.msk.bf16.gmra.mxu0 %vm206_vm2, %v137_v19  ;;  %v85_v19 = vld [vmem:[%s11877_s0 + $0x198] sm:$0xff]  ;;  %8776 = vmatprep.subr.bf16.mxu1 %v8981_v22  ;;  %v91_v29 = vld [vmem:[%s11877_s0 + $0x1c8] sm:$0xff] }
  0x16   :  { %8682 = vmatprep.mubr.msk.bf16.mxu0 %vm206_vm2, %v138_v20  ;;  %v86_v20 = vld [vmem:[%s11877_s0 + $0x1a0] sm:$0xff]  ;;  %v159_v23 = vpack.c.bf16 %v85_v19, %v84_v18 }
  0x18   :  { %8777 = vmatpush3.bf16.msra.mxu1 %v8981_v22 }
  0x19   :  { %8782 = vmatprep.subr.bf16.mxu1 %v9376_v24 }
  0x1d   :  { %8683 = vmatmul.mubr.msk.bf16.gmra.mxu0 %vm206_vm2, %v139_v25  ;;  %v160_v25 = vpack.c.bf16 %v87_v21, %v86_v20 }
  0x1e   :  { %8686 = vmatprep.mubr.msk.bf16.mxu0 %vm206_vm2, %v140_v26  ;;  %v88_v26 = vld [vmem:[%s11877_s0 + $0x1b0] sm:$0xff] }
  0x25   :  { %8687 = vmatmul.mubr.msk.bf16.gmra.mxu0 %vm206_vm2, %v141_v31 }
  0x26   :  { %8690 = vmatprep.mubr.msk.bf16.mxu0 %vm206_vm2, %v142_v32 }
  0x2d   :  { %8691 = vmatmul.mubr.msk.bf16.gmra.mxu0 %vm206_vm2, %v143_v37 }
  0x2e   :  { %8694 = vmatprep.mubr.msk.bf16.mxu0 %vm206_vm2, %v144_v38 }
  0x35   :  { %8695 = vmatmul.mubr.msk.bf16.gmra.mxu0 %vm206_vm2, %v145_v43 }
  0x36   :  { %8698 = vmatprep.mubr.msk.bf16.mxu0 %vm206_vm2, %v146_v44 }
  0x3d   :  { %8699 = vmatmul.mubr.msk.bf16.gmra.mxu0 %vm206_vm2, %v147_v49 }
  0x3e   :  { %8702 = vmatprep.mubr.msk.bf16.mxu0 %vm206_vm2, %v148_v50 }
  0x45   :  { %8703 = vmatmul.mubr.msk.bf16.gmra.mxu0 %vm206_vm2, %v149_v55 }
  0x46   :  { %8706 = vmatprep.mubr.msk.bf16.mxu0 %vm206_vm2, %v150_v56 }
  0x4d   :  { %8707 = vmatmul.mubr.msk.bf16.gmra.mxu0 %vm206_vm2, %v151_v61 }
  0x4e   :  { %8710 = vmatprep.mubr.msk.bf16.mxu0 %vm206_vm2, %v152_v62 }
  0x55   :  { %8711 = vmatmul.mubr.msk.bf16.gmra.mxu0 %vm206_vm2, %v153_v3 }
  0x56   :  { %8714 = vmatprep.mubr.msk.bf16.mxu0 %vm206_vm2, %v154_v4 }
  0x5d   :  { %8715 = vmatmul.mubr.msk.bf16.gmra.mxu0 %vm206_vm2, %v155_v9 }
  0x5e   :  { %8718 = vmatprep.mubr.msk.bf16.mxu0 %vm206_vm2, %v156_v10 }
  0x65   :  { %8719 = vmatmul.mubr.msk.bf16.gmra.mxu0 %vm206_vm2, %v157_v15 }
  0x66   :  { %8722 = vmatprep.mubr.msk.bf16.mxu0 %vm206_vm2, %v158_v17 }
  0x6d   :  { %8723 = vmatmul.mubr.msk.bf16.gmra.mxu0 %vm206_vm2, %v159_v23 }
  0x6e   :  { %8726 = vmatprep.mubr.msk.bf16.mxu0 %vm206_vm2, %v160_v25 }
  0x6f   :  { %14 = vsyncpa [#allocation6], 0  ;;  %v161_v30 = vpack.c.bf16 %v89_v27, %v88_v26  ;;  %v162_v31 = vpack.c.bf16 %v91_v29, %v90_v28  ;;  %v92_v32 = vld [vmem:[%s11877_s0 + $0x1d0] sm:$0xff]  ;;  %v93_v33 = vld [vmem:[%s11877_s0 + $0x1d8] sm:$0xff]  ;;  %vm897_vm3 = vcmask 261120   ;;  %vm3030_vm4 = vcmask 523264  }
  0x70   :  { %v94_v34 = vld [vmem:[%s11877_s0 + $0x1e0] sm:$0xff]  ;;  %v95_v35 = vld [vmem:[%s11877_s0 + $0x1e8] sm:$0xff]  ;;  %v163_v36 = vpack.c.bf16 %v93_v33, %v92_v32  ;;  %v96_v38 = vld [vmem:[%s11877_s0 + $0x1f0] sm:$0xff]  ;;  %vm3036_vm5 = vcmask 517120   ;;  %vm3050_vm6 = vcmask 1041920   ;;  %s9123_s13 = smov [#allocation5]  }
  0x71   :  { %v164_v37 = vpack.c.bf16 %v95_v35, %v94_v34  ;;  %v97_v39 = vld [vmem:[%s11877_s0 + $0x1f8] sm:$0xff]  ;;  %v98_v40 = vld [vmem:[%s11877_s0 + $0x200] sm:$0xff]  ;;  %v99_v41 = vld [vmem:[%s11877_s0 + $0x208] sm:$0xff]  ;;  %s7683_s14 = sshll.u32 %s9123_s13, 4  ;;  %s7684_s14 = int_to_ptr.vmem [resolvable:$true] %s7683_s14 }
  0x72   :  { %v165_v42 = vpack.c.bf16 %v97_v39, %v96_v38  ;;  %v166_v43 = vpack.c.bf16 %v99_v41, %v98_v40  ;;  %v100_v44 = vld [vmem:[%s11877_s0 + $0x210] sm:$0xff]  ;;  %v101_v45 = vld [vmem:[%s11877_s0 + $0x218] sm:$0xff]  ;;  %v102_v46 = vld [vmem:[%s11877_s0 + $0x220] sm:$0xff]  ;;  %p9103_p1 = scmp.lt.s32.totalorder %s7684_s14, %s7684_s14 }
  0x73   :  { %v103_v47 = vld [vmem:[%s11877_s0 + $0x228] sm:$0xff]  ;;  %v167_v48 = vpack.c.bf16 %v101_v45, %v100_v44  ;;  %v104_v50 = vld [vmem:[%s11877_s0 + $0x230] sm:$0xff]  ;;  %v105_v51 = vld [vmem:[%s11877_s0 + $0x238] sm:$0xff] }
  0x74   :  { %v168_v49 = vpack.c.bf16 %v103_v47, %v102_v46  ;;  %v106_v52 = vld [vmem:[%s11877_s0 + $0x240] sm:$0xff]  ;;  %v107_v53 = vld [vmem:[%s11877_s0 + $0x248] sm:$0xff]  ;;  %v169_v54 = vpack.c.bf16 %v105_v51, %v104_v50  ;;  %v108_v56 = vld [vmem:[%s11877_s0 + $0x250] sm:$0xff] }
  0x75   :  { %8727 = vmatmul.mubr.msk.bf16.gmra.mxu0 %vm206_vm2, %v161_v30  ;;  %v170_v55 = vpack.c.bf16 %v107_v53, %v106_v52  ;;  %v109_v57 = vld [vmem:[%s11877_s0 + $0x258] sm:$0xff]  ;;  %v110_v58 = vld [vmem:[%s11877_s0 + $0x260] sm:$0xff]  ;;  %v111_v59 = vld [vmem:[%s11877_s0 + $0x268] sm:$0xff] }
  0x76   :  { %8730 = vmatprep.mubr.msk.bf16.mxu0 %vm206_vm2, %v162_v31  ;;  %v171_v60 = vpack.c.bf16 %v109_v57, %v108_v56  ;;  %v172_v61 = vpack.c.bf16 %v111_v59, %v110_v58  ;;  %v112_v62 = vld [vmem:[%s11877_s0 + $0x270] sm:$0xff]  ;;  %v113_v63 = vld [vmem:[%s11877_s0 + $0x278] sm:$0xff]  ;;  %v114_v0 = vld [vmem:[%s11877_s0 + $0x280] sm:$0xff] }
  0x77   :  { %v115_v1 = vld [vmem:[%s11877_s0 + $0x288] sm:$0xff]  ;;  %v173_v2 = vpack.c.bf16 %v113_v63, %v112_v62  ;;  %v116_v4 = vld [vmem:[%s11877_s0 + $0x290] sm:$0xff]  ;;  %v117_v5 = vld [vmem:[%s11877_s0 + $0x298] sm:$0xff] }
  0x78   :  { %v174_v3 = vpack.c.bf16 %v115_v1, %v114_v0  ;;  %v118_v6 = vld [vmem:[%s11877_s0 + $0x2a0] sm:$0xff]  ;;  %v119_v7 = vld [vmem:[%s11877_s0 + $0x2a8] sm:$0xff]  ;;  %v175_v8 = vpack.c.bf16 %v117_v5, %v116_v4  ;;  %v120_v10 = vld [vmem:[%s11877_s0 + $0x2b0] sm:$0xff] }
  0x79   :  { %v176_v9 = vpack.c.bf16 %v119_v7, %v118_v6  ;;  %v121_v11 = vld [vmem:[%s11877_s0 + $0x2b8] sm:$0xff]  ;;  %v122_v12 = vld [vmem:[%s11877_s0 + $0x2c0] sm:$0xff]  ;;  %v123_v13 = vld [vmem:[%s11877_s0 + $0x2c8] sm:$0xff] }
  0x7a   :  { %v177_v14 = vpack.c.bf16 %v121_v11, %v120_v10  ;;  %v178_v15 = vpack.c.bf16 %v123_v13, %v122_v12  ;;  %v124_v16 = vld [vmem:[%s11877_s0 + $0x2d0] sm:$0xff]  ;;  %v125_v17 = vld [vmem:[%s11877_s0 + $0x2d8] sm:$0xff]  ;;  %v126_v18 = vld [vmem:[%s11877_s0 + $0x2e0] sm:$0xff] }
  0x7b   :  { %v127_v19 = vld [vmem:[%s11877_s0 + $0x2e8] sm:$0xff]  ;;  %v179_v20 = vpack.c.bf16 %v125_v17, %v124_v16  ;;  %v128_v22 = vld [vmem:[%s11877_s0 + $0x2f0] sm:$0xff]  ;;  %v129_v23 = vld [vmem:[%s11877_s0 + $0x2f8] sm:$0xff] }
  0x7c   :  { %v180_v21 = vpack.c.bf16 %v127_v19, %v126_v18  ;;  %v130_v25 = vld [vmem:[%s11877_s0 + $0x300] sm:$0xff]  ;;  %v131_v26 = vld [vmem:[%s11877_s0 + $0x308] sm:$0xff]  ;;  %v181_v27 = vpack.c.bf16 %v129_v23, %v128_v22  ;;  %v132_v29 = vld [vmem:[%s11877_s0 + $0x310] sm:$0xff] }
  0x7d   :  { %8731 = vmatmul.mubr.msk.bf16.gmra.mxu0 %vm206_vm2, %v163_v36  ;;  %v182_v28 = vpack.c.bf16 %v131_v26, %v130_v25  ;;  %v133_v30 = vld [vmem:[%s11877_s0 + $0x318] sm:$0xff]  ;;  %v9544_v32 = vld [vmem:[%s11879_s2] ss:$0 sm:$0xff] }
  0x7e   :  { %8734 = vmatprep.mubr.msk.bf16.mxu0 %vm206_vm2, %v164_v37  ;;  %v183_v31 = vpack.c.bf16 %v133_v30, %v132_v29  ;;  %v8983_v19 = vld [vmem:[%s11880_s3] sm:$0xff]  }
  0x85   :  { %8735 = vmatmul.mubr.msk.bf16.gmra.mxu0 %vm206_vm2, %v165_v42 }
  0x86   :  { %8738 = vmatprep.mubr.msk.bf16.mxu0 %vm206_vm2, %v166_v43 }
  0x8d   :  { %8739 = vmatmul.mubr.msk.bf16.gmra.mxu0 %vm206_vm2, %v167_v48 }
  0x8e   :  { %8742 = vmatprep.mubr.msk.bf16.mxu0 %vm206_vm2, %v168_v49 }
  0x95   :  { %8743 = vmatmul.mubr.msk.bf16.gmra.mxu0 %vm206_vm2, %v169_v54 }
  0x96   :  { %8746 = vmatprep.mubr.msk.bf16.mxu0 %vm206_vm2, %v170_v55 }
  0x9d   :  { %8747 = vmatmul.mubr.msk.bf16.gmra.mxu0 %vm206_vm2, %v171_v60 }
  0x9e   :  { %8750 = vmatprep.mubr.msk.bf16.mxu0 %vm206_vm2, %v172_v61 }
  0xa5   :  { %8751 = vmatmul.mubr.msk.bf16.gmra.mxu0 %vm206_vm2, %v173_v2 }
  0xa6   :  { %8754 = vmatprep.mubr.msk.bf16.mxu0 %vm206_vm2, %v174_v3 }
  0xad   :  { %8755 = vmatmul.mubr.msk.bf16.gmra.mxu0 %vm206_vm2, %v175_v8 }
  0xae   :  { %8758 = vmatprep.mubr.msk.bf16.mxu0 %vm206_vm2, %v176_v9 }
  0xb5   :  { %8759 = vmatmul.mubr.msk.bf16.gmra.mxu0 %vm206_vm2, %v177_v14 }
  0xb6   :  { %8762 = vmatprep.mubr.msk.bf16.mxu0 %vm206_vm2, %v178_v15 }
  0xbd   :  { %8763 = vmatmul.mubr.msk.bf16.gmra.mxu0 %vm206_vm2, %v179_v20 }
  0xbe   :  { %8766 = vmatprep.mubr.msk.bf16.mxu0 %vm206_vm2, %v180_v21 }
  0xc5   :  { %8767 = vmatmul.mubr.msk.bf16.gmra.mxu0 %vm206_vm2, %v181_v27 }
  0xc6   :  { %8770 = vmatprep.mubr.msk.bf16.mxu0 %vm206_vm2, %v182_v28  ;;  %v8984_v28 = vld [vmem:[%s11880_s3 + $0x28] sm:$0xff]  }
  0xcd   :  { %v8676_v33 = vpop.f32.mrf.mxu0  ;;  %8771 = vmatmul.mubr.msk.bf16.gmra.mxu0 %vm206_vm2, %v183_v31 }
  0xce   :  { %v407_v34 = vadd.f32 %v8676_v33, %v9544_v32 }
  0xcf   :  { %v398_v35 = vpop.f32.mrf.mxu0 }
  0xd0   :  { %v799_v36 = vmax.f32 %v407_v34, 0.0  ;;  %v399_v37 = vadd.f32 %v9544_v32, %v398_v35 }
  0xd1   :  { %v8677_v38 = vpop.f32.mrf.mxu0 }
  0xd2   :  { %900 = vst.msk [vmem:[#allocation2 + $0x10] sm:$0xff] %vm897_vm3, %v799_v36  ;;  %v797_v39 = vmax.f32 %v399_v37, 0.0  ;;  %v410_v40 = vadd.f32 %v8677_v38, %v9544_v32 }
  0xd3   :  { %v401_v41 = vpop.f32.mrf.mxu0 }
  0xd4   :  { %898 = vst.msk [vmem:[#allocation2] sm:$0xff] %vm897_vm3, %v797_v39  ;;  %v800_v42 = vmax.f32 %v410_v40, 0.0  ;;  %v402_v43 = vadd.f32 %v9544_v32, %v401_v41  ;;  %v8985_v41 = vld [vmem:[%s11880_s3 + $0x20] sm:$0xff]  }
  0xd5   :  { %v8680_v44 = vpop.f32.mrf.mxu0 }
  0xd6   :  { %901 = vst.msk [vmem:[#allocation2 + $0x18] sm:$0xff] %vm897_vm3, %v800_v42  ;;  %v798_v45 = vmax.f32 %v402_v43, 0.0  ;;  %v423_v46 = vadd.f32 %v8680_v44, %v9544_v32 }
  0xd7   :  { %v414_v47 = vpop.f32.mrf.mxu0 }
  0xd8   :  { %899 = vst.msk [vmem:[#allocation2 + $0x8] sm:$0xff] %vm897_vm3, %v798_v45  ;;  %v803_v48 = vmax.f32 %v423_v46, 0.0  ;;  %v415_v49 = vadd.f32 %v9544_v32, %v414_v47 }
  0xd9   :  { %v8681_v50 = vpop.f32.mrf.mxu0  ;;  %v1000_v37 = vld [vmem:[#allocation2 + $0x10] sm:$0xff] }
  0xda   :  { %904 = vst.msk [vmem:[#allocation2 + $0x30] sm:$0xff] %vm897_vm3, %v803_v48  ;;  %v801_v51 = vmax.f32 %v415_v49, 0.0  ;;  %v426_v52 = vadd.f32 %v8681_v50, %v9544_v32  ;;  %v8986_v48 = vld [vmem:[%s11880_s3 + $0x38] sm:$0xff]  }
  0xdb   :  { %v417_v53 = vpop.f32.mrf.mxu0  ;;  %v998_v18 = vld [vmem:[#allocation2] sm:$0xff] }
  0xdc   :  { %902 = vst.msk [vmem:[#allocation2 + $0x20] sm:$0xff] %vm897_vm3, %v801_v51  ;;  %v804_v54 = vmax.f32 %v426_v52, 0.0  ;;  %v418_v55 = vadd.f32 %v9544_v32, %v417_v53 }
  0xdd   :  { %v8684_v56 = vpop.f32.mrf.mxu0  ;;  %v1001_v33 = vld [vmem:[#allocation2 + $0x18] sm:$0xff] }
  0xde   :  { %905 = vst.msk [vmem:[#allocation2 + $0x38] sm:$0xff] %vm897_vm3, %v804_v54  ;;  %v802_v57 = vmax.f32 %v418_v55, 0.0  ;;  %v439_v58 = vadd.f32 %v8684_v56, %v9544_v32  ;;  %v1003_v40 = vpack.c.bf16 %v1001_v33, %v1000_v37 }
  0xdf   :  { %v430_v59 = vpop.f32.mrf.mxu0  ;;  %v999_v11 = vld [vmem:[#allocation2 + $0x8] sm:$0xff] }
  0xe0   :  { %903 = vst.msk [vmem:[#allocation2 + $0x28] sm:$0xff] %vm897_vm3, %v802_v57  ;;  %v807_v60 = vmax.f32 %v439_v58, 0.0  ;;  %v431_v61 = vadd.f32 %v9544_v32, %v430_v59  ;;  %v1002_v22 = vpack.c.bf16 %v999_v11, %v998_v18 }
  0xe1   :  { %v8685_v62 = vpop.f32.mrf.mxu0  ;;  %v1010_v15 = vld [vmem:[#allocation2 + $0x30] sm:$0xff] }
  0xe2   :  { %908 = vst.msk [vmem:[#allocation2 + $0x50] sm:$0xff] %vm897_vm3, %v807_v60  ;;  %v805_v63 = vmax.f32 %v431_v61, 0.0  ;;  %v442_v0 = vadd.f32 %v8685_v62, %v9544_v32  ;;  %v8987_v61 = vld [vmem:[%s11880_s3 + $0x30] sm:$0xff]  }
  0xe3   :  { %v433_v1 = vpop.f32.mrf.mxu0  ;;  %v1008_v9 = vld [vmem:[#allocation2 + $0x20] sm:$0xff] }
  0xe4   :  { %906 = vst.msk [vmem:[#allocation2 + $0x40] sm:$0xff] %vm897_vm3, %v805_v63  ;;  %v808_v2 = vmax.f32 %v442_v0, 0.0  ;;  %v434_v3 = vadd.f32 %v9544_v32, %v433_v1 }
  0xe5   :  { %v8688_v4 = vpop.f32.mrf.mxu0  ;;  %v1011_v7 = vld [vmem:[#allocation2 + $0x38] sm:$0xff] }
  0xe6   :  { %909 = vst.msk [vmem:[#allocation2 + $0x58] sm:$0xff] %vm897_vm3, %v808_v2  ;;  %v806_v5 = vmax.f32 %v434_v3, 0.0  ;;  %v455_v6 = vadd.f32 %v8688_v4, %v9544_v32  ;;  %v1013_v17 = vpack.c.bf16 %v1011_v7, %v1010_v15  ;;  %v8988_v4 = vld [vmem:[%s11880_s3 + $0x48] sm:$0xff]  }
  0xe7   :  { %v446_v8 = vpop.f32.mrf.mxu0  ;;  %v1009_v10 = vld [vmem:[#allocation2 + $0x28] sm:$0xff] }
  0xe8   :  { %907 = vst.msk [vmem:[#allocation2 + $0x48] sm:$0xff] %vm897_vm3, %v806_v5  ;;  %v811_v12 = vmax.f32 %v455_v6, 0.0  ;;  %v447_v13 = vadd.f32 %v9544_v32, %v446_v8  ;;  %v1012_v14 = vpack.c.bf16 %v1009_v10, %v1008_v9 }
  0xe9   :  { %v8689_v16 = vpop.f32.mrf.mxu0  ;;  %v1154_v52 = vld [vmem:[#allocation2 + $0x50] sm:$0xff] }
  0xea   :  { %912 = vst.msk [vmem:[#allocation2 + $0x70] sm:$0xff] %vm897_vm3, %v811_v12  ;;  %v809_v20 = vmax.f32 %v447_v13, 0.0  ;;  %8778 = vmatprep.mubr.msk.bf16.mxu1 %vm897_vm3, %v1012_v14  ;;  %v458_v21 = vadd.f32 %v8689_v16, %v9544_v32 }
  0xeb   :  { %8779 = vmatmul.mubr.msk.bf16.vlgmr.msra.gmra.mxu1 %vm897_vm3, %v1013_v17  ;;  %v449_v23 = vpop.f32.mrf.mxu0  ;;  %v1152_v29 = vld [vmem:[#allocation2 + $0x40] sm:$0xff] }
  0xec   :  { %910 = vst.msk [vmem:[#allocation2 + $0x60] sm:$0xff] %vm897_vm3, %v809_v20  ;;  %v812_v25 = vmax.f32 %v458_v21, 0.0  ;;  %8783 = vmatpush3.bf16.msra.mxu1 %v9376_v24  ;;  %8786 = vmatprep.mubr.msk.bf16.mxu1 %vm897_vm3, %v1002_v22  ;;  %v450_v26 = vadd.f32 %v9544_v32, %v449_v23  ;;  %v8989_v17 = vld [vmem:[%s11880_s3 + $0x40] sm:$0xff]  }
  0xed   :  { %8784 = vmatprep.subr.bf16.mxu1 %v8983_v19  ;;  %v8692_v27 = vpop.f32.mrf.mxu0  ;;  %v1155_v53 = vld [vmem:[#allocation2 + $0x58] sm:$0xff] }
  0xee   :  { %913 = vst.msk [vmem:[#allocation2 + $0x78] sm:$0xff] %vm897_vm3, %v812_v25  ;;  %v810_v30 = vmax.f32 %v450_v26, 0.0  ;;  %v471_v31 = vadd.f32 %v8692_v27, %v9544_v32  ;;  %v1157_v60 = vpack.c.bf16 %v1155_v53, %v1154_v52  ;;  %v8990_v25 = vld [vmem:[%s11880_s3 + $0x58] sm:$0xff]  }
  0xef   :  { %v462_v34 = vpop.f32.mrf.mxu0  ;;  %v1153_v35 = vld [vmem:[#allocation2 + $0x48] sm:$0xff] }
  0xf0   :  { %911 = vst.msk [vmem:[#allocation2 + $0x68] sm:$0xff] %vm897_vm3, %v810_v30  ;;  %v815_v24 = vmax.f32 %v471_v31, 0.0  ;;  %8785 = vmatpush3.bf16.msra.mxu1 %v8983_v19  ;;  %v463_v36 = vadd.f32 %v9544_v32, %v462_v34  ;;  %v1156_v38 = vpack.c.bf16 %v1153_v35, %v1152_v29 }
  0xf1   :  { %8790 = vmatprep.subr.bf16.mxu1 %v8984_v28  ;;  %v8693_v39 = vpop.f32.mrf.mxu0  ;;  %v1235_v8 = vld [vmem:[#allocation2 + $0x70] sm:$0xff] }
  0xf2   :  { %916 = vst.msk [vmem:[#allocation2 + $0x90] sm:$0xff] %vm897_vm3, %v815_v24  ;;  %v813_v42 = vmax.f32 %v463_v36, 0.0  ;;  %v474_v43 = vadd.f32 %v8693_v39, %v9544_v32 }
  0xf3   :  { %8787 = vmatmul.mubr.msk.bf16.vlgmr.msra.gmra.mxu1 %vm897_vm3, %v1003_v40  ;;  %v465_v44 = vpop.f32.mrf.mxu0  ;;  %v1233_v49 = vld [vmem:[#allocation2 + $0x60] sm:$0xff] }
  0xf4   :  { %914 = vst.msk [vmem:[#allocation2 + $0x80] sm:$0xff] %vm897_vm3, %v813_v42  ;;  %v816_v45 = vmax.f32 %v474_v43, 0.0  ;;  %8791 = vmatpush3.bf16.msra.mxu1 %v8984_v28  ;;  %8794 = vmatprep.mubr.msk.bf16.mxu1 %vm897_vm3, %v1156_v38  ;;  %v466_v46 = vadd.f32 %v9544_v32, %v465_v44  ;;  %v8991_v38 = vld [vmem:[%s11880_s3 + $0x50] sm:$0xff]  }
  0xf5   :  { %8792 = vmatprep.subr.bf16.mxu1 %v8985_v41  ;;  %v8696_v47 = vpop.f32.mrf.mxu0  ;;  %v1236_v9 = vld [vmem:[#allocation2 + $0x78] sm:$0xff] }
  0xf6   :  { %917 = vst.msk [vmem:[#allocation2 + $0x98] sm:$0xff] %vm897_vm3, %v816_v45  ;;  %v814_v50 = vmax.f32 %v466_v46, 0.0  ;;  %v487_v51 = vadd.f32 %v8696_v47, %v9544_v32  ;;  %v1238_v16 = vpack.c.bf16 %v1236_v9, %v1235_v8  ;;  %v8992_v45 = vld [vmem:[%s11880_s3 + $0x68] sm:$0xff]  }
  0xf7   :  { %v478_v54 = vpop.f32.mrf.mxu0  ;;  %v1234_v55 = vld [vmem:[#allocation2 + $0x68] sm:$0xff] }
  0xf8   :  { %915 = vst.msk [vmem:[#allocation2 + $0x88] sm:$0xff] %vm897_vm3, %v814_v50  ;;  %v819_v56 = vmax.f32 %v487_v51, 0.0  ;;  %8793 = vmatpush3.bf16.msra.mxu1 %v8985_v41  ;;  %v479_v57 = vadd.f32 %v9544_v32, %v478_v54  ;;  %v1237_v58 = vpack.c.bf16 %v1234_v55, %v1233_v49 }
  0xf9   :  { %8798 = vmatprep.subr.bf16.mxu1 %v8986_v48  ;;  %v8697_v59 = vpop.f32.mrf.mxu0  ;;  %v1316_v29 = vld [vmem:[#allocation2 + $0x90] sm:$0xff] }
  0xfa   :  { %920 = vst.msk [vmem:[#allocation2 + $0xb0] sm:$0xff] %vm897_vm3, %v819_v56  ;;  %v817_v62 = vmax.f32 %v479_v57, 0.0  ;;  %v490_v63 = vadd.f32 %v8697_v59, %v9544_v32 }
  0xfb   :  { %8795 = vmatmul.mubr.msk.bf16.vlgmr.msra.gmra.mxu1 %vm897_vm3, %v1157_v60  ;;  %v481_v0 = vpop.f32.mrf.mxu0  ;;  %v1314_v5 = vld [vmem:[#allocation2 + $0x80] sm:$0xff] }
  0xfc   :  { %918 = vst.msk [vmem:[#allocation2 + $0xa0] sm:$0xff] %vm897_vm3, %v817_v62  ;;  %v820_v1 = vmax.f32 %v490_v63, 0.0  ;;  %8799 = vmatpush3.bf16.msra.mxu1 %v8986_v48  ;;  %8802 = vmatprep.mubr.msk.bf16.mxu1 %vm897_vm3, %v1237_v58  ;;  %v482_v2 = vadd.f32 %v9544_v32, %v481_v0  ;;  %v8993_v58 = vld [vmem:[%s11880_s3 + $0x60] sm:$0xff]  }
  0xfd   :  { %8800 = vmatprep.subr.bf16.mxu1 %v8987_v61  ;;  %v8700_v3 = vpop.f32.mrf.mxu0  ;;  %v1317_v30 = vld [vmem:[#allocation2 + $0x98] sm:$0xff] }
  0xfe   :  { %921 = vst.msk [vmem:[#allocation2 + $0xb8] sm:$0xff] %vm897_vm3, %v820_v1  ;;  %v818_v6 = vmax.f32 %v482_v2, 0.0  ;;  %v503_v7 = vadd.f32 %v8700_v3, %v9544_v32  ;;  %v1319_v37 = vpack.c.bf16 %v1317_v30, %v1316_v29  ;;  %v8994_v1 = vld [vmem:[%s11880_s3 + $0x78] sm:$0xff]  }
  0xff   :  { %v494_v10 = vpop.f32.mrf.mxu0  ;;  %v1315_v11 = vld [vmem:[#allocation2 + $0x88] sm:$0xff] }
 0x100   :  { %919 = vst.msk [vmem:[#allocation2 + $0xa8] sm:$0xff] %vm897_vm3, %v818_v6  ;;  %v823_v12 = vmax.f32 %v503_v7, 0.0  ;;  %8801 = vmatpush3.bf16.msra.mxu1 %v8987_v61  ;;  %v495_v13 = vadd.f32 %v9544_v32, %v494_v10  ;;  %v1318_v14 = vpack.c.bf16 %v1315_v11, %v1314_v5 }
 0x101   :  { %8806 = vmatprep.subr.bf16.mxu1 %v8988_v4  ;;  %v8701_v15 = vpop.f32.mrf.mxu0  ;;  %v1397_v49 = vld [vmem:[#allocation2 + $0xb0] sm:$0xff] }
 0x102   :  { %924 = vst.msk [vmem:[#allocation2 + $0xd0] sm:$0xff] %vm897_vm3, %v823_v12  ;;  %v821_v18 = vmax.f32 %v495_v13, 0.0  ;;  %v506_v19 = vadd.f32 %v8701_v15, %v9544_v32 }
 0x103   :  { %8803 = vmatmul.mubr.msk.bf16.vlgmr.msra.gmra.mxu1 %vm897_vm3, %v1238_v16  ;;  %v497_v20 = vpop.f32.mrf.mxu0  ;;  %v1395_v26 = vld [vmem:[#allocation2 + $0xa0] sm:$0xff] }
 0x104   :  { %922 = vst.msk [vmem:[#allocation2 + $0xc0] sm:$0xff] %vm897_vm3, %v821_v18  ;;  %v824_v21 = vmax.f32 %v506_v19, 0.0  ;;  %8807 = vmatpush3.bf16.msra.mxu1 %v8988_v4  ;;  %8810 = vmatprep.mubr.msk.bf16.mxu1 %vm897_vm3, %v1318_v14  ;;  %v498_v22 = vadd.f32 %v9544_v32, %v497_v20  ;;  %v8995_v14 = vld [vmem:[%s11880_s3 + $0x70] sm:$0xff]  }
 0x105   :  { %8808 = vmatprep.subr.bf16.mxu1 %v8989_v17  ;;  %v8704_v23 = vpop.f32.mrf.mxu0  ;;  %v1398_v50 = vld [vmem:[#allocation2 + $0xb8] sm:$0xff] }
 0x106   :  { %925 = vst.msk [vmem:[#allocation2 + $0xd8] sm:$0xff] %vm897_vm3, %v824_v21  ;;  %v822_v27 = vmax.f32 %v498_v22, 0.0  ;;  %v519_v28 = vadd.f32 %v8704_v23, %v9544_v32  ;;  %v1400_v57 = vpack.c.bf16 %v1398_v50, %v1397_v49  ;;  %v8996_v21 = vld [vmem:[%s11880_s3 + $0x88] sm:$0xff]  }
 0x107   :  { %v510_v31 = vpop.f32.mrf.mxu0  ;;  %v1396_v33 = vld [vmem:[#allocation2 + $0xa8] sm:$0xff] }
 0x108   :  { %923 = vst.msk [vmem:[#allocation2 + $0xc8] sm:$0xff] %vm897_vm3, %v822_v27  ;;  %v827_v34 = vmax.f32 %v519_v28, 0.0  ;;  %8809 = vmatpush3.bf16.msra.mxu1 %v8989_v17  ;;  %v511_v35 = vadd.f32 %v9544_v32, %v510_v31  ;;  %v1399_v24 = vpack.c.bf16 %v1396_v33, %v1395_v26 }
 0x109   :  { %8814 = vmatprep.subr.bf16.mxu1 %v8990_v25  ;;  %v8705_v36 = vpop.f32.mrf.mxu0  ;;  %v1478_v5 = vld [vmem:[#allocation2 + $0xd0] sm:$0xff] }
 0x10a   :  { %928 = vst.msk [vmem:[#allocation2 + $0xf0] sm:$0xff] %vm897_vm3, %v827_v34  ;;  %v825_v39 = vmax.f32 %v511_v35, 0.0  ;;  %v522_v40 = vadd.f32 %v8705_v36, %v9544_v32 }
 0x10b   :  { %8811 = vmatmul.mubr.msk.bf16.vlgmr.msra.gmra.mxu1 %vm897_vm3, %v1319_v37  ;;  %v513_v41 = vpop.f32.mrf.mxu0  ;;  %v1476_v46 = vld [vmem:[#allocation2 + $0xc0] sm:$0xff] }
 0x10c   :  { %926 = vst.msk [vmem:[#allocation2 + $0xe0] sm:$0xff] %vm897_vm3, %v825_v39  ;;  %v828_v42 = vmax.f32 %v522_v40, 0.0  ;;  %8815 = vmatpush3.bf16.msra.mxu1 %v8990_v25  ;;  %8818 = vmatprep.mubr.msk.bf16.mxu1 %vm897_vm3, %v1399_v24  ;;  %v514_v43 = vadd.f32 %v9544_v32, %v513_v41  ;;  %v8997_v24 = vld [vmem:[%s11880_s3 + $0x80] sm:$0xff]  }
 0x10d   :  { %8816 = vmatprep.subr.bf16.mxu1 %v8991_v38  ;;  %v8708_v44 = vpop.f32.mrf.mxu0  ;;  %v1479_v6 = vld [vmem:[#allocation2 + $0xd8] sm:$0xff] }
 0x10e   :  { %929 = vst.msk [vmem:[#allocation2 + $0xf8] sm:$0xff] %vm897_vm3, %v828_v42  ;;  %v826_v47 = vmax.f32 %v514_v43, 0.0  ;;  %v535_v48 = vadd.f32 %v8708_v44, %v9544_v32  ;;  %v1481_v13 = vpack.c.bf16 %v1479_v6, %v1478_v5  ;;  %v8998_v42 = vld [vmem:[%s11880_s3 + $0x98] sm:$0xff]  }
 0x10f   :  { %v526_v51 = vpop.f32.mrf.mxu0  ;;  %v1477_v52 = vld [vmem:[#allocation2 + $0xc8] sm:$0xff] }
 0x110   :  { %927 = vst.msk [vmem:[#allocation2 + $0xe8] sm:$0xff] %vm897_vm3, %v826_v47  ;;  %v831_v53 = vmax.f32 %v535_v48, 0.0  ;;  %8817 = vmatpush3.bf16.msra.mxu1 %v8991_v38  ;;  %v527_v54 = vadd.f32 %v9544_v32, %v526_v51  ;;  %v1480_v55 = vpack.c.bf16 %v1477_v52, %v1476_v46 }
 0x111   :  { %8822 = vmatprep.subr.bf16.mxu1 %v8992_v45  ;;  %v8709_v56 = vpop.f32.mrf.mxu0  ;;  %v1559_v26 = vld [vmem:[#allocation2 + $0xf0] sm:$0xff] }
 0x112   :  { %932 = vst.msk [vmem:[#allocation2 + $0x110] sm:$0xff] %vm897_vm3, %v831_v53  ;;  %v829_v59 = vmax.f32 %v527_v54, 0.0  ;;  %v538_v60 = vadd.f32 %v8709_v56, %v9544_v32 }
 0x113   :  { %8819 = vmatmul.mubr.msk.bf16.vlgmr.msra.gmra.mxu1 %vm897_vm3, %v1400_v57  ;;  %v529_v61 = vpop.f32.mrf.mxu0  ;;  %v1557_v2 = vld [vmem:[#allocation2 + $0xe0] sm:$0xff] }
 0x114   :  { %930 = vst.msk [vmem:[#allocation2 + $0x100] sm:$0xff] %vm897_vm3, %v829_v59  ;;  %v832_v62 = vmax.f32 %v538_v60, 0.0  ;;  %8823 = vmatpush3.bf16.msra.mxu1 %v8992_v45  ;;  %8826 = vmatprep.mubr.msk.bf16.mxu1 %vm897_vm3, %v1480_v55  ;;  %v530_v63 = vadd.f32 %v9544_v32, %v529_v61  ;;  %v8999_v55 = vld [vmem:[%s11880_s3 + $0x90] sm:$0xff]  }
 0x115   :  { %8824 = vmatprep.subr.bf16.mxu1 %v8993_v58  ;;  %v8712_v0 = vpop.f32.mrf.mxu0  ;;  %v1560_v27 = vld [vmem:[#allocation2 + $0xf8] sm:$0xff] }
 0x116   :  { %933 = vst.msk [vmem:[#allocation2 + $0x118] sm:$0xff] %vm897_vm3, %v832_v62  ;;  %v830_v3 = vmax.f32 %v530_v63, 0.0  ;;  %v551_v4 = vadd.f32 %v8712_v0, %v9544_v32  ;;  %v1562_v35 = vpack.c.bf16 %v1560_v27, %v1559_v26  ;;  %v9000_v62 = vld [vmem:[%s11880_s3 + $0xa8] sm:$0xff]  }
 0x117   :  { %v542_v7 = vpop.f32.mrf.mxu0  ;;  %v1558_v8 = vld [vmem:[#allocation2 + $0xe8] sm:$0xff] }
 0x118   :  { %931 = vst.msk [vmem:[#allocation2 + $0x108] sm:$0xff] %vm897_vm3, %v830_v3  ;;  %v835_v9 = vmax.f32 %v551_v4, 0.0  ;;  %8825 = vmatpush3.bf16.msra.mxu1 %v8993_v58  ;;  %v543_v10 = vadd.f32 %v9544_v32, %v542_v7  ;;  %v1561_v11 = vpack.c.bf16 %v1558_v8, %v1557_v2 }
 0x119   :  { %8830 = vmatprep.subr.bf16.mxu1 %v8994_v1  ;;  %v8713_v12 = vpop.f32.mrf.mxu0  ;;  %v1640_v46 = vld [vmem:[#allocation2 + $0x110] sm:$0xff] }
 0x11a   :  { %936 = vst.msk [vmem:[#allocation2 + $0x130] sm:$0xff] %vm897_vm3, %v835_v9  ;;  %v833_v15 = vmax.f32 %v543_v10, 0.0  ;;  %v554_v16 = vadd.f32 %v8713_v12, %v9544_v32 }
 0x11b   :  { %8827 = vmatmul.mubr.msk.bf16.vlgmr.msra.gmra.mxu1 %vm897_vm3, %v1481_v13  ;;  %v545_v17 = vpop.f32.mrf.mxu0  ;;  %v1638_v22 = vld [vmem:[#allocation2 + $0x100] sm:$0xff] }
 0x11c   :  { %934 = vst.msk [vmem:[#allocation2 + $0x120] sm:$0xff] %vm897_vm3, %v833_v15  ;;  %v836_v18 = vmax.f32 %v554_v16, 0.0  ;;  %8831 = vmatpush3.bf16.msra.mxu1 %v8994_v1  ;;  %8834 = vmatprep.mubr.msk.bf16.mxu1 %vm897_vm3, %v1561_v11  ;;  %v546_v19 = vadd.f32 %v9544_v32, %v545_v17  ;;  %v9001_v11 = vld [vmem:[%s11880_s3 + $0xa0] sm:$0xff]  }
 0x11d   :  { %8832 = vmatprep.subr.bf16.mxu1 %v8995_v14  ;;  %v8716_v20 = vpop.f32.mrf.mxu0  ;;  %v1641_v47 = vld [vmem:[#allocation2 + $0x118] sm:$0xff] }
 0x11e   :  { %937 = vst.msk [vmem:[#allocation2 + $0x138] sm:$0xff] %vm897_vm3, %v836_v18  ;;  %v834_v23 = vmax.f32 %v546_v19, 0.0  ;;  %v567_v25 = vadd.f32 %v8716_v20, %v9544_v32  ;;  %v1643_v54 = vpack.c.bf16 %v1641_v47, %v1640_v46  ;;  %v9002_v18 = vld [vmem:[%s11880_s3 + $0xb8] sm:$0xff]  }
 0x11f   :  { %v558_v28 = vpop.f32.mrf.mxu0  ;;  %v1639_v29 = vld [vmem:[#allocation2 + $0x108] sm:$0xff] }
 0x120   :  { %935 = vst.msk [vmem:[#allocation2 + $0x128] sm:$0xff] %vm897_vm3, %v834_v23  ;;  %v839_v30 = vmax.f32 %v567_v25, 0.0  ;;  %8833 = vmatpush3.bf16.msra.mxu1 %v8995_v14  ;;  %v559_v31 = vadd.f32 %v9544_v32, %v558_v28  ;;  %v1642_v33 = vpack.c.bf16 %v1639_v29, %v1638_v22 }
 0x121   :  { %8838 = vmatprep.subr.bf16.mxu1 %v8996_v21  ;;  %v8717_v34 = vpop.f32.mrf.mxu0  ;;  %v1721_v2 = vld [vmem:[#allocation2 + $0x130] sm:$0xff] }
 0x122   :  { %940 = vst.msk [vmem:[#allocation2 + $0x150] sm:$0xff] %vm897_vm3, %v839_v30  ;;  %v837_v36 = vmax.f32 %v559_v31, 0.0  ;;  %v570_v37 = vadd.f32 %v8717_v34, %v9544_v32 }
 0x123   :  { %8835 = vmatmul.mubr.msk.bf16.vlgmr.msra.gmra.mxu1 %vm897_vm3, %v1562_v35  ;;  %v561_v38 = vpop.f32.mrf.mxu0  ;;  %v1719_v43 = vld [vmem:[#allocation2 + $0x120] sm:$0xff] }
 0x124   :  { %938 = vst.msk [vmem:[#allocation2 + $0x140] sm:$0xff] %vm897_vm3, %v837_v36  ;;  %v840_v39 = vmax.f32 %v570_v37, 0.0  ;;  %8839 = vmatpush3.bf16.msra.mxu1 %v8996_v21  ;;  %8842 = vmatprep.mubr.msk.bf16.mxu1 %vm897_vm3, %v1642_v33  ;;  %v562_v40 = vadd.f32 %v9544_v32, %v561_v38  ;;  %v9003_v33 = vld [vmem:[%s11880_s3 + $0xb0] sm:$0xff]  }
 0x125   :  { %8840 = vmatprep.subr.bf16.mxu1 %v8997_v24  ;;  %v8720_v41 = vpop.f32.mrf.mxu0  ;;  %v1722_v3 = vld [vmem:[#allocation2 + $0x138] sm:$0xff] }
 0x126   :  { %941 = vst.msk [vmem:[#allocation2 + $0x158] sm:$0xff] %vm897_vm3, %v840_v39  ;;  %v838_v44 = vmax.f32 %v562_v40, 0.0  ;;  %v583_v45 = vadd.f32 %v8720_v41, %v9544_v32  ;;  %v1724_v10 = vpack.c.bf16 %v1722_v3, %v1721_v2  ;;  %v9004_v39 = vld [vmem:[%s11880_s3 + $0xc8] sm:$0xff]  }
 0x127   :  { %v574_v48 = vpop.f32.mrf.mxu0  ;;  %v1720_v49 = vld [vmem:[#allocation2 + $0x128] sm:$0xff] }
 0x128   :  { %939 = vst.msk [vmem:[#allocation2 + $0x148] sm:$0xff] %vm897_vm3, %v838_v44  ;;  %v843_v50 = vmax.f32 %v583_v45, 0.0  ;;  %8841 = vmatpush3.bf16.msra.mxu1 %v8997_v24  ;;  %v575_v51 = vadd.f32 %v9544_v32, %v574_v48  ;;  %v1723_v52 = vpack.c.bf16 %v1720_v49, %v1719_v43 }
 0x129   :  { %8846 = vmatprep.subr.bf16.mxu1 %v8998_v42  ;;  %v8721_v53 = vpop.f32.mrf.mxu0  ;;  %v1802_v22 = vld [vmem:[#allocation2 + $0x150] sm:$0xff] }
 0x12a   :  { %944 = vst.msk [vmem:[#allocation2 + $0x170] sm:$0xff] %vm897_vm3, %v843_v50  ;;  %v841_v56 = vmax.f32 %v575_v51, 0.0  ;;  %v586_v57 = vadd.f32 %v8721_v53, %v9544_v32 }
 0x12b   :  { %8843 = vmatmul.mubr.msk.bf16.vlgmr.msra.gmra.mxu1 %vm897_vm3, %v1643_v54  ;;  %v577_v58 = vpop.f32.mrf.mxu0  ;;  %v1800_v63 = vld [vmem:[#allocation2 + $0x140] sm:$0xff] }
 0x12c   :  { %942 = vst.msk [vmem:[#allocation2 + $0x160] sm:$0xff] %vm897_vm3, %v841_v56  ;;  %v844_v59 = vmax.f32 %v586_v57, 0.0  ;;  %8847 = vmatpush3.bf16.msra.mxu1 %v8998_v42  ;;  %8850 = vmatprep.mubr.msk.bf16.mxu1 %vm897_vm3, %v1723_v52  ;;  %v578_v60 = vadd.f32 %v9544_v32, %v577_v58  ;;  %v9005_v52 = vld [vmem:[%s11880_s3 + $0xc0] sm:$0xff]  }
 0x12d   :  { %8848 = vmatprep.subr.bf16.mxu1 %v8999_v55  ;;  %v8724_v61 = vpop.f32.mrf.mxu0  ;;  %v1803_v23 = vld [vmem:[#allocation2 + $0x158] sm:$0xff] }
 0x12e   :  { %945 = vst.msk [vmem:[#allocation2 + $0x178] sm:$0xff] %vm897_vm3, %v844_v59  ;;  %v842_v0 = vmax.f32 %v578_v60, 0.0  ;;  %v599_v1 = vadd.f32 %v8724_v61, %v9544_v32  ;;  %v1805_v31 = vpack.c.bf16 %v1803_v23, %v1802_v22  ;;  %v9006_v59 = vld [vmem:[%s11880_s3 + $0xd8] sm:$0xff]  }
 0x12f   :  { %v590_v4 = vpop.f32.mrf.mxu0  ;;  %v1801_v5 = vld [vmem:[#allocation2 + $0x148] sm:$0xff] }
 0x130   :  { %943 = vst.msk [vmem:[#allocation2 + $0x168] sm:$0xff] %vm897_vm3, %v842_v0  ;;  %v847_v6 = vmax.f32 %v599_v1, 0.0  ;;  %8849 = vmatpush3.bf16.msra.mxu1 %v8999_v55  ;;  %v591_v7 = vadd.f32 %v9544_v32, %v590_v4  ;;  %v1804_v8 = vpack.c.bf16 %v1801_v5, %v1800_v63 }
 0x131   :  { %8854 = vmatprep.subr.bf16.mxu1 %v9000_v62  ;;  %v8725_v9 = vpop.f32.mrf.mxu0  ;;  %v1883_v43 = vld [vmem:[#allocation2 + $0x170] sm:$0xff] }
 0x132   :  { %948 = vst.msk [vmem:[#allocation2 + $0x190] sm:$0xff] %vm897_vm3, %v847_v6  ;;  %v845_v12 = vmax.f32 %v591_v7, 0.0  ;;  %v602_v13 = vadd.f32 %v8725_v9, %v9544_v32 }
 0x133   :  { %8851 = vmatmul.mubr.msk.bf16.vlgmr.msra.gmra.mxu1 %vm897_vm3, %v1724_v10  ;;  %v593_v14 = vpop.f32.mrf.mxu0  ;;  %v1881_v19 = vld [vmem:[#allocation2 + $0x160] sm:$0xff] }
 0x134   :  { %946 = vst.msk [vmem:[#allocation2 + $0x180] sm:$0xff] %vm897_vm3, %v845_v12  ;;  %v848_v15 = vmax.f32 %v602_v13, 0.0  ;;  %8855 = vmatpush3.bf16.msra.mxu1 %v9000_v62  ;;  %8858 = vmatprep.mubr.msk.bf16.mxu1 %vm897_vm3, %v1804_v8  ;;  %v594_v16 = vadd.f32 %v9544_v32, %v593_v14  ;;  %v9007_v8 = vld [vmem:[%s11880_s3 + $0xd0] sm:$0xff]  }
 0x135   :  { %8856 = vmatprep.subr.bf16.mxu1 %v9001_v11  ;;  %v8728_v17 = vpop.f32.mrf.mxu0  ;;  %v1884_v44 = vld [vmem:[#allocation2 + $0x178] sm:$0xff] }
 0x136   :  { %949 = vst.msk [vmem:[#allocation2 + $0x198] sm:$0xff] %vm897_vm3, %v848_v15  ;;  %v846_v20 = vmax.f32 %v594_v16, 0.0  ;;  %v615_v21 = vadd.f32 %v8728_v17, %v9544_v32  ;;  %v1886_v51 = vpack.c.bf16 %v1884_v44, %v1883_v43  ;;  %v9008_v15 = vld [vmem:[%s11880_s3 + $0xe8] sm:$0xff]  }
 0x137   :  { %v606_v25 = vpop.f32.mrf.mxu0  ;;  %v1882_v26 = vld [vmem:[#allocation2 + $0x168] sm:$0xff] }
 0x138   :  { %947 = vst.msk [vmem:[#allocation2 + $0x188] sm:$0xff] %vm897_vm3, %v846_v20  ;;  %v851_v27 = vmax.f32 %v615_v21, 0.0  ;;  %8857 = vmatpush3.bf16.msra.mxu1 %v9001_v11  ;;  %v607_v28 = vadd.f32 %v9544_v32, %v606_v25  ;;  %v1885_v29 = vpack.c.bf16 %v1882_v26, %v1881_v19 }
 0x139   :  { %8862 = vmatprep.subr.bf16.mxu1 %v9002_v18  ;;  %v8729_v30 = vpop.f32.mrf.mxu0  ;;  %v1964_v63 = vld [vmem:[#allocation2 + $0x190] sm:$0xff] }
 0x13a   :  { %952 = vst.msk [vmem:[#allocation2 + $0x1b0] sm:$0xff] %vm897_vm3, %v851_v27  ;;  %v849_v34 = vmax.f32 %v607_v28, 0.0  ;;  %v618_v35 = vadd.f32 %v8729_v30, %v9544_v32 }
 0x13b   :  { %8859 = vmatmul.mubr.msk.bf16.vlgmr.msra.gmra.mxu1 %vm897_vm3, %v1805_v31  ;;  %v609_v24 = vpop.f32.mrf.mxu0  ;;  %v1962_v40 = vld [vmem:[#allocation2 + $0x180] sm:$0xff] }
 0x13c   :  { %950 = vst.msk [vmem:[#allocation2 + $0x1a0] sm:$0xff] %vm897_vm3, %v849_v34  ;;  %v852_v36 = vmax.f32 %v618_v35, 0.0  ;;  %8863 = vmatpush3.bf16.msra.mxu1 %v9002_v18  ;;  %8866 = vmatprep.mubr.msk.bf16.mxu1 %vm897_vm3, %v1885_v29  ;;  %v610_v37 = vadd.f32 %v9544_v32, %v609_v24  ;;  %v9009_v29 = vld [vmem:[%s11880_s3 + $0xe0] sm:$0xff]  }
 0x13d   :  { %8864 = vmatprep.subr.bf16.mxu1 %v9003_v33  ;;  %v8732_v38 = vpop.f32.mrf.mxu0  ;;  %v1965_v0 = vld [vmem:[#allocation2 + $0x198] sm:$0xff] }
 0x13e   :  { %953 = vst.msk [vmem:[#allocation2 + $0x1b8] sm:$0xff] %vm897_vm3, %v852_v36  ;;  %v850_v41 = vmax.f32 %v610_v37, 0.0  ;;  %v631_v42 = vadd.f32 %v8732_v38, %v9544_v32  ;;  %v1967_v7 = vpack.c.bf16 %v1965_v0, %v1964_v63  ;;  %v9010_v36 = vld [vmem:[%s11880_s3 + $0xf8] sm:$0xff]  }
 0x13f   :  { %v622_v45 = vpop.f32.mrf.mxu0  ;;  %v1963_v46 = vld [vmem:[#allocation2 + $0x188] sm:$0xff] }
 0x140   :  { %951 = vst.msk [vmem:[#allocation2 + $0x1a8] sm:$0xff] %vm897_vm3, %v850_v41  ;;  %v855_v47 = vmax.f32 %v631_v42, 0.0  ;;  %8865 = vmatpush3.bf16.msra.mxu1 %v9003_v33  ;;  %v623_v48 = vadd.f32 %v9544_v32, %v622_v45  ;;  %v1966_v49 = vpack.c.bf16 %v1963_v46, %v1962_v40 }
 0x141   :  { %8870 = vmatprep.subr.bf16.mxu1 %v9004_v39  ;;  %v8733_v50 = vpop.f32.mrf.mxu0  ;;  %v2045_v19 = vld [vmem:[#allocation2 + $0x1b0] sm:$0xff] }
 0x142   :  { %956 = vst.msk [vmem:[#allocation2 + $0x1d0] sm:$0xff] %vm897_vm3, %v855_v47  ;;  %v853_v53 = vmax.f32 %v623_v48, 0.0  ;;  %v634_v54 = vadd.f32 %v8733_v50, %v9544_v32 }
 0x143   :  { %8867 = vmatmul.mubr.msk.bf16.vlgmr.msra.gmra.mxu1 %vm897_vm3, %v1886_v51  ;;  %v625_v55 = vpop.f32.mrf.mxu0  ;;  %v2043_v60 = vld [vmem:[#allocation2 + $0x1a0] sm:$0xff] }
 0x144   :  { %954 = vst.msk [vmem:[#allocation2 + $0x1c0] sm:$0xff] %vm897_vm3, %v853_v53  ;;  %v856_v56 = vmax.f32 %v634_v54, 0.0  ;;  %8871 = vmatpush3.bf16.msra.mxu1 %v9004_v39  ;;  %8874 = vmatprep.mubr.msk.bf16.mxu1 %vm897_vm3, %v1966_v49  ;;  %v626_v57 = vadd.f32 %v9544_v32, %v625_v55  ;;  %v9011_v49 = vld [vmem:[%s11880_s3 + $0xf0] sm:$0xff]  }
 0x145   :  { %8872 = vmatprep.subr.bf16.mxu1 %v9005_v52  ;;  %v8736_v58 = vpop.f32.mrf.mxu0  ;;  %v2046_v20 = vld [vmem:[#allocation2 + $0x1b8] sm:$0xff] }
 0x146   :  { %957 = vst.msk [vmem:[#allocation2 + $0x1d8] sm:$0xff] %vm897_vm3, %v856_v56  ;;  %v854_v61 = vmax.f32 %v626_v57, 0.0  ;;  %v647_v62 = vadd.f32 %v8736_v58, %v9544_v32  ;;  %v2048_v28 = vpack.c.bf16 %v2046_v20, %v2045_v19  ;;  %v9012_v56 = vld [vmem:[%s11880_s3 + $0x108] sm:$0xff]  }
 0x147   :  { %v638_v1 = vpop.f32.mrf.mxu0  ;;  %v2044_v2 = vld [vmem:[#allocation2 + $0x1a8] sm:$0xff] }
 0x148   :  { %955 = vst.msk [vmem:[#allocation2 + $0x1c8] sm:$0xff] %vm897_vm3, %v854_v61  ;;  %v859_v3 = vmax.f32 %v647_v62, 0.0  ;;  %8873 = vmatpush3.bf16.msra.mxu1 %v9005_v52  ;;  %v639_v4 = vadd.f32 %v9544_v32, %v638_v1  ;;  %v2047_v5 = vpack.c.bf16 %v2044_v2, %v2043_v60  ;;  %v9817_v1 = vld [vmem:[%s11879_s2] ss:$0 sm:$0xff]  ;;  %s9121_s2 = smov 64  }
 0x149   :  { %8878 = vmatprep.subr.bf16.mxu1 %v9006_v59  ;;  %v8737_v6 = vpop.f32.mrf.mxu0  ;;  %v2126_v40 = vld [vmem:[#allocation2 + $0x1d0] sm:$0xff] }
 0x14a   :  { %960 = vst.msk [vmem:[#allocation2 + $0x1f0] sm:$0xff] %vm897_vm3, %v859_v3  ;;  %v857_v9 = vmax.f32 %v639_v4, 0.0  ;;  %v650_v10 = vadd.f32 %v8737_v6, %v9544_v32 }
 0x14b   :  { %8875 = vmatmul.mubr.msk.bf16.vlgmr.msra.gmra.mxu1 %vm897_vm3, %v1967_v7  ;;  %v641_v11 = vpop.f32.mrf.mxu0  ;;  %v2124_v16 = vld [vmem:[#allocation2 + $0x1c0] sm:$0xff] }
 0x14c   :  { %958 = vst.msk [vmem:[#allocation2 + $0x1e0] sm:$0xff] %vm897_vm3, %v857_v9  ;;  %v860_v12 = vmax.f32 %v650_v10, 0.0  ;;  %8879 = vmatpush3.bf16.msra.mxu1 %v9006_v59  ;;  %8882 = vmatprep.mubr.msk.bf16.mxu1 %vm897_vm3, %v2047_v5  ;;  %v642_v13 = vadd.f32 %v9544_v32, %v641_v11 }
 0x14d   :  { %8880 = vmatprep.subr.bf16.mxu1 %v9007_v8  ;;  %v8740_v14 = vpop.f32.mrf.mxu0  ;;  %v2127_v41 = vld [vmem:[#allocation2 + $0x1d8] sm:$0xff] }
 0x14e   :  { %961 = vst.msk [vmem:[#allocation2 + $0x1f8] sm:$0xff] %vm897_vm3, %v860_v12  ;;  %v858_v17 = vmax.f32 %v642_v13, 0.0  ;;  %v663_v18 = vadd.f32 %v8740_v14, %v9544_v32  ;;  %v2129_v48 = vpack.c.bf16 %v2127_v41, %v2126_v40  ;;  %v9014_v12 = vld [vmem:[%s11880_s3 + $0x118] sm:$0xff]  }
 0x14f   :  { %v654_v21 = vpop.f32.mrf.mxu0  ;;  %v2125_v22 = vld [vmem:[#allocation2 + $0x1c8] sm:$0xff] }
 0x150   :  { %959 = vst.msk [vmem:[#allocation2 + $0x1e8] sm:$0xff] %vm897_vm3, %v858_v17  ;;  %v863_v23 = vmax.f32 %v663_v18, 0.0  ;;  %8881 = vmatpush3.bf16.msra.mxu1 %v9007_v8  ;;  %v655_v25 = vadd.f32 %v9544_v32, %v654_v21  ;;  %v2128_v26 = vpack.c.bf16 %v2125_v22, %v2124_v16 }
 0x151   :  { %8886 = vmatprep.subr.bf16.mxu1 %v9008_v15  ;;  %v8741_v27 = vpop.f32.mrf.mxu0  ;;  %v2207_v60 = vld [vmem:[#allocation2 + $0x1f0] sm:$0xff] }
 0x152   :  { %964 = vst.msk [vmem:[#allocation2 + $0x210] sm:$0xff] %vm897_vm3, %v863_v23  ;;  %v861_v30 = vmax.f32 %v655_v25, 0.0  ;;  %v666_v31 = vadd.f32 %v8741_v27, %v9544_v32 }
 0x153   :  { %8883 = vmatmul.mubr.msk.bf16.vlgmr.msra.gmra.mxu1 %vm897_vm3, %v2048_v28  ;;  %v657_v33 = vpop.f32.mrf.mxu0  ;;  %v2205_v37 = vld [vmem:[#allocation2 + $0x1e0] sm:$0xff] }
 0x154   :  { %962 = vst.msk [vmem:[#allocation2 + $0x200] sm:$0xff] %vm897_vm3, %v861_v30  ;;  %v864_v34 = vmax.f32 %v666_v31, 0.0  ;;  %8887 = vmatpush3.bf16.msra.mxu1 %v9008_v15  ;;  %8890 = vmatprep.mubr.msk.bf16.mxu1 %vm897_vm3, %v2128_v26  ;;  %v658_v35 = vadd.f32 %v9544_v32, %v657_v33  ;;  %v9015_v26 = vld [vmem:[%s11880_s3 + $0x110] sm:$0xff]  }
 0x155   :  { %8888 = vmatprep.subr.bf16.mxu1 %v9009_v29  ;;  %v8744_v24 = vpop.f32.mrf.mxu0  ;;  %v2208_v61 = vld [vmem:[#allocation2 + $0x1f8] sm:$0xff] }
 0x156   :  { %965 = vst.msk [vmem:[#allocation2 + $0x218] sm:$0xff] %vm897_vm3, %v864_v34  ;;  %v862_v38 = vmax.f32 %v658_v35, 0.0  ;;  %v679_v39 = vadd.f32 %v8744_v24, %v9544_v32  ;;  %v2210_v5 = vpack.c.bf16 %v2208_v61, %v2207_v60  ;;  %v9016_v34 = vld [vmem:[%s11880_s3 + $0x128] sm:$0xff]  }
 0x157   :  { %v670_v42 = vpop.f32.mrf.mxu0  ;;  %v2206_v43 = vld [vmem:[#allocation2 + $0x1e8] sm:$0xff] }
 0x158   :  { %963 = vst.msk [vmem:[#allocation2 + $0x208] sm:$0xff] %vm897_vm3, %v862_v38  ;;  %v867_v44 = vmax.f32 %v679_v39, 0.0  ;;  %8889 = vmatpush3.bf16.msra.mxu1 %v9009_v29  ;;  %v671_v45 = vadd.f32 %v9544_v32, %v670_v42  ;;  %v2209_v46 = vpack.c.bf16 %v2206_v43, %v2205_v37 }
 0x159   :  { %8894 = vmatprep.subr.bf16.mxu1 %v9010_v36  ;;  %v8745_v47 = vpop.f32.mrf.mxu0  ;;  %v2288_v16 = vld [vmem:[#allocation2 + $0x210] sm:$0xff] }
 0x15a   :  { %968 = vst.msk [vmem:[#allocation2 + $0x230] sm:$0xff] %vm897_vm3, %v867_v44  ;;  %v865_v50 = vmax.f32 %v671_v45, 0.0  ;;  %v682_v51 = vadd.f32 %v8745_v47, %v9544_v32 }
 0x15b   :  { %8891 = vmatmul.mubr.msk.bf16.vlgmr.msra.gmra.mxu1 %vm897_vm3, %v2129_v48  ;;  %v673_v52 = vpop.f32.mrf.mxu0  ;;  %v2286_v57 = vld [vmem:[#allocation2 + $0x200] sm:$0xff] }
 0x15c   :  { %966 = vst.msk [vmem:[#allocation2 + $0x220] sm:$0xff] %vm897_vm3, %v865_v50  ;;  %v868_v53 = vmax.f32 %v682_v51, 0.0  ;;  %8895 = vmatpush3.bf16.msra.mxu1 %v9010_v36  ;;  %8898 = vmatprep.mubr.msk.bf16.mxu1 %vm897_vm3, %v2209_v46  ;;  %v674_v54 = vadd.f32 %v9544_v32, %v673_v52  ;;  %v9017_v46 = vld [vmem:[%s11880_s3 + $0x120] sm:$0xff]  }
 0x15d   :  { %8896 = vmatprep.subr.bf16.mxu1 %v9011_v49  ;;  %v8748_v55 = vpop.f32.mrf.mxu0  ;;  %v2289_v17 = vld [vmem:[#allocation2 + $0x218] sm:$0xff] }
 0x15e   :  { %969 = vst.msk [vmem:[#allocation2 + $0x238] sm:$0xff] %vm897_vm3, %v868_v53  ;;  %v866_v58 = vmax.f32 %v674_v54, 0.0  ;;  %v695_v59 = vadd.f32 %v8748_v55, %v9544_v32  ;;  %v9013_v32 = vld [vmem:[%s11880_s3 + $0x100] sm:$0xff]   ;;  %v2291_v25 = vpack.c.bf16 %v2289_v17, %v2288_v16  ;;  %v9018_v53 = vld [vmem:[%s11880_s3 + $0x138] sm:$0xff]  }
 0x15f   :  { %v686_v62 = vpop.f32.mrf.mxu0  ;;  %v2287_v63 = vld [vmem:[#allocation2 + $0x208] sm:$0xff] }
 0x160   :  { %967 = vst.msk [vmem:[#allocation2 + $0x228] sm:$0xff] %vm897_vm3, %v866_v58  ;;  %v871_v0 = vmax.f32 %v695_v59, 0.0  ;;  %8897 = vmatpush3.bf16.msra.mxu1 %v9011_v49  ;;  %v687_v2 = vadd.f32 %v9817_v1, %v686_v62  ;;  %v2290_v3 = vpack.c.bf16 %v2287_v63, %v2286_v57 }
 0x161   :  { %8902 = vmatprep.subr.bf16.mxu1 %v9012_v56  ;;  %v8749_v4 = vpop.f32.mrf.mxu0  ;;  %v2369_v37 = vld [vmem:[#allocation2 + $0x230] sm:$0xff] }
 0x162   :  { %972 = vst.msk [vmem:[#allocation2 + $0x250] sm:$0xff] %vm897_vm3, %v871_v0  ;;  %v869_v6 = vmax.f32 %v687_v2, 0.0  ;;  %v698_v7 = vadd.f32 %v9817_v1, %v8749_v4 }
 0x163   :  { %8899 = vmatmul.mubr.msk.bf16.vlgmr.msra.gmra.mxu1 %vm897_vm3, %v2210_v5  ;;  %v689_v8 = vpop.f32.mrf.mxu0  ;;  %v2367_v13 = vld [vmem:[#allocation2 + $0x220] sm:$0xff] }
 0x164   :  { %970 = vst.msk [vmem:[#allocation2 + $0x240] sm:$0xff] %vm897_vm3, %v869_v6  ;;  %v872_v9 = vmax.f32 %v698_v7, 0.0  ;;  %8903 = vmatpush3.bf16.msra.mxu1 %v9012_v56  ;;  %8906 = vmatprep.mubr.msk.bf16.mxu1 %vm897_vm3, %v2290_v3  ;;  %v690_v10 = vadd.f32 %v9817_v1, %v689_v8  ;;  %v9019_v3 = vld [vmem:[%s11880_s3 + $0x130] sm:$0xff]  }
 0x165   :  { %8904 = vmatprep.subr.bf16.mxu1 %v9013_v32  ;;  %v8752_v11 = vpop.f32.mrf.mxu0  ;;  %v2370_v38 = vld [vmem:[#allocation2 + $0x238] sm:$0xff] }
 0x166   :  { %973 = vst.msk [vmem:[#allocation2 + $0x258] sm:$0xff] %vm897_vm3, %v872_v9  ;;  %v870_v14 = vmax.f32 %v690_v10, 0.0  ;;  %v711_v15 = vadd.f32 %v9817_v1, %v8752_v11  ;;  %v2372_v45 = vpack.c.bf16 %v2370_v38, %v2369_v37  ;;  %v9020_v9 = vld [vmem:[%s11880_s3 + $0x148] sm:$0xff]  }
 0x167   :  { %v702_v18 = vpop.f32.mrf.mxu0  ;;  %v2368_v19 = vld [vmem:[#allocation2 + $0x228] sm:$0xff] }
 0x168   :  { %971 = vst.msk [vmem:[#allocation2 + $0x248] sm:$0xff] %vm897_vm3, %v870_v14  ;;  %v875_v20 = vmax.f32 %v711_v15, 0.0  ;;  %8905 = vmatpush3.bf16.msra.mxu1 %v9013_v32  ;;  %v703_v21 = vadd.f32 %v9817_v1, %v702_v18  ;;  %v2371_v22 = vpack.c.bf16 %v2368_v19, %v2367_v13 }
 0x169   :  { %8910 = vmatprep.subr.bf16.mxu1 %v9014_v12  ;;  %v8753_v23 = vpop.f32.mrf.mxu0  ;;  %v2450_v57 = vld [vmem:[#allocation2 + $0x250] sm:$0xff] }
 0x16a   :  { %976 = vst.msk [vmem:[#allocation2 + $0x270] sm:$0xff] %vm897_vm3, %v875_v20  ;;  %v873_v27 = vmax.f32 %v703_v21, 0.0  ;;  %v714_v28 = vadd.f32 %v9817_v1, %v8753_v23 }
 0x16b   :  { %8907 = vmatmul.mubr.msk.bf16.vlgmr.msra.gmra.mxu1 %vm897_vm3, %v2291_v25  ;;  %v705_v29 = vpop.f32.mrf.mxu0  ;;  %v2448_v35 = vld [vmem:[#allocation2 + $0x240] sm:$0xff] }
 0x16c   :  { %974 = vst.msk [vmem:[#allocation2 + $0x260] sm:$0xff] %vm897_vm3, %v873_v27  ;;  %v876_v30 = vmax.f32 %v714_v28, 0.0  ;;  %8911 = vmatpush3.bf16.msra.mxu1 %v9014_v12  ;;  %8914 = vmatprep.mubr.msk.bf16.mxu1 %vm897_vm3, %v2371_v22  ;;  %v706_v31 = vadd.f32 %v9817_v1, %v705_v29  ;;  %v9021_v22 = vld [vmem:[%s11880_s3 + $0x140] sm:$0xff]  }
 0x16d   :  { %8912 = vmatprep.subr.bf16.mxu1 %v9015_v26  ;;  %v8756_v33 = vpop.f32.mrf.mxu0  ;;  %v2451_v58 = vld [vmem:[#allocation2 + $0x258] sm:$0xff] }
 0x16e   :  { %977 = vst.msk [vmem:[#allocation2 + $0x278] sm:$0xff] %vm897_vm3, %v876_v30  ;;  %v874_v24 = vmax.f32 %v706_v31, 0.0  ;;  %v727_v36 = vadd.f32 %v9817_v1, %v8756_v33  ;;  %v2453_v2 = vpack.c.bf16 %v2451_v58, %v2450_v57  ;;  %v9022_v30 = vld [vmem:[%s11880_s3 + $0x158] sm:$0xff]  }
 0x16f   :  { %v718_v39 = vpop.f32.mrf.mxu0  ;;  %v2449_v40 = vld [vmem:[#allocation2 + $0x248] sm:$0xff] }
 0x170   :  { %975 = vst.msk [vmem:[#allocation2 + $0x268] sm:$0xff] %vm897_vm3, %v874_v24  ;;  %v879_v41 = vmax.f32 %v727_v36, 0.0  ;;  %8913 = vmatpush3.bf16.msra.mxu1 %v9015_v26  ;;  %v719_v42 = vadd.f32 %v9817_v1, %v718_v39  ;;  %v2452_v43 = vpack.c.bf16 %v2449_v40, %v2448_v35 }
 0x171   :  { %8918 = vmatprep.subr.bf16.mxu1 %v9016_v34  ;;  %v8757_v44 = vpop.f32.mrf.mxu0  ;;  %v2531_v13 = vld [vmem:[#allocation2 + $0x270] sm:$0xff] }
 0x172   :  { %980 = vst.msk [vmem:[#allocation2 + $0x290] sm:$0xff] %vm897_vm3, %v879_v41  ;;  %v877_v47 = vmax.f32 %v719_v42, 0.0  ;;  %v730_v48 = vadd.f32 %v9817_v1, %v8757_v44 }
 0x173   :  { %8915 = vmatmul.mubr.msk.bf16.vlgmr.msra.gmra.mxu1 %vm897_vm3, %v2372_v45  ;;  %v721_v49 = vpop.f32.mrf.mxu0  ;;  %v2529_v54 = vld [vmem:[#allocation2 + $0x260] sm:$0xff] }
 0x174   :  { %978 = vst.msk [vmem:[#allocation2 + $0x280] sm:$0xff] %vm897_vm3, %v877_v47  ;;  %v880_v50 = vmax.f32 %v730_v48, 0.0  ;;  %8919 = vmatpush3.bf16.msra.mxu1 %v9016_v34  ;;  %8922 = vmatprep.mubr.msk.bf16.mxu1 %vm897_vm3, %v2452_v43  ;;  %v722_v51 = vadd.f32 %v9817_v1, %v721_v49  ;;  %v9023_v43 = vld [vmem:[%s11880_s3 + $0x150] sm:$0xff]  }
 0x175   :  { %8920 = vmatprep.subr.bf16.mxu1 %v9017_v46  ;;  %v8760_v52 = vpop.f32.mrf.mxu0  ;;  %v2532_v14 = vld [vmem:[#allocation2 + $0x278] sm:$0xff] }
 0x176   :  { %981 = vst.msk [vmem:[#allocation2 + $0x298] sm:$0xff] %vm897_vm3, %v880_v50  ;;  %v878_v55 = vmax.f32 %v722_v51, 0.0  ;;  %v743_v56 = vadd.f32 %v9817_v1, %v8760_v52  ;;  %v2534_v21 = vpack.c.bf16 %v2532_v14, %v2531_v13  ;;  %v9024_v50 = vld [vmem:[%s11880_s3 + $0x168] sm:$0xff]  }
 0x177   :  { %v734_v59 = vpop.f32.mrf.mxu0  ;;  %v2530_v60 = vld [vmem:[#allocation2 + $0x268] sm:$0xff] }
 0x178   :  { %979 = vst.msk [vmem:[#allocation2 + $0x288] sm:$0xff] %vm897_vm3, %v878_v55  ;;  %v883_v61 = vmax.f32 %v743_v56, 0.0  ;;  %8921 = vmatpush3.bf16.msra.mxu1 %v9017_v46  ;;  %v735_v62 = vadd.f32 %v9817_v1, %v734_v59  ;;  %v2533_v63 = vpack.c.bf16 %v2530_v60, %v2529_v54  ;;  %v9028_v13 = vld [vmem:[%s11880_s3 + $0x188] sm:$0xff]  }
 0x179   :  { %8926 = vmatprep.subr.bf16.mxu1 %v9018_v53  ;;  %v8761_v0 = vpop.f32.mrf.mxu0  ;;  %v2612_v35 = vld [vmem:[#allocation2 + $0x290] sm:$0xff] }
 0x17a   :  { %984 = vst.msk [vmem:[#allocation2 + $0x2b0] sm:$0xff] %vm897_vm3, %v883_v61  ;;  %v881_v4 = vmax.f32 %v735_v62, 0.0  ;;  %v746_v5 = vadd.f32 %v9817_v1, %v8761_v0 }
 0x17b   :  { %8923 = vmatmul.mubr.msk.bf16.vlgmr.msra.gmra.mxu1 %vm897_vm3, %v2453_v2  ;;  %v737_v32 = vpop.f32.mrf.mxu0  ;;  %v2610_v10 = vld [vmem:[#allocation2 + $0x280] sm:$0xff] }
 0x17c   :  { %982 = vst.msk [vmem:[#allocation2 + $0x2a0] sm:$0xff] %vm897_vm3, %v881_v4  ;;  %v884_v6 = vmax.f32 %v746_v5, 0.0  ;;  %8927 = vmatpush3.bf16.msra.mxu1 %v9018_v53  ;;  %8930 = vmatprep.mubr.msk.bf16.mxu1 %vm897_vm3, %v2533_v63  ;;  %v738_v7 = vadd.f32 %v9817_v1, %v737_v32  ;;  %v9025_v63 = vld [vmem:[%s11880_s3 + $0x160] sm:$0xff]   ;;  %v9026_v32 = vld [vmem:[%s11880_s3 + $0x178] sm:$0xff]  }
 0x17d   :  { %8928 = vmatprep.subr.bf16.mxu1 %v9019_v3  ;;  %v8764_v8 = vpop.f32.mrf.mxu0  ;;  %v2613_v24 = vld [vmem:[#allocation2 + $0x298] sm:$0xff] }
 0x17e   :  { %985 = vst.msk [vmem:[#allocation2 + $0x2b8] sm:$0xff] %vm897_vm3, %v884_v6  ;;  %v882_v11 = vmax.f32 %v738_v7, 0.0  ;;  %v759_v12 = vadd.f32 %v9817_v1, %v8764_v8  ;;  %v2615_v42 = vpack.c.bf16 %v2613_v24, %v2612_v35 }
 0x17f   :  { %v750_v15 = vpop.f32.mrf.mxu0  ;;  %v2611_v16 = vld [vmem:[#allocation2 + $0x288] sm:$0xff] }
 0x180   :  { %983 = vst.msk [vmem:[#allocation2 + $0x2a8] sm:$0xff] %vm897_vm3, %v882_v11  ;;  %v887_v17 = vmax.f32 %v759_v12, 0.0  ;;  %8929 = vmatpush3.bf16.msra.mxu1 %v9019_v3  ;;  %v751_v18 = vadd.f32 %v9817_v1, %v750_v15  ;;  %v2614_v19 = vpack.c.bf16 %v2611_v16, %v2610_v10 }
 0x181   :  { %8934 = vmatprep.subr.bf16.mxu1 %v9020_v9  ;;  %v8765_v20 = vpop.f32.mrf.mxu0  ;;  %v2693_v54 = vld [vmem:[#allocation2 + $0x2b0] sm:$0xff] }
 0x182   :  { %988 = vst.msk [vmem:[#allocation2 + $0x2d0] sm:$0xff] %vm897_vm3, %v887_v17  ;;  %v885_v23 = vmax.f32 %v751_v18, 0.0  ;;  %v762_v25 = vadd.f32 %v9817_v1, %v8765_v20  ;;  %v9029_v20 = vld [vmem:[%s11880_s3 + $0x180] sm:$0xff]  }
 0x183   :  { %8931 = vmatmul.mubr.msk.bf16.vlgmr.msra.gmra.mxu1 %vm897_vm3, %v2534_v21  ;;  %v753_v26 = vpop.f32.mrf.mxu0  ;;  %v2691_v31 = vld [vmem:[#allocation2 + $0x2a0] sm:$0xff] }
 0x184   :  { %986 = vst.msk [vmem:[#allocation2 + $0x2c0] sm:$0xff] %vm897_vm3, %v885_v23  ;;  %v888_v27 = vmax.f32 %v762_v25, 0.0  ;;  %8935 = vmatpush3.bf16.msra.mxu1 %v9020_v9  ;;  %8938 = vmatprep.mubr.msk.bf16.mxu1 %vm897_vm3, %v2614_v19  ;;  %v754_v28 = vadd.f32 %v9817_v1, %v753_v26 }
 0x185   :  { %8936 = vmatprep.subr.bf16.mxu1 %v9021_v22  ;;  %v8768_v29 = vpop.f32.mrf.mxu0  ;;  %v2694_v55 = vld [vmem:[#allocation2 + $0x2b8] sm:$0xff] }
 0x186   :  { %989 = vst.msk [vmem:[#allocation2 + $0x2d8] sm:$0xff] %vm897_vm3, %v888_v27  ;;  %v886_v33 = vmax.f32 %v754_v28, 0.0  ;;  %v775_v34 = vadd.f32 %v9817_v1, %v8768_v29  ;;  %v2696_v62 = vpack.c.bf16 %v2694_v55, %v2693_v54  ;;  %v3259_v54 = vld [vmem:[%s11882_s5 + $0x180] sm:$0xff] }
 0x187   :  { %v766_v36 = vpop.f32.mrf.mxu0  ;;  %v2692_v37 = vld [vmem:[#allocation2 + $0x2a8] sm:$0xff]  ;;  %v3263_v55 = vld [vmem:[%s11882_s5 + $0x1a0] sm:$0xff] }
 0x188   :  { %987 = vst.msk [vmem:[#allocation2 + $0x2c8] sm:$0xff] %vm897_vm3, %v886_v33  ;;  %v891_v38 = vmax.f32 %v775_v34, 0.0  ;;  %8937 = vmatpush3.bf16.msra.mxu1 %v9021_v22  ;;  %v767_v39 = vadd.f32 %v9817_v1, %v766_v36  ;;  %v2695_v40 = vpack.c.bf16 %v2692_v37, %v2691_v31 }
 0x189   :  { %8942 = vmatprep.subr.bf16.mxu1 %v9022_v30  ;;  %v8769_v41 = vpop.f32.mrf.mxu0  ;;  %v2774_v8 = vld [vmem:[#allocation2 + $0x2d0] sm:$0xff] }
 0x18a   :  { %992 = vst.msk [vmem:[#allocation2 + $0x2f0] sm:$0xff] %vm897_vm3, %v891_v38  ;;  %v889_v44 = vmax.f32 %v767_v39, 0.0  ;;  %v778_v45 = vadd.f32 %v9817_v1, %v8769_v41  ;;  %v3271_v41 = vld [vmem:[%s11882_s5 + $0x1e0] sm:$0xff] }
 0x18b   :  { %8939 = vmatmul.mubr.msk.bf16.vlgmr.msra.gmra.mxu1 %vm897_vm3, %v2615_v42  ;;  %v769_v46 = vpop.f32.mrf.mxu0  ;;  %v2772_v51 = vld [vmem:[#allocation2 + $0x2c0] sm:$0xff] }
 0x18c   :  { %990 = vst.msk [vmem:[#allocation2 + $0x2e0] sm:$0xff] %vm897_vm3, %v889_v44  ;;  %v892_v47 = vmax.f32 %v778_v45, 0.0  ;;  %8943 = vmatpush3.bf16.msra.mxu1 %v9022_v30  ;;  %8946 = vmatprep.mubr.msk.bf16.mxu1 %vm897_vm3, %v2695_v40  ;;  %v770_v48 = vadd.f32 %v9817_v1, %v769_v46  ;;  %v3267_v40 = vld [vmem:[%s11882_s5 + $0x1c0] sm:$0xff] }
 0x18d   :  { %8944 = vmatprep.subr.bf16.mxu1 %v9023_v43  ;;  %v8772_v49 = vpop.f32.mrf.mxu0  ;;  %v2775_v9 = vld [vmem:[#allocation2 + $0x2d8] sm:$0xff]  ;;  %v7910_v44 = vcombine.high %v3267_v40, %v3271_v41 }
 0x18e   :  { %993 = vst.msk [vmem:[#allocation2 + $0x2f8] sm:$0xff] %vm897_vm3, %v892_v47  ;;  %v890_v52 = vmax.f32 %v770_v48, 0.0  ;;  %v791_v53 = vadd.f32 %v9817_v1, %v8772_v49  ;;  %v2777_v12 = vpack.c.bf16 %v2775_v9, %v2774_v8 }
 0x18f   :  { %v782_v56 = vpop.f32.mrf.mxu0  ;;  %v2773_v57 = vld [vmem:[#allocation2 + $0x2c8] sm:$0xff]  ;;  %6325 = vmatprep.subr.bf16.mxu0 %v7910_v44 }
 0x190   :  { %991 = vst.msk [vmem:[#allocation2 + $0x2e8] sm:$0xff] %vm897_vm3, %v890_v52  ;;  %v895_v58 = vmax.f32 %v791_v53, 0.0  ;;  %8945 = vmatpush3.bf16.msra.mxu1 %v9023_v43  ;;  %v783_v59 = vadd.f32 %v9817_v1, %v782_v56  ;;  %v2776_v60 = vpack.c.bf16 %v2773_v57, %v2772_v51  ;;  %v7909_v43 = vcombine.low %v3267_v40, %v3271_v41 }
 0x191   :  { %8950 = vmatprep.subr.bf16.mxu1 %v9024_v50  ;;  %v8773_v61 = vpop.f32.mrf.mxu0  ;;  %v2855_v15 = vld [vmem:[#allocation2 + $0x2f0] sm:$0xff]  ;;  %v7901_v57 = vcombine.low %v3259_v54, %v3263_v55 }
 0x192   :  { %996 = vst.msk [vmem:[#allocation2 + $0x310] sm:$0xff] %vm897_vm3, %v895_v58  ;;  %v893_v0 = vmax.f32 %v783_v59, 0.0  ;;  %v794_v2 = vadd.f32 %v9817_v1, %v8773_v61  ;;  %6326 = vmatpush1.bf16.msra.mxu0 %v7909_v43  ;;  %v7902_v58 = vcombine.high %v3259_v54, %v3263_v55  ;;  %v3227_v55 = vld [vmem:[%s11882_s5 + $0x80] sm:$0xff] }
 0x193   :  { %8947 = vmatmul.mubr.msk.bf16.vlgmr.msra.gmra.mxu1 %vm897_vm3, %v2696_v62  ;;  %v785_v3 = vpop.f32.mrf.mxu0  ;;  %v2853_v6 = vld [vmem:[#allocation2 + $0x2e0] sm:$0xff] }
 0x194   :  { %994 = vst.msk [vmem:[#allocation2 + $0x300] sm:$0xff] %vm897_vm3, %v893_v0  ;;  %v896_v4 = vmax.f32 %v794_v2, 0.0  ;;  %8951 = vmatpush3.bf16.msra.mxu1 %v9024_v50  ;;  %8954 = vmatprep.mubr.msk.bf16.mxu1 %vm897_vm3, %v2776_v60  ;;  %v786_v5 = vadd.f32 %v9817_v1, %v785_v3  ;;  %v9027_v1 = vld [vmem:[%s11880_s3 + $0x170] sm:$0xff]  }
 0x195   :  { %8952 = vmatprep.subr.bf16.mxu1 %v9025_v63  ;;  %v2856_v16 = vld [vmem:[#allocation2 + $0x2f8] sm:$0xff]  ;;  %6327 = vmatprep.subr.bf16.mxu0 %v7902_v58 }
 0x196   :  { %997 = vst.msk [vmem:[#allocation2 + $0x318] sm:$0xff] %vm897_vm3, %v896_v4  ;;  %v894_v7 = vmax.f32 %v786_v5, 0.0  ;;  %v2858_v19 = vpack.c.bf16 %v2856_v16, %v2855_v15  ;;  %6328 = vmatpush1.bf16.msra.mxu0 %v7901_v57 }
 0x197   :  { %v2854_v10 = vld [vmem:[#allocation2 + $0x2e8] sm:$0xff] }
 0x198   :  { %995 = vst.msk [vmem:[#allocation2 + $0x308] sm:$0xff] %vm897_vm3, %v894_v7  ;;  %8953 = vmatpush3.bf16.msra.mxu1 %v9025_v63  ;;  %v2857_v11 = vpack.c.bf16 %v2854_v10, %v2853_v6  ;;  %v3255_v6 = vld [vmem:[%s11882_s5 + $0x160] sm:$0xff] }
 0x199   :  { %8958 = vmatprep.subr.bf16.mxu1 %v9026_v32  ;;  %v2936_v21 = vld [vmem:[#allocation2 + $0x310] sm:$0xff] }
 0x19b   :  { %8955 = vmatmul.mubr.msk.bf16.vlgmr.msra.gmra.mxu1 %vm897_vm3, %v2777_v12  ;;  %v2934_v14 = vld [vmem:[#allocation2 + $0x300] sm:$0xff] }
 0x19c   :  { %8959 = vmatpush3.bf16.msra.mxu1 %v9026_v32  ;;  %8962 = vmatprep.mubr.msk.bf16.mxu1 %vm897_vm3, %v2857_v11  ;;  %v3251_v32 = vld [vmem:[%s11882_s5 + $0x140] sm:$0xff] }
 0x19d   :  { %8960 = vmatprep.subr.bf16.mxu1 %v9027_v1  ;;  %v2937_v22 = vld [vmem:[#allocation2 + $0x318] sm:$0xff]  ;;  %v7893_v8 = vcombine.low %v3251_v32, %v3255_v6  ;;  %v7894_v9 = vcombine.high %v3251_v32, %v3255_v6 }
 0x19e   :  { %v2939_v23 = vpack.c.bf16 %v2937_v22, %v2936_v21 }
 0x19f   :  { %v2935_v17 = vld [vmem:[#allocation2 + $0x308] sm:$0xff]  ;;  %6329 = vmatprep.subr.bf16.mxu0 %v7894_v9 }
 0x1a0   :  { %8961 = vmatpush3.bf16.msra.mxu1 %v9027_v1  ;;  %v2938_v18 = vpack.c.bf16 %v2935_v17, %v2934_v14  ;;  %6330 = vmatpush1.bf16.msra.mxu0 %v7893_v8  ;;  %v3223_v8 = vld [vmem:[%s11882_s5 + $0x60] sm:$0xff] }
 0x1a1   :  { %8966 = vmatprep.subr.bf16.mxu1 %v9028_v13 }
 0x1a3   :  { %8963 = vmatmul.mubr.msk.bf16.vlgmr.msra.gmra.mxu1 %vm897_vm3, %v2858_v19 }
 0x1a4   :  { %8967 = vmatpush3.bf16.msra.mxu1 %v9028_v13  ;;  %8970 = vmatprep.mubr.msk.bf16.mxu1 %vm897_vm3, %v2938_v18 }
 0x1a5   :  { %8968 = vmatprep.subr.bf16.mxu1 %v9029_v20 }
 0x1a8   :  { %8969 = vmatpush3.bf16.msra.mxu1 %v9029_v20 }
 0x1ab   :  { %v8780_v25 = vpop.f32.mrf.mxu1  ;;  %8971 = vmatmul.mubr.msk.bf16.vlgmr.msra.gmra.mxu1 %vm897_vm3, %v2939_v23 }
 0x1ad   :  { %v1070_v26 = vpop.f32.mrf.mxu1 }
 0x1af   :  { %v8781_v27 = vpop.f32.mrf.mxu1 }
 0x1b1   :  { %v1073_v28 = vpop.f32.mrf.mxu1 }
 0x1b3   :  { %v8788_v29 = vpop.f32.mrf.mxu1 }
 0x1b4   :  { %v1146_v30 = vadd.f32 %v8788_v29, %v8780_v25  ;;  %v3243_v25 = vld [vmem:[%s11882_s5 + $0x100] sm:$0xff] }
 0x1b5   :  { %v1137_v31 = vpop.f32.mrf.mxu1 }
 0x1b6   :  { %v1138_v33 = vadd.f32 %v1137_v31, %v1070_v26  ;;  %v3247_v26 = vld [vmem:[%s11882_s5 + $0x120] sm:$0xff] }
 0x1b7   :  { %v8789_v34 = vpop.f32.mrf.mxu1  ;;  %v7885_v29 = vcombine.low %v3243_v25, %v3247_v26 }
 0x1b8   :  { %v1149_v35 = vadd.f32 %v8789_v34, %v8781_v27 }
 0x1b9   :  { %v1140_v24 = vpop.f32.mrf.mxu1 }
 0x1ba   :  { %v1141_v14 = vadd.f32 %v1140_v24, %v1073_v28  ;;  %v7886_v28 = vcombine.high %v3243_v25, %v3247_v26  ;;  %v3335_v25 = vld [vmem:[%s11882_s5 + $0x3e0] sm:$0xff] }
 0x1bb   :  { %v8796_v36 = vpop.f32.mrf.mxu1 }
 0x1bc   :  { %v1231_v37 = vadd.f32 %v8796_v36, %v1146_v30  ;;  %6331 = vmatprep.subr.bf16.mxu0 %v7886_v28  ;;  %v3327_v28 = vld [vmem:[%s11882_s5 + $0x3a0] sm:$0xff] }
 0x1bd   :  { %v1214_v38 = vpop.f32.mrf.mxu1  ;;  %6332 = vmatpush1.bf16.msra.mxu0 %v7885_v29  ;;  %v3323_v29 = vld [vmem:[%s11882_s5 + $0x380] sm:$0xff] }
 0x1be   :  { %v1229_v39 = vadd.f32 %v1214_v38, %v1138_v33 }
 0x1bf   :  { %v8797_v42 = vpop.f32.mrf.mxu1 }
 0x1c0   :  { %v1232_v45 = vadd.f32 %v8797_v42, %v1149_v35 }
 0x1c1   :  { %v1217_v46 = vpop.f32.mrf.mxu1 }
 0x1c2   :  { %v1230_v17 = vadd.f32 %v1217_v46, %v1141_v14 }
 0x1c3   :  { %v8804_v47 = vpop.f32.mrf.mxu1 }
 0x1c4   :  { %v1312_v48 = vadd.f32 %v8804_v47, %v1231_v37 }
 0x1c5   :  { %v1295_v49 = vpop.f32.mrf.mxu1 }
 0x1c6   :  { %v1310_v50 = vadd.f32 %v1295_v49, %v1229_v39  ;;  %v3235_v49 = vld [vmem:[%s11882_s5 + $0xc0] sm:$0xff] }
 0x1c7   :  { %v8805_v51 = vpop.f32.mrf.mxu1 }
 0x1c8   :  { %v1313_v52 = vadd.f32 %v8805_v51, %v1232_v45 }
 0x1c9   :  { %v1298_v53 = vpop.f32.mrf.mxu1 }
 0x1ca   :  { %v1311_v20 = vadd.f32 %v1298_v53, %v1230_v17 }
 0x1cb   :  { %v8812_v56 = vpop.f32.mrf.mxu1 }
 0x1cc   :  { %v1393_v59 = vadd.f32 %v8812_v56, %v1312_v48  ;;  %v3231_v56 = vld [vmem:[%s11882_s5 + $0xa0] sm:$0xff] }
 0x1cd   :  { %v1376_v60 = vpop.f32.mrf.mxu1  ;;  %v7870_v58 = vcombine.high %v3227_v55, %v3231_v56 }
 0x1ce   :  { %v1391_v61 = vadd.f32 %v1376_v60, %v1310_v50  ;;  %v3239_v50 = vld [vmem:[%s11882_s5 + $0xe0] sm:$0xff]  ;;  %v7869_v60 = vcombine.low %v3227_v55, %v3231_v56 }
 0x1cf   :  { %v8813_v62 = vpop.f32.mrf.mxu1  ;;  %v7878_v53 = vcombine.high %v3235_v49, %v3239_v50  ;;  %v3311_v56 = vld [vmem:[%s11882_s5 + $0x320] sm:$0xff] }
 0x1d0   :  { %v1394_v63 = vadd.f32 %v8813_v62, %v1313_v52  ;;  %v7877_v52 = vcombine.low %v3235_v49, %v3239_v50  ;;  %v7965_v49 = vcombine.low %v3323_v29, %v3327_v28 }
 0x1d1   :  { %v1379_v0 = vpop.f32.mrf.mxu1  ;;  %6333 = vmatprep.subr.bf16.mxu0 %v7878_v53  ;;  %v3307_v53 = vld [vmem:[%s11882_s5 + $0x300] sm:$0xff] }
 0x1d2   :  { %v1392_v22 = vadd.f32 %v1379_v0, %v1311_v20  ;;  %6334 = vmatpush1.bf16.msra.mxu0 %v7877_v52  ;;  %v3331_v20 = vld [vmem:[%s11882_s5 + $0x3c0] sm:$0xff] }
 0x1d3   :  { %v8820_v2 = vpop.f32.mrf.mxu1  ;;  %6335 = vmatprep.subr.bf16.mxu0 %v7870_v58  ;;  %v3375_v58 = vld [vmem:[%s11882_s5 + $0x520] sm:$0xff] }
 0x1d4   :  { %v1474_v3 = vadd.f32 %v8820_v2, %v1393_v59 }
 0x1d5   :  { %v1457_v4 = vpop.f32.mrf.mxu1 }
 0x1d6   :  { %v1472_v5 = vadd.f32 %v1457_v4, %v1391_v61  ;;  %6336 = vmatpush1.bf16.msra.mxu0 %v7869_v60 }
 0x1d7   :  { %v8821_v7 = vpop.f32.mrf.mxu1 }
 0x1d8   :  { %v1475_v10 = vadd.f32 %v8821_v7, %v1394_v63  ;;  %v3219_v7 = vld [vmem:[%s11882_s5 + $0x40] sm:$0xff] }
 0x1d9   :  { %v1460_v11 = vpop.f32.mrf.mxu1 }
 0x1da   :  { %v1473_v30 = vadd.f32 %v1460_v11, %v1392_v22  ;;  %v7862_v11 = vcombine.high %v3219_v7, %v3223_v8 }
 0x1db   :  { %v8828_v12 = vpop.f32.mrf.mxu1 }
 0x1dc   :  { %v1555_v1 = vadd.f32 %v8828_v12, %v1474_v3  ;;  %6337 = vmatprep.subr.bf16.mxu0 %v7862_v11 }
 0x1dd   :  { %v1538_v13 = vpop.f32.mrf.mxu1 }
 0x1de   :  { %v1553_v15 = vadd.f32 %v1538_v13, %v1472_v5 }
 0x1df   :  { %v8829_v16 = vpop.f32.mrf.mxu1 }
 0x1e0   :  { %v1556_v18 = vadd.f32 %v8829_v16, %v1475_v10  ;;  %v7861_v10 = vcombine.low %v3219_v7, %v3223_v8  ;;  %v7949_v8 = vcombine.low %v3307_v53, %v3311_v56 }
 0x1e1   :  { %v1541_v19 = vpop.f32.mrf.mxu1 }
 0x1e2   :  { %v1554_v34 = vadd.f32 %v1541_v19, %v1473_v30  ;;  %6338 = vmatpush1.bf16.msra.mxu0 %v7861_v10  ;;  %v3215_v19 = vld [vmem:[%s11882_s5 + $0x20] sm:$0xff] }
 0x1e3   :  { %v8836_v21 = vpop.f32.mrf.mxu1 }
 0x1e4   :  { %v1636_v23 = vadd.f32 %v8836_v21, %v1555_v1 }
 0x1e5   :  { %v1619_v27 = vpop.f32.mrf.mxu1 }
 0x1e6   :  { %v1634_v31 = vadd.f32 %v1619_v27, %v1553_v15  ;;  %v7974_v27 = vcombine.high %v3331_v20, %v3335_v25 }
 0x1e7   :  { %v8837_v33 = vpop.f32.mrf.mxu1 }
 0x1e8   :  { %v1637_v35 = vadd.f32 %v8837_v33, %v1556_v18  ;;  %v3211_v18 = vld [vmem:[%s11882_s5] sm:$0xff] }
 0x1e9   :  { %v1622_v24 = vpop.f32.mrf.mxu1  ;;  %v7853_v22 = vcombine.low %v3211_v18, %v3215_v19  ;;  %v3399_v33 = vld [vmem:[%s11882_s5 + $0x5e0] sm:$0xff] }
 0x1ea   :  { %v1635_v36 = vadd.f32 %v1622_v24, %v1554_v34 }
 0x1eb   :  { %v8844_v37 = vpop.f32.mrf.mxu1 }
 0x1ec   :  { %v1717_v38 = vadd.f32 %v8844_v37, %v1636_v23  ;;  %v7854_v23 = vcombine.high %v3211_v18, %v3215_v19  ;;  %v3391_v37 = vld [vmem:[%s11882_s5 + $0x5a0] sm:$0xff] }
 0x1ed   :  { %v1700_v39 = vpop.f32.mrf.mxu1 }
 0x1ee   :  { %v1715_v40 = vadd.f32 %v1700_v39, %v1634_v31  ;;  %6339 = vmatprep.subr.bf16.mxu0 %v7854_v23  ;;  %v3395_v31 = vld [vmem:[%s11882_s5 + $0x5c0] sm:$0xff]  ;;  %v7966_v39 = vcombine.high %v3323_v29, %v3327_v28 }
 0x1ef   :  { %v8845_v41 = vpop.f32.mrf.mxu1  ;;  %6340 = vmatpush1.bf16.msra.mxu0 %v7853_v22  ;;  %v8037_v24 = vcombine.low %v3395_v31, %v3399_v33  ;;  %v3351_v23 = vld [vmem:[%s11882_s5 + $0x460] sm:$0xff] }
 0x1f0   :  { %v1718_v42 = vadd.f32 %v8845_v41, %v1637_v35  ;;  %v7973_v35 = vcombine.low %v3331_v20, %v3335_v25  ;;  %6341 = vmatprep.subr.bf16.mxu0 %v7974_v27  ;;  %v8038_v41 = vcombine.high %v3395_v31, %v3399_v33  ;;  %v3283_v25 = vld [vmem:[%s11882_s5 + $0x240] sm:$0xff] }
 0x1f1   :  { %v1703_v43 = vpop.f32.mrf.mxu1 }
 0x1f2   :  { %v1716_v44 = vadd.f32 %v1703_v43, %v1635_v36  ;;  %v3387_v36 = vld [vmem:[%s11882_s5 + $0x580] sm:$0xff]  ;;  %6366 = vmatprep.subr.bf16.mxu1 %v8038_v41 }
 0x1f3   :  { %v8852_v45 = vpop.f32.mrf.mxu1  ;;  %6342 = vmatpush2.bf16.msra.mxu0 %v7973_v35  ;;  %6367 = vmatpush1.bf16.msra.mxu1 %v8037_v24  ;;  %v8029_v50 = vcombine.low %v3387_v36, %v3391_v37  ;;  %v3343_v35 = vld [vmem:[%s11882_s5 + $0x420] sm:$0xff] }
 0x1f4   :  { %v1798_v46 = vadd.f32 %v8852_v45, %v1717_v38  ;;  %v3379_v45 = vld [vmem:[%s11882_s5 + $0x540] sm:$0xff]  ;;  %6343 = vmatprep.subr.bf16.mxu0 %v7966_v39 }
 0x1f5   :  { %v1781_v47 = vpop.f32.mrf.mxu1  ;;  %v3463_v41 = vld [vmem:[%s11882_s5 + $0x7e0] sm:$0xff] }
 0x1f6   :  { %v1796_v48 = vadd.f32 %v1781_v47, %v1715_v40  ;;  %v3315_v40 = vld [vmem:[%s11882_s5 + $0x340] sm:$0xff] }
 0x1f7   :  { %v8853_v51 = vpop.f32.mrf.mxu1  ;;  %6344 = vmatpush2.bf16.msra.mxu0 %v7965_v49 }
 0x1f8   :  { %v1799_v54 = vadd.f32 %v8853_v51, %v1718_v42  ;;  %v8030_v42 = vcombine.high %v3387_v36, %v3391_v37 }
 0x1f9   :  { %v1784_v57 = vpop.f32.mrf.mxu1 }
 0x1fa   :  { %v1797_v59 = vadd.f32 %v1784_v57, %v1716_v44  ;;  %v3319_v44 = vld [vmem:[%s11882_s5 + $0x360] sm:$0xff]  ;;  %6368 = vmatprep.subr.bf16.mxu1 %v8030_v42 }
 0x1fb   :  { %v8860_v61 = vpop.f32.mrf.mxu1  ;;  %v7958_v52 = vcombine.high %v3315_v40, %v3319_v44  ;;  %v3371_v57 = vld [vmem:[%s11882_s5 + $0x500] sm:$0xff]  ;;  %6369 = vmatpush1.bf16.msra.mxu1 %v8029_v50 }
 0x1fc   :  { %v1879_v62 = vadd.f32 %v8860_v61, %v1798_v46  ;;  %v3383_v46 = vld [vmem:[%s11882_s5 + $0x560] sm:$0xff]  ;;  %v7957_v61 = vcombine.low %v3315_v40, %v3319_v44 }
 0x1fd   :  { %v1862_v63 = vpop.f32.mrf.mxu1  ;;  %6345 = vmatprep.subr.bf16.mxu0 %v7958_v52  ;;  %v3459_v40 = vld [vmem:[%s11882_s5 + $0x7c0] sm:$0xff] }
 0x1fe   :  { %v1877_v0 = vadd.f32 %v1862_v63, %v1796_v48  ;;  %6346 = vmatpush2.bf16.msra.mxu0 %v7957_v61  ;;  %v8101_v50 = vcombine.low %v3459_v40, %v3463_v41 }
 0x1ff   :  { %v8861_v2 = vpop.f32.mrf.mxu1 }
 0x200   :  { %v1880_v3 = vadd.f32 %v8861_v2, %v1799_v54  ;;  %v8022_v54 = vcombine.high %v3379_v45, %v3383_v46  ;;  %v3299_v2 = vld [vmem:[%s11882_s5 + $0x2c0] sm:$0xff] }
 0x201   :  { %v1865_v4 = vpop.f32.mrf.mxu1 }
 0x202   :  { %v1878_v5 = vadd.f32 %v1865_v4, %v1797_v59  ;;  %6370 = vmatprep.subr.bf16.mxu1 %v8022_v54 }
 0x203   :  { %v8868_v32 = vpop.f32.mrf.mxu1 }
 0x204   :  { %v1960_v6 = vadd.f32 %v8868_v32, %v1879_v62  ;;  %v8021_v62 = vcombine.low %v3379_v45, %v3383_v46  ;;  %v3363_v32 = vld [vmem:[%s11882_s5 + $0x4c0] sm:$0xff]  ;;  %v8102_v45 = vcombine.high %v3459_v40, %v3463_v41 }
 0x205   :  { %v1943_v9 = vpop.f32.mrf.mxu1  ;;  %v3451_v46 = vld [vmem:[%s11882_s5 + $0x780] sm:$0xff] }
 0x206   :  { %v1958_v12 = vadd.f32 %v1943_v9, %v1877_v0  ;;  %v7950_v0 = vcombine.high %v3307_v53, %v3311_v56  ;;  %6371 = vmatpush1.bf16.msra.mxu1 %v8021_v62  ;;  %v8013_v9 = vcombine.low %v3371_v57, %v3375_v58 }
 0x207   :  { %v8869_v1 = vpop.f32.mrf.mxu1 }
 0x208   :  { %v1961_v13 = vadd.f32 %v8869_v1, %v1880_v3  ;;  %v8014_v3 = vcombine.high %v3371_v57, %v3375_v58  ;;  %6347 = vmatprep.subr.bf16.mxu0 %v7950_v0  ;;  %v3355_v1 = vld [vmem:[%s11882_s5 + $0x480] sm:$0xff] }
 0x209   :  { %v1946_v14 = vpop.f32.mrf.mxu1  ;;  %6348 = vmatpush2.bf16.msra.mxu0 %v7949_v8 }
 0x20a   :  { %v1959_v15 = vadd.f32 %v1946_v14, %v1878_v5  ;;  %v3303_v5 = vld [vmem:[%s11882_s5 + $0x2e0] sm:$0xff]  ;;  %6372 = vmatprep.subr.bf16.mxu1 %v8014_v3 }
 0x20b   :  { %v8876_v16 = vpop.f32.mrf.mxu1  ;;  %v7942_v11 = vcombine.high %v3299_v2, %v3303_v5  ;;  %v3291_v14 = vld [vmem:[%s11882_s5 + $0x280] sm:$0xff]  ;;  %6373 = vmatpush1.bf16.msra.mxu1 %v8013_v9 }
 0x20c   :  { %v2041_v17 = vadd.f32 %v8876_v16, %v1960_v6  ;;  %v3367_v6 = vld [vmem:[%s11882_s5 + $0x4e0] sm:$0xff] }
 0x20d   :  { %v2024_v21 = vpop.f32.mrf.mxu1  ;;  %v8005_v18 = vcombine.low %v3363_v32, %v3367_v6  ;;  %6349 = vmatprep.subr.bf16.mxu0 %v7942_v11 }
 0x20e   :  { %v2039_v26 = vadd.f32 %v2024_v21, %v1958_v12  ;;  %v8006_v12 = vcombine.high %v3363_v32, %v3367_v6  ;;  %v3347_v21 = vld [vmem:[%s11882_s5 + $0x440] sm:$0xff] }
 0x20f   :  { %v8877_v30 = vpop.f32.mrf.mxu1  ;;  %v7990_v31 = vcombine.high %v3347_v21, %v3351_v23  ;;  %v7989_v36 = vcombine.low %v3347_v21, %v3351_v23 }
 0x210   :  { %v2042_v34 = vadd.f32 %v8877_v30, %v1961_v13  ;;  %v3359_v13 = vld [vmem:[%s11882_s5 + $0x4a0] sm:$0xff]  ;;  %6374 = vmatprep.subr.bf16.mxu1 %v8006_v12 }
 0x211   :  { %v2027_v38 = vpop.f32.mrf.mxu1  ;;  %v7998_v20 = vcombine.high %v3355_v1, %v3359_v13  ;;  %6375 = vmatpush1.bf16.msra.mxu1 %v8005_v18  ;;  %v7997_v29 = vcombine.low %v3355_v1, %v3359_v13 }
 0x212   :  { %v2040_v43 = vadd.f32 %v2027_v38, %v1959_v15  ;;  %v3295_v15 = vld [vmem:[%s11882_s5 + $0x2a0] sm:$0xff] }
 0x213   :  { %v8884_v47 = vpop.f32.mrf.mxu1  ;;  %v7934_v22 = vcombine.high %v3291_v14, %v3295_v15  ;;  %v7933_v28 = vcombine.low %v3291_v14, %v3295_v15  ;;  %6376 = vmatprep.subr.bf16.mxu1 %v7998_v20 }
 0x214   :  { %v10028_v48 = vadd.f32 %v8884_v47, %v2041_v17  ;;  %v7941_v17 = vcombine.low %v3299_v2, %v3303_v5  ;;  %v3455_v47 = vld [vmem:[%s11882_s5 + $0x7a0] sm:$0xff] }
 0x215   :  { %v2105_v51 = vpop.f32.mrf.mxu1  ;;  %6377 = vmatpush1.bf16.msra.mxu1 %v7997_v29  ;;  %v8094_v52 = vcombine.high %v3451_v46, %v3455_v47  ;;  %v8093_v54 = vcombine.low %v3451_v46, %v3455_v47 }
 0x216   :  { %v10033_v55 = vadd.f32 %v2105_v51, %v2039_v26  ;;  %v3287_v26 = vld [vmem:[%s11882_s5 + $0x260] sm:$0xff]  ;;  %6350 = vmatpush2.bf16.msra.mxu0 %v7941_v17  ;;  %6378 = vmatprep.subr.bf16.mxu1 %v7990_v31 }
 0x217   :  { %v8885_v59 = vpop.f32.mrf.mxu1  ;;  %6351 = vmatprep.subr.bf16.mxu0 %v7934_v22  ;;  %v7926_v33 = vcombine.high %v3283_v25, %v3287_v26  ;;  %v7925_v37 = vcombine.low %v3283_v25, %v3287_v26 }
 0x218   :  { %v10044_v60 = vadd.f32 %v8885_v59, %v2042_v34  ;;  %v3339_v34 = vld [vmem:[%s11882_s5 + $0x400] sm:$0xff] }
 0x219   :  { %v2108_v63 = vpop.f32.mrf.mxu1  ;;  %v7982_v39 = vcombine.high %v3339_v34, %v3343_v35  ;;  %6379 = vmatpush1.bf16.msra.mxu1 %v7989_v36 }
 0x21a   :  { %v10049_v4 = vadd.f32 %v2108_v63, %v2040_v43  ;;  %6352 = vmatpush2.bf16.msra.mxu0 %v7933_v28  ;;  %v7981_v43 = vcombine.low %v3339_v34, %v3343_v35 }
 0x21b   :  { %v10060_v7 = vpop.f32.mrf.mxu1  ;;  %6353 = vmatprep.subr.bf16.mxu0 %v7926_v33  ;;  %6380 = vmatprep.subr.bf16.mxu1 %v7982_v39 }
 0x21c   :  { %v2203_v13 = vadd.f32 %v10060_v7, %v10028_v48 }
 0x21d   :  { %v10062_v10 = vpop.f32.mrf.mxu1  ;;  %6381 = vmatpush1.bf16.msra.mxu1 %v7981_v43 }
 0x21e   :  { %6354 = vmatpush2.bf16.msra.mxu0 %v7925_v37  ;;  %6382 = vmatprep.subr.bf16.mxu1 %v8102_v45  ;;  %v2201_v15 = vadd.f32 %v10062_v10, %v10033_v55 }
 0x21f   :  { %v10076_v16 = vpop.f32.mrf.mxu1 }
 0x220   :  { %v2204_v20 = vadd.f32 %v10076_v16, %v10044_v60 }
 0x221   :  { %v10078_v19 = vpop.f32.mrf.mxu1  ;;  %6383 = vmatpush2.bf16.msra.mxu1 %v8101_v50 }
 0x222   :  { %6384 = vmatprep.subr.bf16.mxu1 %v8094_v52  ;;  %v2202_v23 = vadd.f32 %v10078_v19, %v10049_v4 }
 0x223   :  { %v10092_v27 = vpop.f32.mrf.mxu1 }
 0x224   :  { %v2284_v17 = vadd.f32 %v10092_v27, %v2203_v13  ;;  %v3435_v13 = vld [vmem:[%s11882_s5 + $0x700] sm:$0xff] }
 0x225   :  { %v2267_v30 = vpop.f32.mrf.mxu1  ;;  %6385 = vmatpush2.bf16.msra.mxu1 %v8093_v54  ;;  %v7844_v54 = vld [vmem:[%s11881_s4] ss:$0 sm:$0xff] }
 0x226   :  { %v2282_v21 = vadd.f32 %v2267_v30, %v2201_v15 }
 0x227   :  { %v8901_v24 = vpop.f32.mrf.mxu1 }
 0x228   :  { %v2285_v26 = vadd.f32 %v8901_v24, %v2204_v20 }
 0x229   :  { %v2270_v38 = vpop.f32.mrf.mxu1 }
 0x22a   :  { %v2283_v48 = vadd.f32 %v2270_v38, %v2202_v23 }
 0x22b   :  { %v8908_v42 = vpop.f32.mrf.mxu1 }
 0x22c   :  { %v2365_v22 = vadd.f32 %v8908_v42, %v2284_v17 }
 0x22d   :  { %v2348_v44 = vpop.f32.mrf.mxu1 }
 0x22e   :  { %v2363_v29 = vadd.f32 %v2348_v44, %v2282_v21 }
 0x22f   :  { %v8909_v49 = vpop.f32.mrf.mxu1 }
 0x230   :  { %v2366_v31 = vadd.f32 %v8909_v49, %v2285_v26  ;;  %v3431_v26 = vld [vmem:[%s11882_s5 + $0x6e0] sm:$0xff] }
 0x231   :  { %v2351_v51 = vpop.f32.mrf.mxu1 }
 0x232   :  { %v2364_v10 = vadd.f32 %v2351_v51, %v2283_v48 }
 0x233   :  { %v8916_v53 = vpop.f32.mrf.mxu1 }
 0x234   :  { %v2446_v28 = vadd.f32 %v8916_v53, %v2365_v22 }
 0x235   :  { %v2429_v56 = vpop.f32.mrf.mxu1 }
 0x236   :  { %v2444_v33 = vadd.f32 %v2429_v56, %v2363_v29 }
 0x237   :  { %v8917_v57 = vpop.f32.mrf.mxu1 }
 0x238   :  { %v2447_v34 = vadd.f32 %v8917_v57, %v2366_v31  ;;  %v3279_v31 = vld [vmem:[%s11882_s5 + $0x220] sm:$0xff] }
 0x239   :  { %v2432_v58 = vpop.f32.mrf.mxu1 }
 0x23a   :  { %v2445_v60 = vadd.f32 %v2432_v58, %v2364_v10 }
 0x23b   :  { %v8924_v59 = vpop.f32.mrf.mxu1 }
 0x23c   :  { %v2527_v55 = vadd.f32 %v8924_v59, %v2446_v28 }
 0x23d   :  { %v2510_v61 = vpop.f32.mrf.mxu1 }
 0x23e   :  { %v2525_v35 = vadd.f32 %v2510_v61, %v2444_v33 }
 0x23f   :  { %v8925_v62 = vpop.f32.mrf.mxu1 }
 0x240   :  { %v2528_v30 = vadd.f32 %v8925_v62, %v2447_v34  ;;  %v3443_v62 = vld [vmem:[%s11882_s5 + $0x740] sm:$0xff] }
 0x241   :  { %v2513_v63 = vpop.f32.mrf.mxu1 }
 0x242   :  { %v2526_v4 = vadd.f32 %v2513_v63, %v2445_v60  ;;  %v3447_v63 = vld [vmem:[%s11882_s5 + $0x760] sm:$0xff] }
 0x243   :  { %v8932_v0 = vpop.f32.mrf.mxu1 }
 0x244   :  { %v2608_v36 = vadd.f32 %v8932_v0, %v2527_v55 }
 0x245   :  { %v2591_v2 = vpop.f32.mrf.mxu1 }
 0x246   :  { %v2606_v37 = vadd.f32 %v2591_v2, %v2525_v35 }
 0x247   :  { %v8933_v3 = vpop.f32.mrf.mxu1 }
 0x248   :  { %v2609_v24 = vadd.f32 %v8933_v3, %v2528_v30  ;;  %v3419_v30 = vld [vmem:[%s11882_s5 + $0x680] sm:$0xff] }
 0x249   :  { %v2594_v5 = vpop.f32.mrf.mxu1 }
 0x24a   :  { %v2607_v38 = vadd.f32 %v2594_v5, %v2526_v4  ;;  %v8086_v5 = vcombine.high %v3443_v62, %v3447_v63 }
 0x24b   :  { %v8940_v32 = vpop.f32.mrf.mxu1 }
 0x24c   :  { %v2689_v39 = vadd.f32 %v8940_v32, %v2608_v36  ;;  %6386 = vmatprep.subr.bf16.mxu1 %v8086_v5 }
 0x24d   :  { %v2672_v6 = vpop.f32.mrf.mxu1 }
 0x24e   :  { %v2687_v40 = vadd.f32 %v2672_v6, %v2606_v37  ;;  %v8085_v6 = vcombine.low %v3443_v62, %v3447_v63  ;;  %v3423_v37 = vld [vmem:[%s11882_s5 + $0x6a0] sm:$0xff] }
 0x24f   :  { %v8941_v8 = vpop.f32.mrf.mxu1 }
 0x250   :  { %v2690_v43 = vadd.f32 %v8941_v8, %v2609_v24  ;;  %6387 = vmatpush2.bf16.msra.mxu1 %v8085_v6  ;;  %v8062_v24 = vcombine.high %v3419_v30, %v3423_v37 }
 0x251   :  { %v2675_v9 = vpop.f32.mrf.mxu1 }
 0x252   :  { %v2688_v46 = vadd.f32 %v2675_v9, %v2607_v38  ;;  %v3411_v38 = vld [vmem:[%s11882_s5 + $0x640] sm:$0xff] }
 0x253   :  { %v8948_v11 = vpop.f32.mrf.mxu1 }
 0x254   :  { %v2770_v41 = vadd.f32 %v8948_v11, %v2689_v39 }
 0x255   :  { %v2753_v12 = vpop.f32.mrf.mxu1 }
 0x256   :  { %v2768_v44 = vadd.f32 %v2753_v12, %v2687_v40 }
 0x257   :  { %v8949_v1 = vpop.f32.mrf.mxu1 }
 0x258   :  { %v2771_v49 = vadd.f32 %v8949_v1, %v2690_v43 }
 0x259   :  { %v2756_v14 = vpop.f32.mrf.mxu1 }
 0x25a   :  { %v2769_v52 = vadd.f32 %v2756_v14, %v2688_v46  ;;  %v3439_v14 = vld [vmem:[%s11882_s5 + $0x720] sm:$0xff] }
 0x25b   :  { %v8956_v18 = vpop.f32.mrf.mxu1  ;;  %v8078_v20 = vcombine.high %v3435_v13, %v3439_v14  ;;  %v8077_v21 = vcombine.low %v3435_v13, %v3439_v14  ;;  %v3403_v46 = vld [vmem:[%s11882_s5 + $0x600] sm:$0xff] }
 0x25c   :  { %v2851_v45 = vadd.f32 %v8956_v18, %v2770_v41 }
 0x25d   :  { %v2834_v25 = vpop.f32.mrf.mxu1  ;;  %6388 = vmatprep.subr.bf16.mxu1 %v8078_v20 }
 0x25e   :  { %v2849_v50 = vadd.f32 %v2834_v25, %v2768_v44  ;;  %6389 = vmatpush2.bf16.msra.mxu1 %v8077_v21  ;;  %v3427_v25 = vld [vmem:[%s11882_s5 + $0x6c0] sm:$0xff] }
 0x25f   :  { %v8957_v7 = vpop.f32.mrf.mxu1  ;;  %v8070_v28 = vcombine.high %v3427_v25, %v3431_v26  ;;  %v8069_v48 = vcombine.low %v3427_v25, %v3431_v26  ;;  %v3515_v25 = vld [vmem:[%s11882_s5 + $0x980] sm:$0xff] }
 0x260   :  { %v2852_v56 = vadd.f32 %v8957_v7, %v2771_v49  ;;  %v3275_v7 = vld [vmem:[%s11882_s5 + $0x200] sm:$0xff] }
 0x261   :  { %v2837_v27 = vpop.f32.mrf.mxu1  ;;  %6390 = vmatprep.subr.bf16.mxu1 %v8070_v28  ;;  %v7917_v33 = vcombine.low %v3275_v7, %v3279_v31  ;;  %v7918_v55 = vcombine.high %v3275_v7, %v3279_v31  ;;  %v3519_v26 = vld [vmem:[%s11882_s5 + $0x9a0] sm:$0xff] }
 0x262   :  { %v2850_v59 = vadd.f32 %v2837_v27, %v2769_v52  ;;  %6391 = vmatpush2.bf16.msra.mxu1 %v8069_v48  ;;  %v10191_v52 = vld [vmem:[%s11882_s5 + $0x9e0] sm:$0xff] }
 0x263   :  { %v8964_v16 = vpop.f32.mrf.mxu1  ;;  %6355 = vmatprep.subr.bf16.mxu0 %v7918_v55  ;;  %6392 = vmatprep.subr.bf16.mxu1 %v8062_v24  ;;  %v3643_v48 = vld [vmem:[%s11882_s5 + $0xd80] sm:$0xff] }
 0x264   :  { %v2932_v51 = vadd.f32 %v8964_v16, %v2851_v45  ;;  %6356 = vmatpush2.bf16.msra.mxu0 %v7917_v33  ;;  %v3647_v7 = vld [vmem:[%s11882_s5 + $0xda0] sm:$0xff]  ;;  %v8158_v33 = vcombine.high %v3515_v25, %v3519_v26 }
 0x265   :  { %v2915_v19 = vpop.f32.mrf.mxu1 }
 0x266   :  { %v2930_v57 = vadd.f32 %v2915_v19, %v2849_v50  ;;  %v8061_v19 = vcombine.low %v3419_v30, %v3423_v37  ;;  %v3635_v30 = vld [vmem:[%s11882_s5 + $0xd40] sm:$0xff] }
 0x267   :  { %v8965_v42 = vpop.f32.mrf.mxu1  ;;  %v3639_v37 = vld [vmem:[%s11882_s5 + $0xd60] sm:$0xff] }
 0x268   :  { %v2933_v0 = vadd.f32 %v8965_v42, %v2852_v56  ;;  %v3415_v42 = vld [vmem:[%s11882_s5 + $0x660] sm:$0xff]  ;;  %6393 = vmatpush2.bf16.msra.mxu1 %v8061_v19  ;;  %v8285_v19 = vcombine.low %v3643_v48, %v3647_v7 }
 0x269   :  { %v2918_v47 = vpop.f32.mrf.mxu1  ;;  %v8053_v44 = vcombine.low %v3411_v38, %v3415_v42  ;;  %v8054_v45 = vcombine.high %v3411_v38, %v3415_v42  ;;  %v3503_v38 = vld [vmem:[%s11882_s5 + $0x920] sm:$0xff]  ;;  %v8278_v42 = vcombine.high %v3635_v30, %v3639_v37 }
 0x26a   :  { %v2931_v8 = vadd.f32 %v2918_v47, %v2850_v59  ;;  %v3407_v47 = vld [vmem:[%s11882_s5 + $0x620] sm:$0xff] }
 0x26b   :  { %v8972_v53 = vpop.f32.mrf.mxu1  ;;  %v8046_v50 = vcombine.high %v3403_v46, %v3407_v47  ;;  %6394 = vmatprep.subr.bf16.mxu1 %v8054_v45  ;;  %v10200_v59 = vld [vmem:[%s11882_s5 + $0xdc0] sm:$0xff] }
 0x26c   :  { %v3013_v58 = vadd.f32 %v8972_v53, %v2932_v51  ;;  %v10186_v51 = vld [vmem:[%s11882_s5 + $0x9c0] sm:$0xff]  ;;  %6395 = vmatpush2.bf16.msra.mxu1 %v8053_v44 }
 0x26d   :  { %v2996_v61 = vpop.f32.mrf.mxu1  ;;  %v8165_v56 = vcombine.low %v10186_v51, %v10191_v52  ;;  %6396 = vmatprep.subr.bf16.mxu1 %v8046_v50  ;;  %v8277_v50 = vcombine.low %v3635_v30, %v3639_v37  ;;  %v3579_v30 = vld [vmem:[%s11882_s5 + $0xb80] sm:$0xff] }
 0x26e   :  { %v3024_v2 = vadd.f32 %v7844_v54, %v3013_v58  ;;  %v3011_v3 = vadd.f32 %v2996_v61, %v2930_v57  ;;  %v8166_v57 = vcombine.high %v10186_v51, %v10191_v52  ;;  %v10205_v61 = vld [vmem:[%s11882_s5 + $0xde0] sm:$0xff] }
 0x26f   :  { %v8973_v32 = vpop.f32.mrf.mxu1  ;;  %v8293_v62 = vcombine.low %v10200_v59, %v10205_v61  ;;  %v8294_v63 = vcombine.high %v10200_v59, %v10205_v61  ;;  %v3491_v52 = vld [vmem:[%s11882_s5 + $0x8c0] sm:$0xff] }
 0x270   :  { %v3028_v9 = vmax.f32 %v3024_v2, 0.0  ;;  %v3022_v11 = vadd.f32 %v7844_v54, %v3011_v3  ;;  %v3014_v12 = vadd.f32 %v8973_v32, %v2933_v0  ;;  %6407 = vmatprep.subr.bf16.mxu0 %v8166_v57  ;;  %v9122_v32 = vmov 1983009808   ;;  %v3619_v57 = vld [vmem:[%s11882_s5 + $0xcc0] sm:$0xff] }
 0x271   :  { %v2999_v1 = vpop.f32.mrf.mxu1  ;;  %v3163_v6 = vunpack.c.l.s4 %v9122_v32  ;;  %v3583_v37 = vld [vmem:[%s11882_s5 + $0xba0] sm:$0xff] }
 0x272   :  { %3033 = vst.msk [vmem:[#allocation3 + $0x10] sm:$0xff] %vm3030_vm4, %v3028_v9  ;;  %v3026_v15 = vmax.f32 %v3022_v11, 0.0  ;;  %v3025_v17 = vadd.f32 %v7844_v54, %v3014_v12  ;;  %v3012_v18 = vadd.f32 %v2999_v1, %v2931_v8  ;;  %v3165_v8 = vlaneseq }
 0x273   :  { %v3164_v12 = vunpack.c.0.s8 %v3163_v6 }
 0x274   :  { %3031 = vst.msk [vmem:[#allocation3] sm:$0xff] %vm3030_vm4, %v3026_v15  ;;  %v3029_v22 = vmax.f32 %v3025_v17, 0.0  ;;  %v3023_v23 = vadd.f32 %v7844_v54, %v3012_v18  ;;  %v8045_v54 = vcombine.low %v3403_v46, %v3407_v47  ;;  %v10219_v1 = vshrl.u32 %v3165_v8, 7  ;;  %v3627_v46 = vld [vmem:[%s11882_s5 + $0xd00] sm:$0xff] }
 0x275   :  { %v3631_v47 = vld [vmem:[%s11882_s5 + $0xd20] sm:$0xff] }
 0x276   :  { %3034 = vst.msk [vmem:[#allocation3 + $0x18] sm:$0xff] %vm3030_vm4, %v3029_v22  ;;  %v3027_v29 = vmax.f32 %v3023_v23, 0.0  ;;  %6397 = vmatpush2.bf16.msra.mxu1 %v8045_v54  ;;  %v3167_v15 = vsub.s32 %v3164_v12, %v10219_v1  ;;  %v8270_v54 = vcombine.high %v3627_v46, %v3631_v47  ;;  %v8269_v61 = vcombine.low %v3627_v46, %v3631_v47  ;;  %v3475_v8 = vld [vmem:[%s11882_s5 + $0x840] sm:$0xff] }
 0x277   :  { %6448 = vmatprep.subr.bf16.mxu1 %v8294_v63  ;;  %v3487_v63 = vld [vmem:[%s11882_s5 + $0x8a0] sm:$0xff]  ;;  %v8221_v46 = vcombine.low %v3579_v30, %v3583_v37 }
 0x278   :  { %3032 = vst.msk [vmem:[#allocation3 + $0x8] sm:$0xff] %vm3030_vm4, %v3027_v29  ;;  %v3699_v47 = vld [vmem:[%s11882_s5 + $0xf40] sm:$0xff] }
 0x279   :  { %v3097_v10 = vld [vmem:[#allocation3 + $0x10] sm:$0x3]  ;;  %v3112_v27 = vld [vmem:[#allocation3 + $0x14] sm:$0x3] }
 0x27a   :  { %3098 = vst.msk [vmem:[#allocation4 + $0x8] sm:$0x3] %vm3036_vm5, %v3097_v10  ;;  %3113 = vst.msk [vmem:[#allocation4 + $0xa] sm:$0x3] %vm3036_vm5, %v3112_v27  ;;  %v3507_v10 = vld [vmem:[%s11882_s5 + $0x940] sm:$0xff] }
 0x27b   :  { %v7845_v34 = vld.sshfl [vmem:[#allocation3 + $0x2] sm:$0x3 pattern:$0x76325410]  ;;  %v3035_v35 = vld [vmem:[#allocation3] sm:$0x3] }
 0x27c   :  { %3047 = vrot.lane.b32.xlu0 %v7845_v34, %s9121_s2  ;;  %3037 = vst.msk [vmem:[#allocation4] sm:$0x3] %vm3036_vm5, %v3035_v35  ;;  %v3052_v36 = vld [vmem:[#allocation3 + $0x4] sm:$0x3]  ;;  %v8286_v35 = vcombine.high %v3643_v48, %v3647_v7 }
 0x27d   :  { %3053 = vst.msk [vmem:[#allocation4 + $0x2] sm:$0x3] %vm3036_vm5, %v3052_v36  ;;  %v3127_v60 = vld [vmem:[#allocation3 + $0x18] sm:$0x3]  ;;  %v3142_v41 = vld [vmem:[#allocation3 + $0x1c] sm:$0x3] }
 0x27e   :  { %v7846_v16 = vld.sshfl [vmem:[#allocation3 + $0x6] sm:$0x3 pattern:$0x76325410]  ;;  %3128 = vst.msk [vmem:[#allocation4 + $0xc] sm:$0x3] %vm3036_vm5, %v3127_v60  ;;  %v8157_v60 = vcombine.low %v3515_v25, %v3519_v26 }
 0x27f   :  { %v7847_v39 = vld.sshfl [vmem:[#allocation3 + $0xa] sm:$0x3 pattern:$0x76325410]  ;;  %v3067_v4 = vld [vmem:[#allocation3 + $0x8] sm:$0x3] }
 0x280   :  { %3078 = vrot.lane.b32.xlu1 %v7847_v39, %s9121_s2  ;;  %3063 = vrot.lane.b32.xlu0 %v7846_v16, %s9121_s2  ;;  %3068 = vst.msk [vmem:[#allocation4 + $0x4] sm:$0x3] %vm3036_vm5, %v3067_v4  ;;  %v3082_v40 = vld [vmem:[#allocation3 + $0xc] sm:$0x3]  ;;  %3143 = vst.msk [vmem:[#allocation4 + $0xe] sm:$0x3] %vm3036_vm5, %v3142_v41 }
 0x281   :  { %3083 = vst.msk [vmem:[#allocation4 + $0x6] sm:$0x3] %vm3036_vm5, %v3082_v40  ;;  %v7849_v43 = vld.sshfl [vmem:[#allocation3 + $0x12] sm:$0x3 pattern:$0x76325410] }
 0x282   :  { %v7848_v49 = vld.sshfl [vmem:[#allocation3 + $0xe] sm:$0x3 pattern:$0x76325410]  ;;  %v3511_v27 = vld [vmem:[%s11882_s5 + $0x960] sm:$0xff] }
 0x283   :  { %v7850_v53 = vld.sshfl [vmem:[#allocation3 + $0x16] sm:$0x3 pattern:$0x76325410]  ;;  %v8150_v4 = vcombine.high %v3507_v10, %v3511_v27  ;;  %v3499_v41 = vld [vmem:[%s11882_s5 + $0x900] sm:$0xff] }
 0x284   :  { %3093 = vrot.lane.b32.xlu1 %v7848_v49, %s9121_s2  ;;  %3108 = vrot.lane.b32.xlu0 %v7849_v43, %s9121_s2  ;;  %v7851_v58 = vld.sshfl [vmem:[#allocation3 + $0x1a] sm:$0x3 pattern:$0x76325410]  ;;  %v8149_v43 = vcombine.low %v3507_v10, %v3511_v27  ;;  %v8142_v49 = vcombine.high %v3499_v41, %v3503_v38  ;;  %v3599_v25 = vld [vmem:[%s11882_s5 + $0xc20] sm:$0xff] }
 0x285   :  { %v7852_v0 = vld.sshfl [vmem:[#allocation3 + $0x1e] sm:$0x3 pattern:$0x76325410]  ;;  %v3587_v48 = vld [vmem:[%s11882_s5 + $0xbc0] sm:$0xff] }
 0x286   :  { %v3591_v7 = vld [vmem:[%s11882_s5 + $0xbe0] sm:$0xff] }
 0x287   :  { %v3715_v27 = vld [vmem:[%s11882_s5 + $0xfc0] sm:$0xff] }
 0x288   :  { %3123 = vrot.lane.b32.xlu1 %v7850_v53, %s9121_s2  ;;  %3138 = vrot.lane.b32.xlu0 %v7851_v58, %s9121_s2  ;;  %v3495_v53 = vld [vmem:[%s11882_s5 + $0x8e0] sm:$0xff] }
 0x289   :  { %v3623_v58 = vld [vmem:[%s11882_s5 + $0xce0] sm:$0xff]  ;;  %v8134_v59 = vcombine.high %v3491_v52, %v3495_v53 }
 0x28a   :  { %v8261_v6 = vcombine.low %v3619_v57, %v3623_v58 }
 0x28c   :  { %3153 = vrot.lane.b32.xlu1 %v7852_v0, %s9121_s2  ;;  %v8262_v0 = vcombine.high %v3619_v57, %v3623_v58  ;;  %v3691_v58 = vld [vmem:[%s11882_s5 + $0xf00] sm:$0xff] }
 0x2ee   :  { %v3048_v2 = vpop.permute.xlu0 %3047 }
 0x2ef   :  { %3051 = vst.msk [vmem:[#allocation4] sm:$0x3] %vm3050_vm6, %v3048_v2  ;;  %v8133_v2 = vcombine.low %v3491_v52, %v3495_v53  ;;  %v3563_v53 = vld [vmem:[%s11882_s5 + $0xb00] sm:$0xff] }
 0x2f2   :  { %v3079_v3 = vpop.permute.xlu1 %3078  ;;  %v3064_v5 = vpop.permute.xlu0 %3063 }
 0x2f3   :  { %3081 = vst.msk [vmem:[#allocation4 + $0x4] sm:$0x3] %vm3050_vm6, %v3079_v3  ;;  %3066 = vst.msk [vmem:[#allocation4 + $0x2] sm:$0x3] %vm3050_vm6, %v3064_v5  ;;  %v3611_v3 = vld [vmem:[%s11882_s5 + $0xc80] sm:$0xff] }
 0x2f4   :  { %v3615_v5 = vld [vmem:[%s11882_s5 + $0xca0] sm:$0xff] }
 0x2f6   :  { %v3094_v9 = vpop.permute.xlu1 %3093  ;;  %v3109_v11 = vpop.permute.xlu0 %3108 }
 0x2f7   :  { %3096 = vst.msk [vmem:[#allocation4 + $0x6] sm:$0x3] %vm3050_vm6, %v3094_v9  ;;  %3111 = vst.msk [vmem:[#allocation4 + $0x8] sm:$0x3] %vm3050_vm6, %v3109_v11  ;;  %v3479_v9 = vld [vmem:[%s11882_s5 + $0x860] sm:$0xff]  ;;  %v8254_v11 = vcombine.high %v3611_v3, %v3615_v5 }
 0x2fa   :  { %v3124_v13 = vpop.permute.xlu1 %3123  ;;  %v3139_v14 = vpop.permute.xlu0 %3138 }
 0x2fb   :  { %3126 = vst.msk [vmem:[#allocation4 + $0xa] sm:$0x3] %vm3050_vm6, %v3124_v13  ;;  %3141 = vst.msk [vmem:[#allocation4 + $0xc] sm:$0x3] %vm3050_vm6, %v3139_v14  ;;  %v3603_v13 = vld [vmem:[%s11882_s5 + $0xc40] sm:$0xff] }
 0x2fc   :  { %v3607_v14 = vld [vmem:[%s11882_s5 + $0xc60] sm:$0xff] }
 0x2fe   :  { %v3154_v17 = vpop.permute.xlu1 %3153  ;;  %v3157_v18 = vld [vmem:[#allocation4] sm:$0xff] }
 0x2ff   :  { %3156 = vst.msk [vmem:[#allocation4 + $0xe] sm:$0x3] %vm3050_vm6, %v3154_v17  ;;  %v3168_v20 = vrot.slane %v3157_v18, %v3167_v15  ;;  %v3161_v21 = vcombine.high %v3157_v18, %v3157_v18  ;;  %v8253_v17 = vcombine.low %v3611_v3, %v3615_v5  ;;  %v3467_v18 = vld [vmem:[%s11882_s5 + $0x800] sm:$0xff] }
 0x300   :  { %v3683_v5 = vld [vmem:[%s11882_s5 + $0xec0] sm:$0xff] }
 0x301   :  { %v3176_v22 = vcombine.high %v3168_v20, %v3168_v20  ;;  %v3175_v23 = vrot.slane %v3161_v21, %v3167_v15  ;;  %v10239_v31 = vpack.c.bf16 %v3168_v20, %v3168_v20  ;;  %v3471_v20 = vld [vmem:[%s11882_s5 + $0x820] sm:$0xff]  ;;  %v8246_v21 = vcombine.high %v3603_v13, %v3607_v14 }
 0x302   :  { %v8110_v26 = vcombine.high %v3467_v18, %v3471_v20  ;;  %v8109_v10 = vcombine.low %v3467_v18, %v3471_v20  ;;  %v3539_v20 = vld [vmem:[%s11882_s5 + $0xa40] sm:$0xff] }
 0x303   :  { %v10231_v29 = vpack.c.bf16 %v3176_v22, %v3176_v22  ;;  %v3177_v28 = vcombine.high %v3175_v23, %v3175_v23  ;;  %v10251_v34 = vpack.c.bf16 %v3175_v23, %v3175_v23  ;;  %v8117_v22 = vcombine.low %v3475_v8, %v3479_v9  ;;  %v3595_v23 = vld [vmem:[%s11882_s5 + $0xc00] sm:$0xff] }
 0x305   :  { %6357 = vmatprep.mubr.bf16.mxu0 %v10231_v29  ;;  %v10242_v55 = vpack.c.bf16 %v3177_v28, %v3177_v28  ;;  %v8245_v28 = vcombine.low %v3603_v13, %v3607_v14  ;;  %v3675_v14 = vld [vmem:[%s11882_s5 + $0xe80] sm:$0xff] }
 0x306   :  { %6358 = vmatmul.mubr.bf16.vlgmr.msra.gmra.mxu0 %v10239_v31  ;;  %v3158_v36 = vld [vmem:[#allocation4 + $0x8] sm:$0xff] }
 0x307   :  { %6408 = vmatpush1.bf16.msra.mxu0 %v8165_v56  ;;  %6398 = vmatprep.mubr.bf16.mxu1 %v10242_v55  ;;  %v10254_v16 = vrot.slane %v3158_v36, %v3167_v15  ;;  %v3178_v39 = vcombine.high %v3158_v36, %v3158_v36  ;;  %v8141_v56 = vcombine.low %v3499_v41, %v3503_v38 }
 0x308   :  { %6399 = vmatmul.mubr.bf16.vlgmr.msra.gmra.mxu1 %v10251_v34  ;;  %6409 = vmatprep.subr.bf16.mxu0 %v8158_v33  ;;  %v8238_v33 = vcombine.high %v3595_v23, %v3599_v25  ;;  %v8230_v36 = vcombine.high %v3587_v48, %v3591_v7  ;;  %v8222_v41 = vcombine.high %v3579_v30, %v3583_v37  ;;  %v3268_v37 = vld [vmem:[%s11882_s5 + $0x1c8] sm:$0xff] }
 0x309   :  { %6449 = vmatpush1.bf16.msra.mxu1 %v8293_v62  ;;  %v3193_v24 = vcombine.high %v10254_v16, %v10254_v16  ;;  %v10265_v40 = vrot.slane %v3178_v39, %v3167_v15  ;;  %v3483_v62 = vld [vmem:[%s11882_s5 + $0x880] sm:$0xff]  ;;  %v8118_v15 = vcombine.high %v3475_v8, %v3479_v9 }
 0x30a   :  { %6450 = vmatprep.subr.bf16.mxu1 %v8286_v35  ;;  %v8126_v32 = vcombine.high %v3483_v62, %v3487_v63  ;;  %v8125_v12 = vcombine.low %v3483_v62, %v3487_v63  ;;  %v3719_v35 = vld [vmem:[%s11882_s5 + $0xfe0] sm:$0xff] }
 0x30b   :  { %6410 = vmatpush1.bf16.msra.mxu0 %v8157_v60  ;;  %v10273_v44 = vpack.c.bf16 %v3193_v24, %v3193_v24  ;;  %v3194_v45 = vcombine.high %v10265_v40, %v10265_v40  ;;  %v8237_v60 = vcombine.low %v3595_v23, %v3599_v25  ;;  %v8358_v39 = vcombine.high %v3715_v27, %v3719_v35  ;;  %v3711_v24 = vld [vmem:[%s11882_s5 + $0xfa0] sm:$0xff] }
 0x30c   :  { %6411 = vmatprep.subr.bf16.mxu0 %v8150_v4  ;;  %v8229_v4 = vcombine.low %v3587_v48, %v3591_v7  ;;  %v8357_v38 = vcombine.low %v3715_v27, %v3719_v35  ;;  %v3555_v63 = vld [vmem:[%s11882_s5 + $0xac0] sm:$0xff] }
 0x30d   :  { %6451 = vmatpush1.bf16.msra.mxu1 %v8285_v19  ;;  %6439 = vmatprep.mubr.bf16.mxu0 %v10273_v44  ;;  %v10284_v51 = vpack.c.bf16 %v3194_v45, %v3194_v45  ;;  %v3707_v19 = vld [vmem:[%s11882_s5 + $0xf80] sm:$0xff] }
 0x30e   :  { %6452 = vmatprep.subr.bf16.mxu1 %v8278_v42  ;;  %v3571_v42 = vld [vmem:[%s11882_s5 + $0xb40] sm:$0xff]  ;;  %v8350_v45 = vcombine.high %v3707_v19, %v3711_v24  ;;  %v8349_v52 = vcombine.low %v3707_v19, %v3711_v24  ;;  %v3396_v24 = vld [vmem:[%s11882_s5 + $0x5c8] sm:$0xff] }
 0x30f   :  { %6412 = vmatpush1.bf16.msra.mxu0 %v8149_v43  ;;  %6480 = vmatprep.mubr.bf16.mxu1 %v10284_v51  ;;  %v3575_v43 = vld [vmem:[%s11882_s5 + $0xb60] sm:$0xff] }
 0x310   :  { %6413 = vmatprep.subr.bf16.mxu0 %v8142_v49  ;;  %v3703_v49 = vld [vmem:[%s11882_s5 + $0xf60] sm:$0xff]  ;;  %v8213_v57 = vcombine.low %v3571_v42, %v3575_v43 }
 0x311   :  { %6453 = vmatpush1.bf16.msra.mxu1 %v8277_v50  ;;  %v8214_v50 = vcombine.high %v3571_v42, %v3575_v43  ;;  %v8341_v62 = vcombine.low %v3699_v47, %v3703_v49  ;;  %v3547_v9 = vld [vmem:[%s11882_s5 + $0xa80] sm:$0xff]  ;;  %v3260_v43 = vld [vmem:[%s11882_s5 + $0x188] sm:$0xff] }
 0x312   :  { %6454 = vmatprep.subr.bf16.mxu1 %v8270_v54  ;;  %v3567_v54 = vld [vmem:[%s11882_s5 + $0xb20] sm:$0xff] }
 0x313   :  { %6414 = vmatpush1.bf16.msra.mxu0 %v8141_v56  ;;  %v8342_v56 = vcombine.high %v3699_v47, %v3703_v49  ;;  %v8205_v3 = vcombine.low %v3563_v53, %v3567_v54  ;;  %v3667_v25 = vld [vmem:[%s11882_s5 + $0xe40] sm:$0xff]  ;;  %v3388_v49 = vld [vmem:[%s11882_s5 + $0x588] sm:$0xff] }
 0x314   :  { %6415 = vmatprep.subr.bf16.mxu0 %v8134_v59  ;;  %v3695_v59 = vld [vmem:[%s11882_s5 + $0xf20] sm:$0xff] }
 0x315   :  { %6455 = vmatpush1.bf16.msra.mxu1 %v8269_v61  ;;  %v8206_v61 = vcombine.high %v3563_v53, %v3567_v54  ;;  %v8333_v8 = vcombine.low %v3691_v58, %v3695_v59  ;;  %v3531_v7 = vld [vmem:[%s11882_s5 + $0xa00] sm:$0xff] }
 0x316   :  { %6456 = vmatprep.subr.bf16.mxu1 %v8262_v0  ;;  %v3559_v0 = vld [vmem:[%s11882_s5 + $0xae0] sm:$0xff] }
 0x317   :  { %6416 = vmatpush1.bf16.msra.mxu0 %v8133_v2  ;;  %v8334_v2 = vcombine.high %v3691_v58, %v3695_v59  ;;  %v8197_v13 = vcombine.low %v3555_v63, %v3559_v0  ;;  %v3659_v35 = vld [vmem:[%s11882_s5 + $0xe00] sm:$0xff]  ;;  %v10468_v58 = vpack.c.bf16 %v10265_v40, %v10265_v40 }
 0x318   :  { %6417 = vmatprep.subr.bf16.mxu0 %v8126_v32  ;;  %v3687_v32 = vld [vmem:[%s11882_s5 + $0xee0] sm:$0xff] }
 0x319   :  { %6457 = vmatpush1.bf16.msra.mxu1 %v8261_v6  ;;  %v8198_v6 = vcombine.high %v3555_v63, %v3559_v0  ;;  %v8325_v18 = vcombine.low %v3683_v5, %v3687_v32  ;;  %v3244_v0 = vld [vmem:[%s11882_s5 + $0x108] sm:$0xff] }
 0x31a   :  { %6458 = vmatprep.subr.bf16.mxu1 %v8254_v11  ;;  %v3551_v11 = vld [vmem:[%s11882_s5 + $0xaa0] sm:$0xff] }
 0x31b   :  { %6418 = vmatpush1.bf16.msra.mxu0 %v8125_v12  ;;  %v8326_v12 = vcombine.high %v3683_v5, %v3687_v32  ;;  %v8189_v23 = vcombine.low %v3547_v9, %v3551_v11  ;;  %v3372_v32 = vld [vmem:[%s11882_s5 + $0x508] sm:$0xff] }
 0x31c   :  { %6419 = vmatprep.subr.bf16.mxu0 %v8118_v15  ;;  %v3679_v15 = vld [vmem:[%s11882_s5 + $0xea0] sm:$0xff] }
 0x31d   :  { %6459 = vmatpush1.bf16.msra.mxu1 %v8253_v17  ;;  %v8190_v17 = vcombine.high %v3547_v9, %v3551_v11  ;;  %v8317_v48 = vcombine.low %v3675_v14, %v3679_v15  ;;  %v3236_v11 = vld [vmem:[%s11882_s5 + $0xc8] sm:$0xff] }
 0x31e   :  { %6460 = vmatprep.subr.bf16.mxu1 %v8246_v21  ;;  %v3543_v21 = vld [vmem:[%s11882_s5 + $0xa60] sm:$0xff] }
 0x31f   :  { %6420 = vmatpush1.bf16.msra.mxu0 %v8117_v22  ;;  %v8318_v22 = vcombine.high %v3675_v14, %v3679_v15  ;;  %v8181_v27 = vcombine.low %v3539_v20, %v3543_v21  ;;  %v3364_v15 = vld [vmem:[%s11882_s5 + $0x4c8] sm:$0xff] }
 0x320   :  { %6421 = vmatprep.subr.bf16.mxu0 %v8110_v26  ;;  %v3671_v26 = vld [vmem:[%s11882_s5 + $0xe60] sm:$0xff] }
 0x321   :  { %6461 = vmatpush1.bf16.msra.mxu1 %v8245_v28  ;;  %v8182_v28 = vcombine.high %v3539_v20, %v3543_v21  ;;  %v8309_v30 = vcombine.low %v3667_v25, %v3671_v26  ;;  %v3228_v21 = vld [vmem:[%s11882_s5 + $0x88] sm:$0xff] }
 0x322   :  { %6462 = vmatprep.subr.bf16.mxu1 %v8238_v33  ;;  %v3535_v33 = vld [vmem:[%s11882_s5 + $0xa20] sm:$0xff] }
 0x323   :  { %6422 = vmatpush1.bf16.msra.mxu0 %v8109_v10  ;;  %v8310_v10 = vcombine.high %v3667_v25, %v3671_v26  ;;  %v8173_v19 = vcombine.low %v3531_v7, %v3535_v33  ;;  %v3356_v26 = vld [vmem:[%s11882_s5 + $0x488] sm:$0xff] }
 0x324   :  { %6423 = vmatprep.subr.bf16.mxu0 %v8230_v36  ;;  %v3663_v36 = vld [vmem:[%s11882_s5 + $0xe20] sm:$0xff] }
 0x325   :  { %6463 = vmatpush1.bf16.msra.mxu1 %v8237_v60  ;;  %v8174_v60 = vcombine.high %v3531_v7, %v3535_v33  ;;  %v8301_v42 = vcombine.low %v3659_v35, %v3663_v36  ;;  %v3220_v33 = vld [vmem:[%s11882_s5 + $0x48] sm:$0xff] }
 0x326   :  { %6464 = vmatprep.subr.bf16.mxu1 %v8358_v39  ;;  %v3272_v39 = vld [vmem:[%s11882_s5 + $0x1e8] sm:$0xff] }
 0x327   :  { %6424 = vmatpush2.bf16.msra.mxu0 %v8229_v4  ;;  %v8302_v4 = vcombine.high %v3659_v35, %v3663_v36  ;;  %v7911_v47 = vcombine.low %v3268_v37, %v3272_v39  ;;  %v3348_v36 = vld [vmem:[%s11882_s5 + $0x448] sm:$0xff] }
 0x328   :  { %6425 = vmatprep.subr.bf16.mxu0 %v8222_v41  ;;  %v3400_v41 = vld [vmem:[%s11882_s5 + $0x5e8] sm:$0xff] }
 0x329   :  { %6465 = vmatpush2.bf16.msra.mxu1 %v8357_v38  ;;  %v7912_v38 = vcombine.high %v3268_v37, %v3272_v39  ;;  %v8039_v54 = vcombine.low %v3396_v24, %v3400_v41  ;;  %v3212_v39 = vld [vmem:[%s11882_s5 + $0x8] sm:$0xff] }
 0x32a   :  { %6466 = vmatprep.subr.bf16.mxu1 %v8350_v45  ;;  %v3264_v45 = vld [vmem:[%s11882_s5 + $0x1a8] sm:$0xff] }
 0x32b   :  { %6426 = vmatpush2.bf16.msra.mxu0 %v8221_v46  ;;  %v8040_v46 = vcombine.high %v3396_v24, %v3400_v41  ;;  %v7904_v53 = vcombine.high %v3260_v43, %v3264_v45  ;;  %v7903_v59 = vcombine.low %v3260_v43, %v3264_v45  ;;  %v3340_v41 = vld [vmem:[%s11882_s5 + $0x408] sm:$0xff] }
 0x32c   :  { %6427 = vmatprep.subr.bf16.mxu0 %v8214_v50  ;;  %v3392_v50 = vld [vmem:[%s11882_s5 + $0x5a8] sm:$0xff] }
 0x32d   :  { %6467 = vmatpush2.bf16.msra.mxu1 %v8349_v52  ;;  %v10457_v52 = vpack.c.bf16 %v10254_v16, %v10254_v16  ;;  %v8032_v16 = vcombine.high %v3388_v49, %v3392_v50  ;;  %v8031_v40 = vcombine.low %v3388_v49, %v3392_v50  ;;  %v3332_v45 = vld [vmem:[%s11882_s5 + $0x3c8] sm:$0xff] }
 0x32e   :  { %6468 = vmatprep.subr.bf16.mxu1 %v8342_v56  ;;  %v3252_v56 = vld [vmem:[%s11882_s5 + $0x148] sm:$0xff] }
 0x32f   :  { %6428 = vmatpush2.bf16.msra.mxu0 %v8213_v57  ;;  %v3256_v57 = vld [vmem:[%s11882_s5 + $0x168] sm:$0xff] }
 0x330   :  { %6429 = vmatprep.subr.bf16.mxu0 %v8206_v61  ;;  %v3380_v61 = vld [vmem:[%s11882_s5 + $0x548] sm:$0xff]  ;;  %v7896_v63 = vcombine.high %v3252_v56, %v3256_v57  ;;  %v7895_v5 = vcombine.low %v3252_v56, %v3256_v57 }
 0x331   :  { %6469 = vmatpush2.bf16.msra.mxu1 %v8341_v62  ;;  %v3384_v62 = vld [vmem:[%s11882_s5 + $0x568] sm:$0xff] }
 0x332   :  { %6470 = vmatprep.subr.bf16.mxu1 %v8334_v2  ;;  %v3248_v2 = vld [vmem:[%s11882_s5 + $0x128] sm:$0xff]  ;;  %v8023_v9 = vcombine.low %v3380_v61, %v3384_v62 }
 0x333   :  { %6430 = vmatpush2.bf16.msra.mxu0 %v8205_v3  ;;  %v8024_v3 = vcombine.high %v3380_v61, %v3384_v62  ;;  %v7887_v14 = vcombine.low %v3244_v0, %v3248_v2  ;;  %v3460_v50 = vld [vmem:[%s11882_s5 + $0x7c8] sm:$0xff] }
 0x334   :  { %6431 = vmatprep.subr.bf16.mxu0 %v8198_v6  ;;  %v3376_v6 = vld [vmem:[%s11882_s5 + $0x528] sm:$0xff] }
 0x335   :  { %6471 = vmatpush2.bf16.msra.mxu1 %v8333_v8  ;;  %v7888_v8 = vcombine.high %v3244_v0, %v3248_v2  ;;  %v8015_v20 = vcombine.low %v3372_v32, %v3376_v6  ;;  %v3324_v57 = vld [vmem:[%s11882_s5 + $0x388] sm:$0xff] }
 0x336   :  { %6472 = vmatprep.subr.bf16.mxu1 %v8326_v12  ;;  %v3240_v12 = vld [vmem:[%s11882_s5 + $0xe8] sm:$0xff] }
 0x337   :  { %6432 = vmatpush2.bf16.msra.mxu0 %v8197_v13  ;;  %v8016_v13 = vcombine.high %v3372_v32, %v3376_v6  ;;  %v7879_v25 = vcombine.low %v3236_v11, %v3240_v12  ;;  %v3452_v62 = vld [vmem:[%s11882_s5 + $0x788] sm:$0xff] }
 0x338   :  { %6433 = vmatprep.subr.bf16.mxu0 %v8190_v17  ;;  %v3368_v17 = vld [vmem:[%s11882_s5 + $0x4e8] sm:$0xff] }
 0x339   :  { %6473 = vmatpush2.bf16.msra.mxu1 %v8325_v18  ;;  %v7880_v18 = vcombine.high %v3236_v11, %v3240_v12  ;;  %v8007_v7 = vcombine.low %v3364_v15, %v3368_v17  ;;  %v3316_v2 = vld [vmem:[%s11882_s5 + $0x348] sm:$0xff] }
 0x33a   :  { %6474 = vmatprep.subr.bf16.mxu1 %v8318_v22  ;;  %v3232_v22 = vld [vmem:[%s11882_s5 + $0xa8] sm:$0xff] }
 0x33b   :  { %6434 = vmatpush2.bf16.msra.mxu0 %v8189_v23  ;;  %v8008_v23 = vcombine.high %v3364_v15, %v3368_v17  ;;  %v7871_v35 = vcombine.low %v3228_v21, %v3232_v22  ;;  %v3444_v6 = vld [vmem:[%s11882_s5 + $0x748] sm:$0xff] }
 0x33c   :  { %6435 = vmatprep.subr.bf16.mxu0 %v8182_v28  ;;  %v3360_v28 = vld [vmem:[%s11882_s5 + $0x4a8] sm:$0xff] }
 0x33d   :  { %6475 = vmatpush2.bf16.msra.mxu1 %v8317_v48  ;;  %v7872_v48 = vcombine.high %v3228_v21, %v3232_v22  ;;  %v7999_v37 = vcombine.low %v3356_v26, %v3360_v28  ;;  %v3308_v12 = vld [vmem:[%s11882_s5 + $0x308] sm:$0xff] }
 0x33e   :  { %6476 = vmatprep.subr.bf16.mxu1 %v8310_v10  ;;  %v3224_v10 = vld [vmem:[%s11882_s5 + $0x68] sm:$0xff] }
 0x33f   :  { %6436 = vmatpush2.bf16.msra.mxu0 %v8181_v27  ;;  %v8000_v27 = vcombine.high %v3356_v26, %v3360_v28  ;;  %v7863_v24 = vcombine.low %v3220_v33, %v3224_v10  ;;  %v3436_v17 = vld [vmem:[%s11882_s5 + $0x708] sm:$0xff] }
 0x340   :  { %6437 = vmatprep.subr.bf16.mxu0 %v8174_v60  ;;  %v3352_v60 = vld [vmem:[%s11882_s5 + $0x468] sm:$0xff] }
 0x341   :  { %6477 = vmatpush2.bf16.msra.mxu1 %v8309_v30  ;;  %v7864_v30 = vcombine.high %v3220_v33, %v3224_v10  ;;  %v7991_v43 = vcombine.low %v3348_v36, %v3352_v60  ;;  %v3300_v22 = vld [vmem:[%s11882_s5 + $0x2c8] sm:$0xff] }
 0x342   :  { %6478 = vmatprep.subr.bf16.mxu1 %v8302_v4  ;;  %v3216_v4 = vld [vmem:[%s11882_s5 + $0x28] sm:$0xff] }
 0x343   :  { %6438 = vmatpush2.bf16.msra.mxu0 %v8173_v19  ;;  %v7992_v19 = vcombine.high %v3348_v36, %v3352_v60  ;;  %v7855_v49 = vcombine.low %v3212_v39, %v3216_v4  ;;  %v3428_v28 = vld [vmem:[%s11882_s5 + $0x6c8] sm:$0xff] }
 0x344   :  { %6489 = vmatprep.subr.bf16.mxu0 %v7912_v38  ;;  %v3344_v38 = vld [vmem:[%s11882_s5 + $0x428] sm:$0xff] }
 0x345   :  { %6479 = vmatpush2.bf16.msra.mxu1 %v8301_v42  ;;  %v7856_v42 = vcombine.high %v3212_v39, %v3216_v4  ;;  %v7983_v56 = vcombine.low %v3340_v41, %v3344_v38  ;;  %v3292_v10 = vld [vmem:[%s11882_s5 + $0x288] sm:$0xff] }
 0x346   :  { %6440 = vmatmul.mubr.bf16.vlgmr.msra.gmra.mxu0 %v10457_v52  ;;  %6530 = vmatprep.subr.bf16.mxu1 %v8040_v46  ;;  %v3336_v46 = vld [vmem:[%s11882_s5 + $0x3e8] sm:$0xff] }
 0x347   :  { %6490 = vmatpush1.bf16.msra.mxu0 %v7911_v47  ;;  %6521 = vmatprep.mubr.bf16.mxu0 %v10231_v29  ;;  %v7984_v47 = vcombine.high %v3340_v41, %v3344_v38  ;;  %v7975_v61 = vcombine.low %v3332_v45, %v3336_v46  ;;  %v3420_v60 = vld [vmem:[%s11882_s5 + $0x688] sm:$0xff] }
 0x348   :  { %6481 = vmatmul.mubr.bf16.vlgmr.msra.gmra.mxu1 %v10468_v58  ;;  %6491 = vmatprep.subr.bf16.mxu0 %v7904_v53  ;;  %v3464_v53 = vld [vmem:[%s11882_s5 + $0x7e8] sm:$0xff] }
 0x349   :  { %6531 = vmatpush1.bf16.msra.mxu1 %v8039_v54  ;;  %6562 = vmatprep.mubr.bf16.mxu1 %v10242_v55  ;;  %v7976_v54 = vcombine.high %v3332_v45, %v3336_v46  ;;  %v8103_v0 = vcombine.low %v3460_v50, %v3464_v53  ;;  %v3284_v4 = vld [vmem:[%s11882_s5 + $0x248] sm:$0xff] }
 0x34a   :  { %6532 = vmatprep.subr.bf16.mxu1 %v8032_v16  ;;  %v3328_v16 = vld [vmem:[%s11882_s5 + $0x3a8] sm:$0xff] }
 0x34b   :  { %6492 = vmatpush1.bf16.msra.mxu0 %v7903_v59  ;;  %v8104_v59 = vcombine.high %v3460_v50, %v3464_v53  ;;  %v7967_v32 = vcombine.low %v3324_v57, %v3328_v16  ;;  %v3412_v38 = vld [vmem:[%s11882_s5 + $0x648] sm:$0xff] }
 0x34c   :  { %6493 = vmatprep.subr.bf16.mxu0 %v7896_v63  ;;  %v3456_v63 = vld [vmem:[%s11882_s5 + $0x7a8] sm:$0xff] }
 0x34d   :  { %6533 = vmatpush1.bf16.msra.mxu1 %v8031_v40  ;;  %v7968_v40 = vcombine.high %v3324_v57, %v3328_v16  ;;  %v8095_v11 = vcombine.low %v3452_v62, %v3456_v63  ;;  %v3276_v46 = vld [vmem:[%s11882_s5 + $0x208] sm:$0xff] }
 0x34e   :  { %6534 = vmatprep.subr.bf16.mxu1 %v8024_v3  ;;  %v3320_v3 = vld [vmem:[%s11882_s5 + $0x368] sm:$0xff] }
 0x34f   :  { %6494 = vmatpush1.bf16.msra.mxu0 %v7895_v5  ;;  %v8096_v5 = vcombine.high %v3452_v62, %v3456_v63  ;;  %v7959_v15 = vcombine.low %v3316_v2, %v3320_v3  ;;  %v3404_v53 = vld [vmem:[%s11882_s5 + $0x608] sm:$0xff] }
 0x350   :  { %6495 = vmatprep.subr.bf16.mxu0 %v7888_v8  ;;  %v3448_v8 = vld [vmem:[%s11882_s5 + $0x768] sm:$0xff] }
 0x351   :  { %6535 = vmatpush1.bf16.msra.mxu1 %v8023_v9  ;;  %v7960_v9 = vcombine.high %v3316_v2, %v3320_v3  ;;  %v8087_v21 = vcombine.low %v3444_v6, %v3448_v8  ;;  %v3524_v16 = vld [vmem:[%s11882_s5 + $0x9c8] sm:$0xff] }
 0x352   :  { %6536 = vmatprep.subr.bf16.mxu1 %v8016_v13  ;;  %v3312_v13 = vld [vmem:[%s11882_s5 + $0x328] sm:$0xff] }
 0x353   :  { %6496 = vmatpush1.bf16.msra.mxu0 %v7887_v14  ;;  %v8088_v14 = vcombine.high %v3444_v6, %v3448_v8  ;;  %v7951_v26 = vcombine.low %v3308_v12, %v3312_v13  ;;  %v3652_v63 = vld [vmem:[%s11882_s5 + $0xdc8] sm:$0xff] }
 0x354   :  { %6497 = vmatprep.subr.bf16.mxu0 %v7880_v18  ;;  %v3440_v18 = vld [vmem:[%s11882_s5 + $0x728] sm:$0xff] }
 0x355   :  { %6537 = vmatpush1.bf16.msra.mxu1 %v8015_v20  ;;  %v7952_v20 = vcombine.high %v3308_v12, %v3312_v13  ;;  %v8079_v33 = vcombine.low %v3436_v17, %v3440_v18  ;;  %v3516_v3 = vld [vmem:[%s11882_s5 + $0x988] sm:$0xff] }
 0x356   :  { %6538 = vmatprep.subr.bf16.mxu1 %v8008_v23  ;;  %v3304_v23 = vld [vmem:[%s11882_s5 + $0x2e8] sm:$0xff] }
 0x357   :  { %6498 = vmatpush1.bf16.msra.mxu0 %v7879_v25  ;;  %v8080_v25 = vcombine.high %v3436_v17, %v3440_v18  ;;  %v7943_v36 = vcombine.low %v3300_v22, %v3304_v23  ;;  %v3644_v8 = vld [vmem:[%s11882_s5 + $0xd88] sm:$0xff] }
 0x358   :  { %6499 = vmatprep.subr.bf16.mxu0 %v7872_v48  ;;  %v3432_v48 = vld [vmem:[%s11882_s5 + $0x6e8] sm:$0xff] }
 0x359   :  { %6539 = vmatpush1.bf16.msra.mxu1 %v8007_v7  ;;  %v7944_v7 = vcombine.high %v3300_v22, %v3304_v23  ;;  %v8071_v39 = vcombine.low %v3428_v28, %v3432_v48  ;;  %v3508_v13 = vld [vmem:[%s11882_s5 + $0x948] sm:$0xff] }
 0x35a   :  { %6540 = vmatprep.subr.bf16.mxu1 %v8000_v27  ;;  %v3296_v27 = vld [vmem:[%s11882_s5 + $0x2a8] sm:$0xff] }
 0x35b   :  { %6500 = vmatpush1.bf16.msra.mxu0 %v7871_v35  ;;  %v8072_v35 = vcombine.high %v3428_v28, %v3432_v48  ;;  %v7935_v41 = vcombine.low %v3292_v10, %v3296_v27  ;;  %v3636_v18 = vld [vmem:[%s11882_s5 + $0xd48] sm:$0xff] }
 0x35c   :  { %6501 = vmatprep.subr.bf16.mxu0 %v7864_v30  ;;  %v3424_v30 = vld [vmem:[%s11882_s5 + $0x6a8] sm:$0xff] }
 0x35d   :  { %6541 = vmatpush1.bf16.msra.mxu1 %v7999_v37  ;;  %v7936_v37 = vcombine.high %v3292_v10, %v3296_v27  ;;  %v8063_v45 = vcombine.low %v3420_v60, %v3424_v30  ;;  %v3500_v23 = vld [vmem:[%s11882_s5 + $0x908] sm:$0xff] }
 0x35e   :  { %6542 = vmatprep.subr.bf16.mxu1 %v7992_v19  ;;  %v3288_v19 = vld [vmem:[%s11882_s5 + $0x268] sm:$0xff] }
 0x35f   :  { %6502 = vmatpush1.bf16.msra.mxu0 %v7863_v24  ;;  %v8064_v24 = vcombine.high %v3420_v60, %v3424_v30  ;;  %v7927_v50 = vcombine.low %v3284_v4, %v3288_v19  ;;  %v3628_v48 = vld [vmem:[%s11882_s5 + $0xd08] sm:$0xff] }
 0x360   :  { %6503 = vmatprep.subr.bf16.mxu0 %v7856_v42  ;;  %v3416_v42 = vld [vmem:[%s11882_s5 + $0x668] sm:$0xff] }
 0x361   :  { %6543 = vmatpush1.bf16.msra.mxu1 %v7991_v43  ;;  %v7928_v43 = vcombine.high %v3284_v4, %v3288_v19  ;;  %v8055_v57 = vcombine.low %v3412_v38, %v3416_v42  ;;  %v3492_v27 = vld [vmem:[%s11882_s5 + $0x8c8] sm:$0xff] }
 0x362   :  { %6544 = vmatprep.subr.bf16.mxu1 %v7984_v47  ;;  %v3280_v47 = vld [vmem:[%s11882_s5 + $0x228] sm:$0xff] }
 0x363   :  { %6504 = vmatpush1.bf16.msra.mxu0 %v7855_v49  ;;  %v8056_v49 = vcombine.high %v3412_v38, %v3416_v42  ;;  %v7919_v62 = vcombine.low %v3276_v46, %v3280_v47  ;;  %v3620_v30 = vld [vmem:[%s11882_s5 + $0xcc8] sm:$0xff] }
 0x364   :  { %6505 = vmatprep.subr.bf16.mxu0 %v7976_v54  ;;  %v3408_v54 = vld [vmem:[%s11882_s5 + $0x628] sm:$0xff] }
 0x365   :  { %6545 = vmatpush1.bf16.msra.mxu1 %v7983_v56  ;;  %v7920_v56 = vcombine.high %v3276_v46, %v3280_v47  ;;  %v8047_v2 = vcombine.low %v3404_v53, %v3408_v54  ;;  %v3484_v19 = vld [vmem:[%s11882_s5 + $0x888] sm:$0xff] }
 0x366   :  { %6546 = vmatprep.subr.bf16.mxu1 %v8104_v59  ;;  %v3528_v59 = vld [vmem:[%s11882_s5 + $0x9e8] sm:$0xff] }
 0x367   :  { %6506 = vmatpush2.bf16.msra.mxu0 %v7975_v61  ;;  %v8048_v61 = vcombine.high %v3404_v53, %v3408_v54  ;;  %v8167_v6 = vcombine.low %v3524_v16, %v3528_v59  ;;  %v3612_v42 = vld [vmem:[%s11882_s5 + $0xc88] sm:$0xff] }
 0x368   :  { %6507 = vmatprep.subr.bf16.mxu0 %v7968_v40  ;;  %v3656_v40 = vld [vmem:[%s11882_s5 + $0xde8] sm:$0xff] }
 0x369   :  { %6547 = vmatpush2.bf16.msra.mxu1 %v8103_v0  ;;  %v8168_v0 = vcombine.high %v3524_v16, %v3528_v59  ;;  %v8295_v12 = vcombine.low %v3652_v63, %v3656_v40  ;;  %v3476_v47 = vld [vmem:[%s11882_s5 + $0x848] sm:$0xff] }
 0x36a   :  { %6548 = vmatprep.subr.bf16.mxu1 %v8096_v5  ;;  %v3520_v5 = vld [vmem:[%s11882_s5 + $0x9a8] sm:$0xff] }
 0x36b   :  { %6508 = vmatpush2.bf16.msra.mxu0 %v7967_v32  ;;  %v8296_v32 = vcombine.high %v3652_v63, %v3656_v40  ;;  %v8159_v17 = vcombine.low %v3516_v3, %v3520_v5  ;;  %v3604_v54 = vld [vmem:[%s11882_s5 + $0xc48] sm:$0xff] }
 0x36c   :  { %6509 = vmatprep.subr.bf16.mxu0 %v7960_v9  ;;  %v3648_v9 = vld [vmem:[%s11882_s5 + $0xda8] sm:$0xff] }
 0x36d   :  { %6549 = vmatpush2.bf16.msra.mxu1 %v8095_v11  ;;  %v8160_v11 = vcombine.high %v3516_v3, %v3520_v5  ;;  %v8287_v22 = vcombine.low %v3644_v8, %v3648_v9  ;;  %v3468_v59 = vld [vmem:[%s11882_s5 + $0x808] sm:$0xff] }
 0x36e   :  { %6550 = vmatprep.subr.bf16.mxu1 %v8088_v14  ;;  %v3512_v14 = vld [vmem:[%s11882_s5 + $0x968] sm:$0xff] }
 0x36f   :  { %6510 = vmatpush2.bf16.msra.mxu0 %v7959_v15  ;;  %v8288_v15 = vcombine.high %v3644_v8, %v3648_v9  ;;  %v8151_v28 = vcombine.low %v3508_v13, %v3512_v14  ;;  %v3596_v40 = vld [vmem:[%s11882_s5 + $0xc08] sm:$0xff] }
 0x370   :  { %6511 = vmatprep.subr.bf16.mxu0 %v7952_v20  ;;  %v3640_v20 = vld [vmem:[%s11882_s5 + $0xd68] sm:$0xff] }
 0x371   :  { %6551 = vmatpush2.bf16.msra.mxu1 %v8087_v21  ;;  %v8152_v21 = vcombine.high %v3508_v13, %v3512_v14  ;;  %v8279_v10 = vcombine.low %v3636_v18, %v3640_v20  ;;  %v3588_v5 = vld [vmem:[%s11882_s5 + $0xbc8] sm:$0xff] }
 0x372   :  { %6552 = vmatprep.subr.bf16.mxu1 %v8080_v25  ;;  %v3504_v25 = vld [vmem:[%s11882_s5 + $0x928] sm:$0xff] }
 0x373   :  { %6512 = vmatpush2.bf16.msra.mxu0 %v7951_v26  ;;  %v8280_v26 = vcombine.high %v3636_v18, %v3640_v20  ;;  %v8143_v60 = vcombine.low %v3500_v23, %v3504_v25  ;;  %v3716_v9 = vld [vmem:[%s11882_s5 + $0xfc8] sm:$0xff] }
 0x374   :  { %6513 = vmatprep.subr.bf16.mxu0 %v7944_v7  ;;  %v3632_v7 = vld [vmem:[%s11882_s5 + $0xd28] sm:$0xff] }
 0x375   :  { %6553 = vmatpush2.bf16.msra.mxu1 %v8079_v33  ;;  %v8144_v33 = vcombine.high %v3500_v23, %v3504_v25  ;;  %v8271_v4 = vcombine.low %v3628_v48, %v3632_v7  ;;  %v3580_v14 = vld [vmem:[%s11882_s5 + $0xb88] sm:$0xff] }
 0x376   :  { %6554 = vmatprep.subr.bf16.mxu1 %v8072_v35  ;;  %v3496_v35 = vld [vmem:[%s11882_s5 + $0x8e8] sm:$0xff] }
 0x377   :  { %6514 = vmatpush2.bf16.msra.mxu0 %v7943_v36  ;;  %v8272_v36 = vcombine.high %v3628_v48, %v3632_v7  ;;  %v8135_v38 = vcombine.low %v3492_v27, %v3496_v35  ;;  %v3708_v20 = vld [vmem:[%s11882_s5 + $0xf88] sm:$0xff] }
 0x378   :  { %6515 = vmatprep.subr.bf16.mxu0 %v7936_v37  ;;  %v3624_v37 = vld [vmem:[%s11882_s5 + $0xce8] sm:$0xff] }
 0x379   :  { %6555 = vmatpush2.bf16.msra.mxu1 %v8071_v39  ;;  %v8136_v39 = vcombine.high %v3492_v27, %v3496_v35  ;;  %v8263_v46 = vcombine.low %v3620_v30, %v3624_v37  ;;  %v3572_v25 = vld [vmem:[%s11882_s5 + $0xb48] sm:$0xff] }
 0x37a   :  { %6556 = vmatprep.subr.bf16.mxu1 %v8064_v24  ;;  %v3488_v24 = vld [vmem:[%s11882_s5 + $0x8a8] sm:$0xff] }
 0x37b   :  { %6516 = vmatpush2.bf16.msra.mxu0 %v7935_v41  ;;  %v8264_v41 = vcombine.high %v3620_v30, %v3624_v37  ;;  %v8127_v53 = vcombine.low %v3484_v19, %v3488_v24  ;;  %v3700_v7 = vld [vmem:[%s11882_s5 + $0xf48] sm:$0xff] }
 0x37c   :  { %6517 = vmatprep.subr.bf16.mxu0 %v7928_v43  ;;  %v3616_v43 = vld [vmem:[%s11882_s5 + $0xca8] sm:$0xff] }
 0x37d   :  { %6557 = vmatpush2.bf16.msra.mxu1 %v8063_v45  ;;  %v8128_v45 = vcombine.high %v3484_v19, %v3488_v24  ;;  %v8255_v16 = vcombine.low %v3612_v42, %v3616_v43  ;;  %v3564_v35 = vld [vmem:[%s11882_s5 + $0xb08] sm:$0xff] }
 0x37e   :  { %6558 = vmatprep.subr.bf16.mxu1 %v8056_v49  ;;  %v3480_v49 = vld [vmem:[%s11882_s5 + $0x868] sm:$0xff] }
 0x37f   :  { %6518 = vmatpush2.bf16.msra.mxu0 %v7927_v50  ;;  %v8256_v50 = vcombine.high %v3612_v42, %v3616_v43  ;;  %v8119_v63 = vcombine.low %v3476_v47, %v3480_v49  ;;  %v3692_v37 = vld [vmem:[%s11882_s5 + $0xf08] sm:$0xff] }
 0x380   :  { %6519 = vmatprep.subr.bf16.mxu0 %v7920_v56  ;;  %v3608_v56 = vld [vmem:[%s11882_s5 + $0xc68] sm:$0xff] }
 0x381   :  { %6559 = vmatpush2.bf16.msra.mxu1 %v8055_v57  ;;  %v8120_v57 = vcombine.high %v3476_v47, %v3480_v49  ;;  %v8247_v3 = vcombine.low %v3604_v54, %v3608_v56  ;;  %v3556_v24 = vld [vmem:[%s11882_s5 + $0xac8] sm:$0xff] }
 0x382   :  { %6560 = vmatprep.subr.bf16.mxu1 %v8048_v61  ;;  %v3472_v61 = vld [vmem:[%s11882_s5 + $0x828] sm:$0xff] }
 0x383   :  { %6520 = vmatpush2.bf16.msra.mxu0 %v7919_v62  ;;  %v8248_v62 = vcombine.high %v3604_v54, %v3608_v56  ;;  %v8111_v8 = vcombine.low %v3468_v59, %v3472_v61  ;;  %v3684_v43 = vld [vmem:[%s11882_s5 + $0xec8] sm:$0xff] }
 0x384   :  { %6571 = vmatprep.subr.bf16.mxu0 %v8168_v0  ;;  %v3600_v0 = vld [vmem:[%s11882_s5 + $0xc28] sm:$0xff] }
 0x385   :  { %6561 = vmatpush2.bf16.msra.mxu1 %v8047_v2  ;;  %v8112_v2 = vcombine.high %v3468_v59, %v3472_v61  ;;  %v8239_v13 = vcombine.low %v3596_v40, %v3600_v0  ;;  %v3548_v49 = vld [vmem:[%s11882_s5 + $0xa88] sm:$0xff] }
 0x386   :  { %6522 = vmatmul.mubr.bf16.vlgmr.msra.gmra.mxu0 %v10239_v31  ;;  %6612 = vmatprep.subr.bf16.mxu1 %v8296_v32  ;;  %v3592_v32 = vld [vmem:[%s11882_s5 + $0xbe8] sm:$0xff] }
 0x387   :  { %6572 = vmatpush1.bf16.msra.mxu0 %v8167_v6  ;;  %6603 = vmatprep.mubr.bf16.mxu0 %v10273_v44  ;;  %v8240_v6 = vcombine.high %v3596_v40, %v3600_v0  ;;  %v8231_v18 = vcombine.low %v3588_v5, %v3592_v32  ;;  %v3676_v56 = vld [vmem:[%s11882_s5 + $0xe88] sm:$0xff] }
 0x388   :  { %6563 = vmatmul.mubr.bf16.vlgmr.msra.gmra.mxu1 %v10251_v34  ;;  %6573 = vmatprep.subr.bf16.mxu0 %v8160_v11  ;;  %v3720_v11 = vld [vmem:[%s11882_s5 + $0xfe8] sm:$0xff] }
 0x389   :  { %6613 = vmatpush1.bf16.msra.mxu1 %v8295_v12  ;;  %6644 = vmatprep.mubr.bf16.mxu1 %v10284_v51  ;;  %v8232_v12 = vcombine.high %v3588_v5, %v3592_v32  ;;  %v8359_v23 = vcombine.low %v3716_v9, %v3720_v11  ;;  %v3540_v61 = vld [vmem:[%s11882_s5 + $0xa48] sm:$0xff] }
 0x38a   :  { %6614 = vmatprep.subr.bf16.mxu1 %v8288_v15  ;;  %v3584_v15 = vld [vmem:[%s11882_s5 + $0xba8] sm:$0xff] }
 0x38b   :  { %6574 = vmatpush1.bf16.msra.mxu0 %v8159_v17  ;;  %v8360_v17 = vcombine.high %v3716_v9, %v3720_v11  ;;  %v8223_v48 = vcombine.low %v3580_v14, %v3584_v15  ;;  %v3668_v0 = vld [vmem:[%s11882_s5 + $0xe48] sm:$0xff] }
 0x38c   :  { %6575 = vmatprep.subr.bf16.mxu0 %v8152_v21  ;;  %v3712_v21 = vld [vmem:[%s11882_s5 + $0xfa8] sm:$0xff] }
 0x38d   :  { %6615 = vmatpush1.bf16.msra.mxu1 %v8287_v22  ;;  %v8224_v22 = vcombine.high %v3580_v14, %v3584_v15  ;;  %v8351_v27 = vcombine.low %v3708_v20, %v3712_v21  ;;  %v3532_v32 = vld [vmem:[%s11882_s5 + $0xa08] sm:$0xff]  ;;  %v3269_v15 = vld [vmem:[%s11882_s5 + $0x1d0] sm:$0xff] }
 0x38e   :  { %6616 = vmatprep.subr.bf16.mxu1 %v8280_v26  ;;  %v3576_v26 = vld [vmem:[%s11882_s5 + $0xb68] sm:$0xff] }
 0x38f   :  { %6576 = vmatpush1.bf16.msra.mxu0 %v8151_v28  ;;  %v8352_v28 = vcombine.high %v3708_v20, %v3712_v21  ;;  %v8215_v30 = vcombine.low %v3572_v25, %v3576_v26  ;;  %v3660_v11 = vld [vmem:[%s11882_s5 + $0xe08] sm:$0xff]  ;;  %v3727_v21 = vsub.s32 0, %v10219_v1 }
 0x390   :  { %6577 = vmatprep.subr.bf16.mxu0 %v8144_v33  ;;  %v3704_v33 = vld [vmem:[%s11882_s5 + $0xf68] sm:$0xff] }
 0x391   :  { %6617 = vmatpush1.bf16.msra.mxu1 %v8279_v10  ;;  %v8216_v10 = vcombine.high %v3572_v25, %v3576_v26  ;;  %v8343_v19 = vcombine.low %v3700_v7, %v3704_v33  ;;  %v10847_v26 = vld [vmem:[%s11883_s6] sm:$0xff] }
 0x392   :  { %6618 = vmatprep.subr.bf16.mxu1 %v8272_v36  ;;  %v3568_v36 = vld [vmem:[%s11882_s5 + $0xb28] sm:$0xff] }
 0x393   :  { %6578 = vmatpush1.bf16.msra.mxu0 %v8143_v60  ;;  %v8344_v60 = vcombine.high %v3700_v7, %v3704_v33  ;;  %v8207_v42 = vcombine.low %v3564_v35, %v3568_v36  ;;  %v3261_v7 = vld [vmem:[%s11882_s5 + $0x190] sm:$0xff] }
 0x394   :  { %6579 = vmatprep.subr.bf16.mxu0 %v8136_v39  ;;  %v3696_v39 = vld [vmem:[%s11882_s5 + $0xf28] sm:$0xff]  ;;  %v3265_v33 = vld [vmem:[%s11882_s5 + $0x1b0] sm:$0xff] }
 0x395   :  { %6619 = vmatpush1.bf16.msra.mxu1 %v8271_v4  ;;  %v8208_v4 = vcombine.high %v3564_v35, %v3568_v36  ;;  %v8335_v47 = vcombine.low %v3692_v37, %v3696_v39  ;;  %v3728_v35 = vrot.slane %v10847_v26, %v3727_v21  ;;  %v3389_v36 = vld [vmem:[%s11882_s5 + $0x590] sm:$0xff] }
 0x396   :  { %6620 = vmatprep.subr.bf16.mxu1 %v8264_v41  ;;  %v3560_v41 = vld [vmem:[%s11882_s5 + $0xae8] sm:$0xff] }
 0x397   :  { %6580 = vmatpush1.bf16.msra.mxu0 %v8135_v38  ;;  %v8336_v38 = vcombine.high %v3692_v37, %v3696_v39  ;;  %v8199_v54 = vcombine.low %v3556_v24, %v3560_v41 }
 0x398   :  { %6581 = vmatprep.subr.bf16.mxu0 %v8128_v45  ;;  %v3688_v45 = vld [vmem:[%s11882_s5 + $0xee8] sm:$0xff] }
 0x399   :  { %6621 = vmatpush1.bf16.msra.mxu1 %v8263_v46  ;;  %v8200_v46 = vcombine.high %v3556_v24, %v3560_v41  ;;  %v8327_v59 = vcombine.low %v3684_v43, %v3688_v45 }
 0x39a   :  { %6622 = vmatprep.subr.bf16.mxu1 %v8256_v50  ;;  %v3552_v50 = vld [vmem:[%s11882_s5 + $0xaa8] sm:$0xff] }
 0x39b   :  { %6582 = vmatpush1.bf16.msra.mxu0 %v8127_v53  ;;  %v8328_v53 = vcombine.high %v3684_v43, %v3688_v45  ;;  %v8191_v40 = vcombine.low %v3548_v49, %v3552_v50  ;;  %v3381_v43 = vld [vmem:[%s11882_s5 + $0x550] sm:$0xff] }
 0x39c   :  { %6583 = vmatprep.subr.bf16.mxu0 %v8120_v57  ;;  %v3680_v57 = vld [vmem:[%s11882_s5 + $0xea8] sm:$0xff]  ;;  %v3385_v45 = vld [vmem:[%s11882_s5 + $0x570] sm:$0xff] }
 0x39d   :  { %6623 = vmatpush1.bf16.msra.mxu1 %v8255_v16  ;;  %v8192_v16 = vcombine.high %v3548_v49, %v3552_v50  ;;  %v8319_v5 = vcombine.low %v3676_v56, %v3680_v57 }
 0x39e   :  { %6624 = vmatprep.subr.bf16.mxu1 %v8248_v62  ;;  %v3544_v62 = vld [vmem:[%s11882_s5 + $0xa68] sm:$0xff] }
 0x39f   :  { %6584 = vmatpush1.bf16.msra.mxu0 %v8119_v63  ;;  %v8320_v63 = vcombine.high %v3676_v56, %v3680_v57  ;;  %v8183_v9 = vcombine.low %v3540_v61, %v3544_v62  ;;  %v3245_v56 = vld [vmem:[%s11882_s5 + $0x110] sm:$0xff] }
 0x3a0   :  { %6585 = vmatprep.subr.bf16.mxu0 %v8112_v2  ;;  %v3672_v2 = vld [vmem:[%s11882_s5 + $0xe68] sm:$0xff]  ;;  %v3249_v57 = vld [vmem:[%s11882_s5 + $0x130] sm:$0xff] }
 0x3a1   :  { %6625 = vmatpush1.bf16.msra.mxu1 %v8247_v3  ;;  %v8184_v3 = vcombine.high %v3540_v61, %v3544_v62  ;;  %v8311_v14 = vcombine.low %v3668_v0, %v3672_v2  ;;  %v8026_v61 = vcombine.high %v3381_v43, %v3385_v45 }
 0x3a2   :  { %6626 = vmatprep.subr.bf16.mxu1 %v8240_v6  ;;  %v3536_v6 = vld [vmem:[%s11882_s5 + $0xa28] sm:$0xff] }
 0x3a3   :  { %6586 = vmatpush1.bf16.msra.mxu0 %v8111_v8  ;;  %v8312_v8 = vcombine.high %v3668_v0, %v3672_v2  ;;  %v8175_v20 = vcombine.low %v3532_v32, %v3536_v6  ;;  %v3377_v0 = vld [vmem:[%s11882_s5 + $0x530] sm:$0xff] }
 0x3a4   :  { %6587 = vmatprep.subr.bf16.mxu0 %v8232_v12  ;;  %v3664_v12 = vld [vmem:[%s11882_s5 + $0xe28] sm:$0xff] }
 0x3a5   :  { %6627 = vmatpush1.bf16.msra.mxu1 %v8239_v13  ;;  %v8176_v13 = vcombine.high %v3532_v32, %v3536_v6  ;;  %v8025_v32 = vcombine.low %v3381_v43, %v3385_v45  ;;  %v3237_v6 = vld [vmem:[%s11882_s5 + $0xd0] sm:$0xff] }
 0x3a6   :  { %6628 = vmatprep.subr.bf16.mxu1 %v8360_v17  ;;  %v3273_v17 = vld [vmem:[%s11882_s5 + $0x1f0] sm:$0xff] }
 0x3a7   :  { %6588 = vmatpush2.bf16.msra.mxu0 %v8231_v18  ;;  %v8304_v18 = vcombine.high %v3660_v11, %v3664_v12  ;;  %v7914_v25 = vcombine.high %v3269_v15, %v3273_v17  ;;  %v3333_v43 = vld [vmem:[%s11882_s5 + $0x3d0] sm:$0xff] }
 0x3a8   :  { %6589 = vmatprep.subr.bf16.mxu0 %v8224_v22  ;;  %v3397_v22 = vld [vmem:[%s11882_s5 + $0x5d0] sm:$0xff] }
 0x3a9   :  { %6629 = vmatpush2.bf16.msra.mxu1 %v8359_v23  ;;  %v3401_v23 = vld [vmem:[%s11882_s5 + $0x5f0] sm:$0xff] }
 0x3aa   :  { %6630 = vmatprep.subr.bf16.mxu1 %v8352_v28  ;;  %v8303_v28 = vcombine.low %v3660_v11, %v3664_v12  ;;  %v8041_v37 = vcombine.low %v3397_v22, %v3401_v23  ;;  %v7889_v12 = vcombine.low %v3245_v56, %v3249_v57  ;;  %v3337_v45 = vld [vmem:[%s11882_s5 + $0x3f0] sm:$0xff] }
 0x3ab   :  { %6590 = vmatpush2.bf16.msra.mxu0 %v8223_v48  ;;  %v3731_v48 = vsub.s32 1, %v10219_v1 }
 0x3ac   :  { %6591 = vmatprep.subr.bf16.mxu0 %v8216_v10  ;;  %v8042_v10 = vcombine.high %v3397_v22, %v3401_v23  ;;  %v3357_v23 = vld [vmem:[%s11882_s5 + $0x490] sm:$0xff] }
 0x3ad   :  { %6631 = vmatpush2.bf16.msra.mxu1 %v8351_v27  ;;  %v7913_v27 = vcombine.low %v3269_v15, %v3273_v17  ;;  %v3732_v39 = vrot.slane %v10847_v26, %v3731_v48 }
 0x3ae   :  { %6632 = vmatprep.subr.bf16.mxu1 %v8344_v60  ;;  %v3393_v60 = vld [vmem:[%s11882_s5 + $0x5b0] sm:$0xff] }
 0x3af   :  { %6592 = vmatpush2.bf16.msra.mxu0 %v8215_v30  ;;  %v7906_v30 = vcombine.high %v3261_v7, %v3265_v33  ;;  %v8034_v41 = vcombine.high %v3389_v36, %v3393_v60 }
 0x3b0   :  { %6593 = vmatprep.subr.bf16.mxu0 %v8208_v4  ;;  %v3253_v4 = vld [vmem:[%s11882_s5 + $0x150] sm:$0xff] }
 0x3b1   :  { %6633 = vmatpush2.bf16.msra.mxu1 %v8343_v19  ;;  %v3257_v19 = vld [vmem:[%s11882_s5 + $0x170] sm:$0xff] }
 0x3b2   :  { %6634 = vmatprep.subr.bf16.mxu1 %v8336_v38  ;;  %v7898_v49 = vcombine.high %v3253_v4, %v3257_v19 }
 0x3b3   :  { %6594 = vmatpush2.bf16.msra.mxu0 %v8207_v42  ;;  %v7905_v42 = vcombine.low %v3261_v7, %v3265_v33  ;;  %v3221_v7 = vld [vmem:[%s11882_s5 + $0x50] sm:$0xff] }
 0x3b4   :  { %6595 = vmatprep.subr.bf16.mxu0 %v8200_v46  ;;  %v3225_v33 = vld [vmem:[%s11882_s5 + $0x70] sm:$0xff] }
 0x3b5   :  { %6635 = vmatpush2.bf16.msra.mxu1 %v8335_v47 }
 0x3b6   :  { %6636 = vmatprep.subr.bf16.mxu1 %v8328_v53 }
 0x3b7   :  { %6596 = vmatpush2.bf16.msra.mxu0 %v8199_v54  ;;  %v8033_v54 = vcombine.low %v3389_v36, %v3393_v60  ;;  %v3353_v36 = vld [vmem:[%s11882_s5 + $0x470] sm:$0xff]  ;;  %v7866_v60 = vcombine.high %v3221_v7, %v3225_v33 }
 0x3b8   :  { %6597 = vmatprep.subr.bf16.mxu0 %v8192_v16 }
 0x3b9   :  { %6637 = vmatpush2.bf16.msra.mxu1 %v8327_v59 }
 0x3ba   :  { %6638 = vmatprep.subr.bf16.mxu1 %v8320_v63  ;;  %v7897_v63 = vcombine.low %v3253_v4, %v3257_v19  ;;  %v7865_v19 = vcombine.low %v3221_v7, %v3225_v33  ;;  %v3429_v7 = vld [vmem:[%s11882_s5 + $0x6d0] sm:$0xff] }
 0x3bb   :  { %6598 = vmatpush2.bf16.msra.mxu0 %v8191_v40  ;;  %v3373_v40 = vld [vmem:[%s11882_s5 + $0x510] sm:$0xff] }
 0x3bc   :  { %6599 = vmatprep.subr.bf16.mxu0 %v8184_v3  ;;  %v8018_v11 = vcombine.high %v3373_v40, %v3377_v0  ;;  %v8017_v17 = vcombine.low %v3373_v40, %v3377_v0  ;;  %v3457_v40 = vld [vmem:[%s11882_s5 + $0x7b0] sm:$0xff] }
 0x3bd   :  { %6639 = vmatpush2.bf16.msra.mxu1 %v8319_v5  ;;  %v7890_v5 = vcombine.high %v3245_v56, %v3249_v57  ;;  %v3325_v57 = vld [vmem:[%s11882_s5 + $0x390] sm:$0xff] }
 0x3be   :  { %6640 = vmatprep.subr.bf16.mxu1 %v8312_v8  ;;  %v3241_v8 = vld [vmem:[%s11882_s5 + $0xf0] sm:$0xff] }
 0x3bf   :  { %6600 = vmatpush2.bf16.msra.mxu0 %v8183_v9  ;;  %v7882_v15 = vcombine.high %v3237_v6, %v3241_v8  ;;  %v7881_v22 = vcombine.low %v3237_v6, %v3241_v8  ;;  %v3445_v8 = vld [vmem:[%s11882_s5 + $0x750] sm:$0xff] }
 0x3c0   :  { %6601 = vmatprep.subr.bf16.mxu0 %v8176_v13  ;;  %v3365_v13 = vld [vmem:[%s11882_s5 + $0x4d0] sm:$0xff] }
 0x3c1   :  { %6641 = vmatpush2.bf16.msra.mxu1 %v8311_v14  ;;  %v3369_v14 = vld [vmem:[%s11882_s5 + $0x4f0] sm:$0xff] }
 0x3c2   :  { %6642 = vmatprep.subr.bf16.mxu1 %v8304_v18  ;;  %v3229_v18 = vld [vmem:[%s11882_s5 + $0x90] sm:$0xff]  ;;  %v8010_v21 = vcombine.high %v3365_v13, %v3369_v14  ;;  %v8009_v48 = vcombine.low %v3365_v13, %v3369_v14 }
 0x3c3   :  { %6602 = vmatpush2.bf16.msra.mxu0 %v8175_v20  ;;  %v3233_v20 = vld [vmem:[%s11882_s5 + $0xb0] sm:$0xff] }
 0x3c4   :  { %6653 = vmatprep.subr.bf16.mxu0 %v7914_v25  ;;  %v3361_v25 = vld [vmem:[%s11882_s5 + $0x4b0] sm:$0xff] }
 0x3c5   :  { %6643 = vmatpush2.bf16.msra.mxu1 %v8303_v28  ;;  %v7874_v28 = vcombine.high %v3229_v18, %v3233_v20  ;;  %v3309_v13 = vld [vmem:[%s11882_s5 + $0x310] sm:$0xff] }
 0x3c6   :  { %6604 = vmatmul.mubr.bf16.vlgmr.msra.gmra.mxu0 %v10457_v52  ;;  %v6359_v24 = vpop.f32.mrf.mxu0  ;;  %6694 = vmatprep.subr.bf16.mxu1 %v8042_v10  ;;  %v8002_v10 = vcombine.high %v3357_v23, %v3361_v25  ;;  %v3313_v14 = vld [vmem:[%s11882_s5 + $0x330] sm:$0xff] }
 0x3c7   :  { %v6360_v38 = vadd.f32 %v6359_v24, %v3728_v35  ;;  %6654 = vmatpush1.bf16.msra.mxu0 %v7913_v27  ;;  %6685 = vmatprep.mubr.bf16.mxu0 %v10231_v29  ;;  %v7873_v27 = vcombine.low %v3229_v18, %v3233_v20  ;;  %v3349_v35 = vld [vmem:[%s11882_s5 + $0x450] sm:$0xff] }
 0x3c8   :  { %6645 = vmatmul.mubr.bf16.vlgmr.msra.gmra.mxu1 %v10468_v58  ;;  %v6361_v46 = vpop.f32.mrf.mxu0  ;;  %v6400_v47 = vpop.f32.mrf.mxu1  ;;  %6655 = vmatprep.subr.bf16.mxu0 %v7906_v30  ;;  %v8001_v30 = vcombine.low %v3357_v23, %v3361_v25  ;;  %v7994_v4 = vcombine.high %v3349_v35, %v3353_v36  ;;  %v3341_v24 = vld [vmem:[%s11882_s5 + $0x410] sm:$0xff] }
 0x3c9   :  { %v6362_v50 = vadd.f32 %v6361_v46, %v3732_v39  ;;  %v10879_v53 = vadd.f32 %v6400_v47, %v6360_v38  ;;  %6695 = vmatpush1.bf16.msra.mxu1 %v8041_v37  ;;  %6726 = vmatprep.mubr.bf16.mxu1 %v10242_v55  ;;  %v3213_v37 = vld [vmem:[%s11882_s5 + $0x10] sm:$0xff] }
 0x3ca   :  { %v6363_v16 = vpop.f32.mrf.mxu0  ;;  %v6402_v59 = vpop.f32.mrf.mxu1  ;;  %6696 = vmatprep.subr.bf16.mxu1 %v8034_v41  ;;  %v3217_v39 = vld [vmem:[%s11882_s5 + $0x30] sm:$0xff] }
 0x3cb   :  { %v10888_v62 = vadd.f32 %v6402_v59, %v6362_v50  ;;  %6656 = vmatpush1.bf16.msra.mxu0 %v7905_v42  ;;  %v3345_v41 = vld [vmem:[%s11882_s5 + $0x430] sm:$0xff]  ;;  %v7858_v38 = vcombine.high %v3213_v37, %v3217_v39  ;;  %v7993_v42 = vcombine.low %v3349_v35, %v3353_v36  ;;  %v7857_v47 = vcombine.low %v3213_v37, %v3217_v39 }
 0x3cc   :  { %v6364_v2 = vpop.f32.mrf.mxu0  ;;  %v6404_v3 = vpop.f32.mrf.mxu1  ;;  %6657 = vmatprep.subr.bf16.mxu0 %v7898_v49  ;;  %v7986_v46 = vcombine.high %v3341_v24, %v3345_v41  ;;  %v3461_v49 = vld [vmem:[%s11882_s5 + $0x7d0] sm:$0xff]  ;;  %v7985_v56 = vcombine.low %v3341_v24, %v3345_v41 }
 0x3cd   :  { %6697 = vmatpush1.bf16.msra.mxu1 %v8033_v54  ;;  %v3465_v50 = vld [vmem:[%s11882_s5 + $0x7f0] sm:$0xff]  ;;  %v7978_v54 = vcombine.high %v3333_v43, %v3337_v45 }
 0x3ce   :  { %v6405_v9 = vpop.f32.mrf.mxu1  ;;  %6698 = vmatprep.subr.bf16.mxu1 %v8026_v61  ;;  %v3329_v16 = vld [vmem:[%s11882_s5 + $0x3b0] sm:$0xff]  ;;  %v8106_v59 = vcombine.high %v3461_v49, %v3465_v50  ;;  %v7977_v61 = vcombine.low %v3333_v43, %v3337_v45  ;;  %v8105_v2 = vcombine.low %v3461_v49, %v3465_v50 }
 0x3cf   :  { %6658 = vmatpush1.bf16.msra.mxu0 %v7897_v63  ;;  %v3453_v63 = vld [vmem:[%s11882_s5 + $0x790] sm:$0xff]  ;;  %v7970_v0 = vcombine.high %v3325_v57, %v3329_v16  ;;  %v7969_v6 = vcombine.low %v3325_v57, %v3329_v16 }
 0x3d0   :  { %6659 = vmatprep.subr.bf16.mxu0 %v7890_v5  ;;  %v3317_v3 = vld [vmem:[%s11882_s5 + $0x350] sm:$0xff] }
 0x3d1   :  { %6699 = vmatpush1.bf16.msra.mxu1 %v8025_v32  ;;  %v3321_v5 = vld [vmem:[%s11882_s5 + $0x370] sm:$0xff]  ;;  %v8098_v32 = vcombine.high %v3453_v63, %v3457_v40 }
 0x3d2   :  { %6700 = vmatprep.subr.bf16.mxu1 %v8018_v11  ;;  %v3449_v9 = vld [vmem:[%s11882_s5 + $0x770] sm:$0xff]  ;;  %v7962_v11 = vcombine.high %v3317_v3, %v3321_v5 }
 0x3d3   :  { %6660 = vmatpush1.bf16.msra.mxu0 %v7889_v12  ;;  %v8097_v12 = vcombine.low %v3453_v63, %v3457_v40  ;;  %v3437_v18 = vld [vmem:[%s11882_s5 + $0x710] sm:$0xff] }
 0x3d4   :  { %6661 = vmatprep.subr.bf16.mxu0 %v7882_v15  ;;  %v8090_v15 = vcombine.high %v3445_v8, %v3449_v9  ;;  %v3441_v20 = vld [vmem:[%s11882_s5 + $0x730] sm:$0xff] }
 0x3d5   :  { %6701 = vmatpush1.bf16.msra.mxu1 %v8017_v17  ;;  %v7961_v17 = vcombine.low %v3317_v3, %v3321_v5  ;;  %v3301_v23 = vld [vmem:[%s11882_s5 + $0x2d0] sm:$0xff] }
 0x3d6   :  { %6702 = vmatprep.subr.bf16.mxu1 %v8010_v21  ;;  %v7954_v21 = vcombine.high %v3309_v13, %v3313_v14  ;;  %v3305_v25 = vld [vmem:[%s11882_s5 + $0x2f0] sm:$0xff] }
 0x3d7   :  { %6662 = vmatpush1.bf16.msra.mxu0 %v7881_v22  ;;  %v8089_v22 = vcombine.low %v3445_v8, %v3449_v9  ;;  %v3433_v33 = vld [vmem:[%s11882_s5 + $0x6f0] sm:$0xff] }
 0x3d8   :  { %6663 = vmatprep.subr.bf16.mxu0 %v7874_v28  ;;  %v8082_v28 = vcombine.high %v3437_v18, %v3441_v20  ;;  %v3293_v35 = vld [vmem:[%s11882_s5 + $0x290] sm:$0xff] }
 0x3d9   :  { %6703 = vmatpush1.bf16.msra.mxu1 %v8009_v48  ;;  %v7953_v48 = vcombine.low %v3309_v13, %v3313_v14  ;;  %v3297_v36 = vld [vmem:[%s11882_s5 + $0x2b0] sm:$0xff] }
 0x3da   :  { %6704 = vmatprep.subr.bf16.mxu1 %v8002_v10  ;;  %v7946_v10 = vcombine.high %v3301_v23, %v3305_v25  ;;  %v3421_v37 = vld [vmem:[%s11882_s5 + $0x690] sm:$0xff] }
 0x3db   :  { %6664 = vmatpush1.bf16.msra.mxu0 %v7873_v27  ;;  %v8081_v27 = vcombine.low %v3437_v18, %v3441_v20  ;;  %v3425_v39 = vld [vmem:[%s11882_s5 + $0x6b0] sm:$0xff] }
 0x3dc   :  { %6665 = vmatprep.subr.bf16.mxu0 %v7866_v60  ;;  %v8074_v60 = vcombine.high %v3429_v7, %v3433_v33  ;;  %v3285_v24 = vld [vmem:[%s11882_s5 + $0x250] sm:$0xff] }
 0x3dd   :  { %6705 = vmatpush1.bf16.msra.mxu1 %v8001_v30  ;;  %v7945_v30 = vcombine.low %v3301_v23, %v3305_v25  ;;  %v3289_v41 = vld [vmem:[%s11882_s5 + $0x270] sm:$0xff] }
 0x3de   :  { %6706 = vmatprep.subr.bf16.mxu1 %v7994_v4  ;;  %v7938_v4 = vcombine.high %v3293_v35, %v3297_v36  ;;  %v3413_v43 = vld [vmem:[%s11882_s5 + $0x650] sm:$0xff] }
 0x3df   :  { %6666 = vmatpush1.bf16.msra.mxu0 %v7865_v19  ;;  %v8073_v19 = vcombine.low %v3429_v7, %v3433_v33  ;;  %v3417_v45 = vld [vmem:[%s11882_s5 + $0x670] sm:$0xff] }
 0x3e0   :  { %6667 = vmatprep.subr.bf16.mxu0 %v7858_v38  ;;  %v8066_v38 = vcombine.high %v3421_v37, %v3425_v39  ;;  %v3277_v49 = vld [vmem:[%s11882_s5 + $0x210] sm:$0xff] }
 0x3e1   :  { %6707 = vmatpush1.bf16.msra.mxu1 %v7993_v42  ;;  %v7937_v42 = vcombine.low %v3293_v35, %v3297_v36  ;;  %v3281_v50 = vld [vmem:[%s11882_s5 + $0x230] sm:$0xff] }
 0x3e2   :  { %6708 = vmatprep.subr.bf16.mxu1 %v7986_v46  ;;  %v7930_v46 = vcombine.high %v3285_v24, %v3289_v41  ;;  %v3405_v57 = vld [vmem:[%s11882_s5 + $0x610] sm:$0xff] }
 0x3e3   :  { %6668 = vmatpush1.bf16.msra.mxu0 %v7857_v47  ;;  %v8065_v47 = vcombine.low %v3421_v37, %v3425_v39  ;;  %v3409_v16 = vld [vmem:[%s11882_s5 + $0x630] sm:$0xff] }
 0x3e4   :  { %6669 = vmatprep.subr.bf16.mxu0 %v7978_v54  ;;  %v8058_v54 = vcombine.high %v3413_v43, %v3417_v45  ;;  %v3525_v63 = vld [vmem:[%s11882_s5 + $0x9d0] sm:$0xff] }
 0x3e5   :  { %6709 = vmatpush1.bf16.msra.mxu1 %v7985_v56  ;;  %v7929_v56 = vcombine.low %v3285_v24, %v3289_v41  ;;  %v3529_v40 = vld [vmem:[%s11882_s5 + $0x9f0] sm:$0xff] }
 0x3e6   :  { %6710 = vmatprep.subr.bf16.mxu1 %v8106_v59  ;;  %v7922_v59 = vcombine.high %v3277_v49, %v3281_v50  ;;  %v3653_v3 = vld [vmem:[%s11882_s5 + $0xdd0] sm:$0xff] }
 0x3e7   :  { %6670 = vmatpush2.bf16.msra.mxu0 %v7977_v61  ;;  %v8057_v61 = vcombine.low %v3413_v43, %v3417_v45  ;;  %v3657_v5 = vld [vmem:[%s11882_s5 + $0xdf0] sm:$0xff] }
 0x3e8   :  { %6671 = vmatprep.subr.bf16.mxu0 %v7970_v0  ;;  %v8050_v0 = vcombine.high %v3405_v57, %v3409_v16  ;;  %v3517_v8 = vld [vmem:[%s11882_s5 + $0x990] sm:$0xff] }
 0x3e9   :  { %6711 = vmatpush2.bf16.msra.mxu1 %v8105_v2  ;;  %v7921_v2 = vcombine.low %v3277_v49, %v3281_v50  ;;  %v3521_v9 = vld [vmem:[%s11882_s5 + $0x9b0] sm:$0xff] }
 0x3ea   :  { %6712 = vmatprep.subr.bf16.mxu1 %v8098_v32  ;;  %v8170_v32 = vcombine.high %v3525_v63, %v3529_v40  ;;  %v3645_v13 = vld [vmem:[%s11882_s5 + $0xd90] sm:$0xff]  ;;  %v8161_v25 = vcombine.low %v3517_v8, %v3521_v9 }
 0x3eb   :  { %6672 = vmatpush2.bf16.msra.mxu0 %v7969_v6  ;;  %v8049_v6 = vcombine.low %v3405_v57, %v3409_v16  ;;  %v3649_v14 = vld [vmem:[%s11882_s5 + $0xdb0] sm:$0xff] }
 0x3ec   :  { %6673 = vmatprep.subr.bf16.mxu0 %v7962_v11  ;;  %v8298_v11 = vcombine.high %v3653_v3, %v3657_v5  ;;  %v3509_v18 = vld [vmem:[%s11882_s5 + $0x950] sm:$0xff]  ;;  %v8289_v35 = vcombine.low %v3645_v13, %v3649_v14 }
 0x3ed   :  { %6713 = vmatpush2.bf16.msra.mxu1 %v8097_v12  ;;  %v8169_v12 = vcombine.low %v3525_v63, %v3529_v40  ;;  %v3513_v20 = vld [vmem:[%s11882_s5 + $0x970] sm:$0xff] }
 0x3ee   :  { %6714 = vmatprep.subr.bf16.mxu1 %v8090_v15  ;;  %v8162_v15 = vcombine.high %v3517_v8, %v3521_v9  ;;  %v3501_v36 = vld [vmem:[%s11882_s5 + $0x910] sm:$0xff] }
 0x3ef   :  { %6674 = vmatpush2.bf16.msra.mxu0 %v7961_v17  ;;  %v8297_v17 = vcombine.low %v3653_v3, %v3657_v5  ;;  %v3633_v24 = vld [vmem:[%s11882_s5 + $0xd30] sm:$0xff] }
 0x3f0   :  { %6675 = vmatprep.subr.bf16.mxu0 %v7954_v21  ;;  %v3493_v45 = vld [vmem:[%s11882_s5 + $0x8d0] sm:$0xff] }
 0x3f1   :  { %6715 = vmatpush2.bf16.msra.mxu1 %v8089_v22  ;;  %v8290_v22 = vcombine.high %v3645_v13, %v3649_v14 }
 0x3f2   :  { %6716 = vmatprep.subr.bf16.mxu1 %v8082_v28  ;;  %v3637_v28 = vld [vmem:[%s11882_s5 + $0xd50] sm:$0xff] }
 0x3f3   :  { %6676 = vmatpush2.bf16.msra.mxu0 %v7953_v48  ;;  %v3641_v48 = vld [vmem:[%s11882_s5 + $0xd70] sm:$0xff] }
 0x3f4   :  { %6677 = vmatprep.subr.bf16.mxu0 %v7946_v10  ;;  %v8154_v10 = vcombine.high %v3509_v18, %v3513_v20  ;;  %v8282_v39 = vcombine.high %v3637_v28, %v3641_v48  ;;  %v8281_v43 = vcombine.low %v3637_v28, %v3641_v48  ;;  %v3589_v28 = vld [vmem:[%s11882_s5 + $0xbd0] sm:$0xff] }
 0x3f5   :  { %6717 = vmatpush2.bf16.msra.mxu1 %v8081_v27  ;;  %v3593_v48 = vld [vmem:[%s11882_s5 + $0xbf0] sm:$0xff] }
 0x3f6   :  { %6718 = vmatprep.subr.bf16.mxu1 %v8074_v60  ;;  %v3505_v60 = vld [vmem:[%s11882_s5 + $0x930] sm:$0xff] }
 0x3f7   :  { %6678 = vmatpush2.bf16.msra.mxu0 %v7945_v30  ;;  %v8145_v50 = vcombine.low %v3501_v36, %v3505_v60 }
 0x3f8   :  { %6679 = vmatprep.subr.bf16.mxu0 %v7938_v4 }
 0x3f9   :  { %6719 = vmatpush2.bf16.msra.mxu1 %v8073_v19  ;;  %v3629_v19 = vld [vmem:[%s11882_s5 + $0xd10] sm:$0xff] }
 0x3fa   :  { %6720 = vmatprep.subr.bf16.mxu1 %v8066_v38  ;;  %v8274_v49 = vcombine.high %v3629_v19, %v3633_v24  ;;  %v8273_v16 = vcombine.low %v3629_v19, %v3633_v24  ;;  %v3713_v19 = vld [vmem:[%s11882_s5 + $0xfb0] sm:$0xff] }
 0x3fb   :  { %6680 = vmatpush2.bf16.msra.mxu0 %v7937_v42  ;;  %v8146_v42 = vcombine.high %v3501_v36, %v3505_v60  ;;  %v3581_v60 = vld [vmem:[%s11882_s5 + $0xb90] sm:$0xff] }
 0x3fc   :  { %6681 = vmatprep.subr.bf16.mxu0 %v7930_v46  ;;  %v3497_v46 = vld [vmem:[%s11882_s5 + $0x8f0] sm:$0xff] }
 0x3fd   :  { %6721 = vmatpush2.bf16.msra.mxu1 %v8065_v47  ;;  %v8138_v57 = vcombine.high %v3493_v45, %v3497_v46  ;;  %v8137_v40 = vcombine.low %v3493_v45, %v3497_v46  ;;  %v3701_v46 = vld [vmem:[%s11882_s5 + $0xf50] sm:$0xff] }
 0x3fe   :  { %6722 = vmatprep.subr.bf16.mxu1 %v8058_v54  ;;  %v3621_v54 = vld [vmem:[%s11882_s5 + $0xcd0] sm:$0xff] }
 0x3ff   :  { %6682 = vmatpush2.bf16.msra.mxu0 %v7929_v56  ;;  %v3625_v56 = vld [vmem:[%s11882_s5 + $0xcf0] sm:$0xff] }
 0x400   :  { %6683 = vmatprep.subr.bf16.mxu0 %v7922_v59  ;;  %v3485_v59 = vld [vmem:[%s11882_s5 + $0x890] sm:$0xff]  ;;  %v8266_v63 = vcombine.high %v3621_v54, %v3625_v56  ;;  %v8265_v5 = vcombine.low %v3621_v54, %v3625_v56 }
 0x401   :  { %6723 = vmatpush2.bf16.msra.mxu1 %v8057_v61  ;;  %v3489_v61 = vld [vmem:[%s11882_s5 + $0x8b0] sm:$0xff] }
 0x402   :  { %6724 = vmatprep.subr.bf16.mxu1 %v8050_v0  ;;  %v3613_v0 = vld [vmem:[%s11882_s5 + $0xc90] sm:$0xff]  ;;  %v8130_v3 = vcombine.high %v3485_v59, %v3489_v61  ;;  %v8129_v9 = vcombine.low %v3485_v59, %v3489_v61 }
 0x403   :  { %6684 = vmatpush2.bf16.msra.mxu0 %v7921_v2  ;;  %v3617_v2 = vld [vmem:[%s11882_s5 + $0xcb0] sm:$0xff] }
 0x404   :  { %6735 = vmatprep.subr.bf16.mxu0 %v8170_v32  ;;  %v3477_v32 = vld [vmem:[%s11882_s5 + $0x850] sm:$0xff]  ;;  %v8258_v8 = vcombine.high %v3613_v0, %v3617_v2  ;;  %v8257_v14 = vcombine.low %v3613_v0, %v3617_v2 }
 0x405   :  { %6725 = vmatpush2.bf16.msra.mxu1 %v8049_v6  ;;  %v3481_v6 = vld [vmem:[%s11882_s5 + $0x870] sm:$0xff] }
 0x406   :  { %v6441_v21 = vpop.f32.mrf.mxu0  ;;  %6686 = vmatmul.mubr.bf16.vlgmr.msra.gmra.mxu0 %v10239_v31  ;;  %6776 = vmatprep.subr.bf16.mxu1 %v8298_v11  ;;  %v3605_v11 = vld [vmem:[%s11882_s5 + $0xc50] sm:$0xff]  ;;  %v8122_v13 = vcombine.high %v3477_v32, %v3481_v6 }
 0x407   :  { %v6442_v23 = vadd.f32 %v6441_v21, %v10879_v53  ;;  %6736 = vmatpush1.bf16.msra.mxu0 %v8169_v12  ;;  %6767 = vmatprep.mubr.bf16.mxu0 %v10273_v44  ;;  %v3609_v12 = vld [vmem:[%s11882_s5 + $0xc70] sm:$0xff] }
 0x408   :  { %v6443_v7 = vpop.f32.mrf.mxu0  ;;  %v6482_v33 = vpop.f32.mrf.mxu1  ;;  %6727 = vmatmul.mubr.bf16.vlgmr.msra.gmra.mxu1 %v10251_v34  ;;  %6737 = vmatprep.subr.bf16.mxu0 %v8162_v15  ;;  %v3469_v15 = vld [vmem:[%s11882_s5 + $0x810] sm:$0xff] }
 0x409   :  { %v6444_v53 = vadd.f32 %v6443_v7, %v10888_v62  ;;  %v11081_v27 = vadd.f32 %v6482_v33, %v6442_v23  ;;  %6777 = vmatpush1.bf16.msra.mxu1 %v8297_v17  ;;  %6808 = vmatprep.mubr.bf16.mxu1 %v10284_v51  ;;  %v8153_v62 = vcombine.low %v3509_v18, %v3513_v20  ;;  %v3473_v17 = vld [vmem:[%s11882_s5 + $0x830] sm:$0xff] }
 0x40a   :  { %v6445_v30 = vpop.f32.mrf.mxu0  ;;  %v6484_v37 = vpop.f32.mrf.mxu1  ;;  %6778 = vmatprep.subr.bf16.mxu1 %v8290_v22  ;;  %v8250_v18 = vcombine.high %v3605_v11, %v3609_v12  ;;  %v8121_v20 = vcombine.low %v3477_v32, %v3481_v6  ;;  %v3597_v21 = vld [vmem:[%s11882_s5 + $0xc10] sm:$0xff]  ;;  %v8114_v23 = vcombine.high %v3469_v15, %v3473_v17  ;;  %v8113_v33 = vcombine.low %v3469_v15, %v3473_v17 }
 0x40b   :  { %v11090_v4 = vadd.f32 %v6484_v37, %v6444_v53  ;;  %6738 = vmatpush1.bf16.msra.mxu0 %v8161_v25  ;;  %v3601_v22 = vld [vmem:[%s11882_s5 + $0xc30] sm:$0xff]  ;;  %v8249_v25 = vcombine.low %v3605_v11, %v3609_v12 }
 0x40c   :  { %v6446_v41 = vpop.f32.mrf.mxu0  ;;  %v6486_v38 = vpop.f32.mrf.mxu1  ;;  %6739 = vmatprep.subr.bf16.mxu0 %v8154_v10  ;;  %v8242_v7 = vcombine.high %v3597_v21, %v3601_v22  ;;  %v3717_v10 = vld [vmem:[%s11882_s5 + $0xfd0] sm:$0xff]  ;;  %v8241_v36 = vcombine.low %v3597_v21, %v3601_v22 }
 0x40d   :  { %6779 = vmatpush1.bf16.msra.mxu1 %v8289_v35  ;;  %v3721_v53 = vld [vmem:[%s11882_s5 + $0xff0] sm:$0xff]  ;;  %v8234_v35 = vcombine.high %v3589_v28, %v3593_v48 }
 0x40e   :  { %v6487_v47 = vpop.f32.mrf.mxu1  ;;  %6780 = vmatprep.subr.bf16.mxu1 %v8282_v39  ;;  %v3585_v30 = vld [vmem:[%s11882_s5 + $0xbb0] sm:$0xff]  ;;  %v8362_v37 = vcombine.high %v3717_v10, %v3721_v53  ;;  %v8233_v39 = vcombine.low %v3589_v28, %v3593_v48  ;;  %v8361_v41 = vcombine.low %v3717_v10, %v3721_v53 }
 0x40f   :  { %6740 = vmatpush1.bf16.msra.mxu0 %v8153_v62  ;;  %v3709_v62 = vld [vmem:[%s11882_s5 + $0xf90] sm:$0xff]  ;;  %v8226_v24 = vcombine.high %v3581_v60, %v3585_v30  ;;  %v8225_v45 = vcombine.low %v3581_v60, %v3585_v30 }
 0x410   :  { %6741 = vmatprep.subr.bf16.mxu0 %v8146_v42  ;;  %v3573_v38 = vld [vmem:[%s11882_s5 + $0xb50] sm:$0xff] }
 0x411   :  { %6781 = vmatpush1.bf16.msra.mxu1 %v8281_v43  ;;  %v3577_v42 = vld [vmem:[%s11882_s5 + $0xb70] sm:$0xff]  ;;  %v8354_v43 = vcombine.high %v3709_v62, %v3713_v19 }
 0x412   :  { %6782 = vmatprep.subr.bf16.mxu1 %v8274_v49  ;;  %v3705_v47 = vld [vmem:[%s11882_s5 + $0xf70] sm:$0xff]  ;;  %v8218_v49 = vcombine.high %v3573_v38, %v3577_v42 }
 0x413   :  { %6742 = vmatpush1.bf16.msra.mxu0 %v8145_v50  ;;  %v8353_v50 = vcombine.low %v3709_v62, %v3713_v19  ;;  %v3565_v54 = vld [vmem:[%s11882_s5 + $0xb10] sm:$0xff]  ;;  %v3270_v62 = vld [vmem:[%s11882_s5 + $0x1d8] sm:$0xff] }
 0x414   :  { %6743 = vmatprep.subr.bf16.mxu0 %v8138_v57  ;;  %v3569_v56 = vld [vmem:[%s11882_s5 + $0xb30] sm:$0xff]  ;;  %v8346_v57 = vcombine.high %v3701_v46, %v3705_v47  ;;  %v3274_v19 = vld [vmem:[%s11882_s5 + $0x1f8] sm:$0xff] }
 0x415   :  { %6783 = vmatpush1.bf16.msra.mxu1 %v8273_v16  ;;  %v8217_v16 = vcombine.low %v3573_v38, %v3577_v42  ;;  %v3693_v59 = vld [vmem:[%s11882_s5 + $0xf10] sm:$0xff]  ;;  %v3735_v38 = vsub.s32 2, %v10219_v1  ;;  %v3398_v42 = vld [vmem:[%s11882_s5 + $0x5d8] sm:$0xff] }
 0x416   :  { %6784 = vmatprep.subr.bf16.mxu1 %v8266_v63  ;;  %v3697_v61 = vld [vmem:[%s11882_s5 + $0xf30] sm:$0xff]  ;;  %v8210_v63 = vcombine.high %v3565_v54, %v3569_v56 }
 0x417   :  { %6744 = vmatpush1.bf16.msra.mxu0 %v8137_v40  ;;  %v8345_v40 = vcombine.low %v3701_v46, %v3705_v47  ;;  %v3557_v0 = vld [vmem:[%s11882_s5 + $0xad0] sm:$0xff]  ;;  %v3739_v47 = vsub.s32 3, %v10219_v1 }
 0x418   :  { %6745 = vmatprep.subr.bf16.mxu0 %v8130_v3  ;;  %v3561_v2 = vld [vmem:[%s11882_s5 + $0xaf0] sm:$0xff]  ;;  %v8338_v3 = vcombine.high %v3693_v59, %v3697_v61 }
 0x419   :  { %6785 = vmatpush1.bf16.msra.mxu1 %v8265_v5  ;;  %v8209_v5 = vcombine.low %v3565_v54, %v3569_v56  ;;  %v3685_v32 = vld [vmem:[%s11882_s5 + $0xed0] sm:$0xff]  ;;  %v3736_v56 = vrot.slane %v10847_v26, %v3735_v38 }
 0x41a   :  { %6786 = vmatprep.subr.bf16.mxu1 %v8258_v8  ;;  %v3689_v6 = vld [vmem:[%s11882_s5 + $0xef0] sm:$0xff]  ;;  %v8202_v8 = vcombine.high %v3557_v0, %v3561_v2 }
 0x41b   :  { %6746 = vmatpush1.bf16.msra.mxu0 %v8129_v9  ;;  %v8337_v9 = vcombine.low %v3693_v59, %v3697_v61  ;;  %v3549_v11 = vld [vmem:[%s11882_s5 + $0xa90] sm:$0xff]  ;;  %v3394_v59 = vld [vmem:[%s11882_s5 + $0x5b8] sm:$0xff] }
 0x41c   :  { %6747 = vmatprep.subr.bf16.mxu0 %v8122_v13  ;;  %v3553_v12 = vld [vmem:[%s11882_s5 + $0xab0] sm:$0xff]  ;;  %v8330_v13 = vcombine.high %v3685_v32, %v3689_v6 }
 0x41d   :  { %6787 = vmatpush1.bf16.msra.mxu1 %v8257_v14  ;;  %v8201_v14 = vcombine.low %v3557_v0, %v3561_v2  ;;  %v3677_v15 = vld [vmem:[%s11882_s5 + $0xe90] sm:$0xff]  ;;  %v3254_v0 = vld [vmem:[%s11882_s5 + $0x158] sm:$0xff] }
 0x41e   :  { %6788 = vmatprep.subr.bf16.mxu1 %v8250_v18  ;;  %v3681_v17 = vld [vmem:[%s11882_s5 + $0xeb0] sm:$0xff]  ;;  %v8194_v18 = vcombine.high %v3549_v11, %v3553_v12  ;;  %v3258_v2 = vld [vmem:[%s11882_s5 + $0x178] sm:$0xff] }
 0x41f   :  { %6748 = vmatpush1.bf16.msra.mxu0 %v8121_v20  ;;  %v8329_v20 = vcombine.low %v3685_v32, %v3689_v6  ;;  %v3541_v21 = vld [vmem:[%s11882_s5 + $0xa50] sm:$0xff] }
 0x420   :  { %6749 = vmatprep.subr.bf16.mxu0 %v8114_v23  ;;  %v3545_v22 = vld [vmem:[%s11882_s5 + $0xa70] sm:$0xff]  ;;  %v8322_v23 = vcombine.high %v3677_v15, %v3681_v17 }
 0x421   :  { %6789 = vmatpush1.bf16.msra.mxu1 %v8249_v25  ;;  %v8193_v25 = vcombine.low %v3549_v11, %v3553_v12  ;;  %v3669_v28 = vld [vmem:[%s11882_s5 + $0xe50] sm:$0xff]  ;;  %v7900_v12 = vcombine.high %v3254_v0, %v3258_v2 }
 0x422   :  { %6790 = vmatprep.subr.bf16.mxu1 %v8242_v7  ;;  %v3673_v48 = vld [vmem:[%s11882_s5 + $0xe70] sm:$0xff]  ;;  %v8186_v7 = vcombine.high %v3541_v21, %v3545_v22 }
 0x423   :  { %6750 = vmatpush1.bf16.msra.mxu0 %v8113_v33  ;;  %v8321_v33 = vcombine.low %v3677_v15, %v3681_v17  ;;  %v3533_v10 = vld [vmem:[%s11882_s5 + $0xa10] sm:$0xff]  ;;  %v3246_v15 = vld [vmem:[%s11882_s5 + $0x118] sm:$0xff] }
 0x424   :  { %6751 = vmatprep.subr.bf16.mxu0 %v8234_v35  ;;  %v3537_v53 = vld [vmem:[%s11882_s5 + $0xa30] sm:$0xff]  ;;  %v8314_v35 = vcombine.high %v3669_v28, %v3673_v48  ;;  %v3250_v17 = vld [vmem:[%s11882_s5 + $0x138] sm:$0xff] }
 0x425   :  { %6791 = vmatpush1.bf16.msra.mxu1 %v8241_v36  ;;  %v8185_v36 = vcombine.low %v3541_v21, %v3545_v22  ;;  %v3661_v60 = vld [vmem:[%s11882_s5 + $0xe10] sm:$0xff] }
 0x426   :  { %6792 = vmatprep.subr.bf16.mxu1 %v8362_v37  ;;  %v3665_v30 = vld [vmem:[%s11882_s5 + $0xe30] sm:$0xff]  ;;  %v8178_v37 = vcombine.high %v3533_v10, %v3537_v53 }
 0x427   :  { %6752 = vmatpush2.bf16.msra.mxu0 %v8233_v39  ;;  %v8313_v39 = vcombine.low %v3669_v28, %v3673_v48  ;;  %v8305_v46 = vcombine.low %v3661_v60, %v3665_v30 }
 0x428   :  { %6753 = vmatprep.subr.bf16.mxu0 %v8226_v24  ;;  %v8306_v24 = vcombine.high %v3661_v60, %v3665_v30  ;;  %v7891_v60 = vcombine.low %v3246_v15, %v3250_v17  ;;  %v3366_v30 = vld [vmem:[%s11882_s5 + $0x4d8] sm:$0xff] }
 0x429   :  { %6793 = vmatpush2.bf16.msra.mxu1 %v8361_v41  ;;  %v8177_v41 = vcombine.low %v3533_v10, %v3537_v53  ;;  %v3238_v10 = vld [vmem:[%s11882_s5 + $0xd8] sm:$0xff] }
 0x42a   :  { %6794 = vmatprep.subr.bf16.mxu1 %v8354_v43  ;;  %v3402_v43 = vld [vmem:[%s11882_s5 + $0x5f8] sm:$0xff] }
 0x42b   :  { %6754 = vmatpush2.bf16.msra.mxu0 %v8225_v45  ;;  %v7916_v45 = vcombine.high %v3270_v62, %v3274_v19  ;;  %v8044_v54 = vcombine.high %v3398_v42, %v3402_v43  ;;  %v3242_v53 = vld [vmem:[%s11882_s5 + $0xf8] sm:$0xff] }
 0x42c   :  { %6755 = vmatprep.subr.bf16.mxu0 %v8218_v49  ;;  %v3262_v49 = vld [vmem:[%s11882_s5 + $0x198] sm:$0xff]  ;;  %v7883_v38 = vcombine.low %v3238_v10, %v3242_v53 }
 0x42d   :  { %6795 = vmatpush2.bf16.msra.mxu1 %v8353_v50  ;;  %v3266_v50 = vld [vmem:[%s11882_s5 + $0x1b8] sm:$0xff] }
 0x42e   :  { %6796 = vmatprep.subr.bf16.mxu1 %v8346_v57  ;;  %v7915_v57 = vcombine.low %v3270_v62, %v3274_v19  ;;  %v7908_v61 = vcombine.high %v3262_v49, %v3266_v50  ;;  %v7907_v6 = vcombine.low %v3262_v49, %v3266_v50  ;;  %v3230_v19 = vld [vmem:[%s11882_s5 + $0x98] sm:$0xff] }
 0x42f   :  { %6756 = vmatpush2.bf16.msra.mxu0 %v8217_v16  ;;  %v3390_v16 = vld [vmem:[%s11882_s5 + $0x598] sm:$0xff] }
 0x430   :  { %6757 = vmatprep.subr.bf16.mxu0 %v8210_v63  ;;  %v3740_v63 = vrot.slane %v10847_v26, %v3739_v47  ;;  %v3382_v26 = vld [vmem:[%s11882_s5 + $0x558] sm:$0xff] }
 0x431   :  { %6797 = vmatpush2.bf16.msra.mxu1 %v8345_v40  ;;  %v8043_v40 = vcombine.low %v3398_v42, %v3402_v43  ;;  %v3358_v42 = vld [vmem:[%s11882_s5 + $0x498] sm:$0xff] }
 0x432   :  { %6798 = vmatprep.subr.bf16.mxu1 %v8338_v3  ;;  %v3362_v43 = vld [vmem:[%s11882_s5 + $0x4b8] sm:$0xff] }
 0x433   :  { %6758 = vmatpush2.bf16.msra.mxu0 %v8209_v5  ;;  %v8036_v5 = vcombine.high %v3390_v16, %v3394_v59  ;;  %v3222_v47 = vld [vmem:[%s11882_s5 + $0x58] sm:$0xff]  ;;  %v8004_v50 = vcombine.high %v3358_v42, %v3362_v43 }
 0x434   :  { %6759 = vmatprep.subr.bf16.mxu0 %v8202_v8  ;;  %v3386_v8 = vld [vmem:[%s11882_s5 + $0x578] sm:$0xff] }
 0x435   :  { %6799 = vmatpush2.bf16.msra.mxu1 %v8337_v9  ;;  %v8028_v21 = vcombine.high %v3382_v26, %v3386_v8  ;;  %v3226_v49 = vld [vmem:[%s11882_s5 + $0x78] sm:$0xff] }
 0x436   :  { %6800 = vmatprep.subr.bf16.mxu1 %v8330_v13 }
 0x437   :  { %6760 = vmatpush2.bf16.msra.mxu0 %v8201_v14 }
 0x438   :  { %6761 = vmatprep.subr.bf16.mxu0 %v8194_v18 }
 0x439   :  { %6801 = vmatpush2.bf16.msra.mxu1 %v8329_v20 }
 0x43a   :  { %6802 = vmatprep.subr.bf16.mxu1 %v8322_v23  ;;  %v7899_v23 = vcombine.low %v3254_v0, %v3258_v2  ;;  %v7867_v0 = vcombine.low %v3222_v47, %v3226_v49  ;;  %v3342_v2 = vld [vmem:[%s11882_s5 + $0x418] sm:$0xff] }
 0x43b   :  { %6762 = vmatpush2.bf16.msra.mxu0 %v8193_v25  ;;  %v3378_v25 = vld [vmem:[%s11882_s5 + $0x538] sm:$0xff] }
 0x43c   :  { %6763 = vmatprep.subr.bf16.mxu0 %v8186_v7  ;;  %v7892_v7 = vcombine.high %v3246_v15, %v3250_v17  ;;  %v3326_v15 = vld [vmem:[%s11882_s5 + $0x398] sm:$0xff] }
 0x43d   :  { %6803 = vmatpush2.bf16.msra.mxu1 %v8321_v33  ;;  %v8027_v33 = vcombine.low %v3382_v26, %v3386_v8  ;;  %v3338_v26 = vld [vmem:[%s11882_s5 + $0x3f8] sm:$0xff] }
 0x43e   :  { %6804 = vmatprep.subr.bf16.mxu1 %v8314_v35  ;;  %v3330_v17 = vld [vmem:[%s11882_s5 + $0x3b8] sm:$0xff] }
 0x43f   :  { %6764 = vmatpush2.bf16.msra.mxu0 %v8185_v36 }
 0x440   :  { %6765 = vmatprep.subr.bf16.mxu0 %v8178_v37  ;;  %v3370_v37 = vld [vmem:[%s11882_s5 + $0x4f8] sm:$0xff] }
 0x441   :  { %6805 = vmatpush2.bf16.msra.mxu1 %v8313_v39  ;;  %v7884_v39 = vcombine.high %v3238_v10, %v3242_v53  ;;  %v3446_v10 = vld [vmem:[%s11882_s5 + $0x758] sm:$0xff] }
 0x442   :  { %6806 = vmatprep.subr.bf16.mxu1 %v8306_v24  ;;  %v3234_v24 = vld [vmem:[%s11882_s5 + $0xb8] sm:$0xff] }
 0x443   :  { %6766 = vmatpush2.bf16.msra.mxu0 %v8177_v41  ;;  %v8012_v41 = vcombine.high %v3366_v30, %v3370_v37  ;;  %v3450_v53 = vld [vmem:[%s11882_s5 + $0x778] sm:$0xff] }
 0x444   :  { %6817 = vmatprep.subr.bf16.mxu0 %v7916_v45  ;;  %v7876_v45 = vcombine.high %v3230_v19, %v3234_v24 }
 0x445   :  { %6807 = vmatpush2.bf16.msra.mxu1 %v8305_v46  ;;  %v8011_v46 = vcombine.low %v3366_v30, %v3370_v37  ;;  %v3314_v30 = vld [vmem:[%s11882_s5 + $0x338] sm:$0xff]  ;;  %v8092_v37 = vcombine.high %v3446_v10, %v3450_v53 }
 0x446   :  { %v6523_v3 = vpop.f32.mrf.mxu0  ;;  %6768 = vmatmul.mubr.bf16.vlgmr.msra.gmra.mxu0 %v10457_v52  ;;  %6858 = vmatprep.subr.bf16.mxu1 %v8044_v54  ;;  %v7875_v54 = vcombine.low %v3230_v19, %v3234_v24  ;;  %v3442_v19 = vld [vmem:[%s11882_s5 + $0x738] sm:$0xff] }
 0x447   :  { %v6524_v32 = vadd.f32 %v6523_v3, %v3736_v56  ;;  %6818 = vmatpush1.bf16.msra.mxu0 %v7915_v57  ;;  %6849 = vmatprep.mubr.bf16.mxu0 %v10231_v29  ;;  %v8035_v29 = vcombine.low %v3390_v16, %v3394_v59  ;;  %v3350_v56 = vld [vmem:[%s11882_s5 + $0x458] sm:$0xff]  ;;  %v7868_v16 = vcombine.high %v3222_v47, %v3226_v49 }
 0x448   :  { %v6525_v9 = vpop.f32.mrf.mxu0  ;;  %v6564_v11 = vpop.f32.mrf.mxu1  ;;  %6809 = vmatmul.mubr.bf16.vlgmr.msra.gmra.mxu1 %v10468_v58  ;;  %6819 = vmatprep.subr.bf16.mxu0 %v7908_v61  ;;  %v3354_v57 = vld [vmem:[%s11882_s5 + $0x478] sm:$0xff]  ;;  %v8003_v59 = vcombine.low %v3358_v42, %v3362_v43 }
 0x449   :  { %v6526_v13 = vadd.f32 %v6525_v9, %v3740_v63  ;;  %v11285_v14 = vadd.f32 %v6564_v11, %v6524_v32  ;;  %6859 = vmatpush1.bf16.msra.mxu1 %v8043_v40  ;;  %6890 = vmatprep.mubr.bf16.mxu1 %v10242_v55  ;;  %v3374_v55 = vld [vmem:[%s11882_s5 + $0x518] sm:$0xff]  ;;  %v7996_v40 = vcombine.high %v3350_v56, %v3354_v57 }
 0x44a   :  { %v6527_v18 = vpop.f32.mrf.mxu0  ;;  %v6566_v20 = vpop.f32.mrf.mxu1  ;;  %6860 = vmatprep.subr.bf16.mxu1 %v8036_v5  ;;  %v8020_v36 = vcombine.high %v3374_v55, %v3378_v25  ;;  %v8019_v62 = vcombine.low %v3374_v55, %v3378_v25  ;;  %v3214_v61 = vld [vmem:[%s11882_s5 + $0x18] sm:$0xff]  ;;  %v7995_v32 = vcombine.low %v3350_v56, %v3354_v57  ;;  %v7972_v55 = vcombine.high %v3326_v15, %v3330_v17 }
 0x44b   :  { %v11294_v22 = vadd.f32 %v6566_v20, %v6526_v13  ;;  %6820 = vmatpush1.bf16.msra.mxu0 %v7907_v6  ;;  %v3218_v63 = vld [vmem:[%s11882_s5 + $0x38] sm:$0xff] }
 0x44c   :  { %v6528_v28 = vpop.f32.mrf.mxu0  ;;  %v6568_v48 = vpop.f32.mrf.mxu1  ;;  %6821 = vmatprep.subr.bf16.mxu0 %v7900_v12  ;;  %v3346_v3 = vld [vmem:[%s11882_s5 + $0x438] sm:$0xff]  ;;  %v7860_v5 = vcombine.high %v3214_v61, %v3218_v63  ;;  %v7859_v9 = vcombine.low %v3214_v61, %v3218_v63 }
 0x44d   :  { %6861 = vmatpush1.bf16.msra.mxu1 %v8035_v29  ;;  %v3334_v6 = vld [vmem:[%s11882_s5 + $0x3d8] sm:$0xff]  ;;  %v7988_v8 = vcombine.high %v3342_v2, %v3346_v3  ;;  %v7987_v29 = vcombine.low %v3342_v2, %v3346_v3 }
 0x44e   :  { %v6569_v35 = vpop.f32.mrf.mxu1  ;;  %6862 = vmatprep.subr.bf16.mxu1 %v8028_v21  ;;  %v3462_v11 = vld [vmem:[%s11882_s5 + $0x7d8] sm:$0xff]  ;;  %v7980_v13 = vcombine.high %v3334_v6, %v3338_v26  ;;  %v7979_v20 = vcombine.low %v3334_v6, %v3338_v26 }
 0x44f   :  { %6822 = vmatpush1.bf16.msra.mxu0 %v7899_v23  ;;  %v3466_v12 = vld [vmem:[%s11882_s5 + $0x7f8] sm:$0xff] }
 0x450   :  { %6823 = vmatprep.subr.bf16.mxu0 %v7892_v7  ;;  %v8108_v18 = vcombine.high %v3462_v11, %v3466_v12  ;;  %v3454_v21 = vld [vmem:[%s11882_s5 + $0x798] sm:$0xff]  ;;  %v8107_v25 = vcombine.low %v3462_v11, %v3466_v12 }
 0x451   :  { %6863 = vmatpush1.bf16.msra.mxu1 %v8027_v33  ;;  %v3458_v23 = vld [vmem:[%s11882_s5 + $0x7b8] sm:$0xff]  ;;  %v7971_v33 = vcombine.low %v3326_v15, %v3330_v17 }
 0x452   :  { %6864 = vmatprep.subr.bf16.mxu1 %v8020_v36  ;;  %v3318_v28 = vld [vmem:[%s11882_s5 + $0x358] sm:$0xff]  ;;  %v8100_v7 = vcombine.high %v3454_v21, %v3458_v23  ;;  %v8099_v36 = vcombine.low %v3454_v21, %v3458_v23 }
 0x453   :  { %6824 = vmatpush1.bf16.msra.mxu0 %v7891_v60  ;;  %v3322_v48 = vld [vmem:[%s11882_s5 + $0x378] sm:$0xff] }
 0x454   :  { %6825 = vmatprep.subr.bf16.mxu0 %v7884_v39  ;;  %v7964_v35 = vcombine.high %v3318_v28, %v3322_v48  ;;  %v3310_v60 = vld [vmem:[%s11882_s5 + $0x318] sm:$0xff]  ;;  %v7963_v39 = vcombine.low %v3318_v28, %v3322_v48 }
 0x455   :  { %6865 = vmatpush1.bf16.msra.mxu1 %v8019_v62  ;;  %v3438_v62 = vld [vmem:[%s11882_s5 + $0x718] sm:$0xff]  ;;  %v7956_v24 = vcombine.high %v3310_v60, %v3314_v30 }
 0x456   :  { %6866 = vmatprep.subr.bf16.mxu1 %v8012_v41  ;;  %v8091_v41 = vcombine.low %v3446_v10, %v3450_v53  ;;  %v3306_v42 = vld [vmem:[%s11882_s5 + $0x2f8] sm:$0xff]  ;;  %v8084_v43 = vcombine.high %v3438_v62, %v3442_v19 }
 0x457   :  { %6826 = vmatpush1.bf16.msra.mxu0 %v7883_v38  ;;  %v3302_v38 = vld [vmem:[%s11882_s5 + $0x2d8] sm:$0xff] }
 0x458   :  { %6827 = vmatprep.subr.bf16.mxu0 %v7876_v45  ;;  %v7955_v45 = vcombine.low %v3310_v60, %v3314_v30  ;;  %v3434_v47 = vld [vmem:[%s11882_s5 + $0x6f8] sm:$0xff]  ;;  %v7948_v49 = vcombine.high %v3302_v38, %v3306_v42 }
 0x459   :  { %6867 = vmatpush1.bf16.msra.mxu1 %v8011_v46  ;;  %v3430_v46 = vld [vmem:[%s11882_s5 + $0x6d8] sm:$0xff] }
 0x45a   :  { %6868 = vmatprep.subr.bf16.mxu1 %v8004_v50  ;;  %v8083_v50 = vcombine.low %v3438_v62, %v3442_v19  ;;  %v3298_v56 = vld [vmem:[%s11882_s5 + $0x2b8] sm:$0xff]  ;;  %v8076_v57 = vcombine.high %v3430_v46, %v3434_v47 }
 0x45b   :  { %6828 = vmatpush1.bf16.msra.mxu0 %v7875_v54  ;;  %v3294_v54 = vld [vmem:[%s11882_s5 + $0x298] sm:$0xff] }
 0x45c   :  { %6829 = vmatprep.subr.bf16.mxu0 %v7868_v16  ;;  %v7947_v16 = vcombine.low %v3302_v38, %v3306_v42  ;;  %v3426_v61 = vld [vmem:[%s11882_s5 + $0x6b8] sm:$0xff]  ;;  %v7940_v63 = vcombine.high %v3294_v54, %v3298_v56 }
 0x45d   :  { %6869 = vmatpush1.bf16.msra.mxu1 %v8003_v59  ;;  %v3422_v59 = vld [vmem:[%s11882_s5 + $0x698] sm:$0xff] }
 0x45e   :  { %6870 = vmatprep.subr.bf16.mxu1 %v7996_v40  ;;  %v8075_v40 = vcombine.low %v3430_v46, %v3434_v47  ;;  %v3290_v2 = vld [vmem:[%s11882_s5 + $0x278] sm:$0xff]  ;;  %v8068_v3 = vcombine.high %v3422_v59, %v3426_v61 }
 0x45f   :  { %6830 = vmatpush1.bf16.msra.mxu0 %v7867_v0  ;;  %v3286_v0 = vld [vmem:[%s11882_s5 + $0x258] sm:$0xff] }
 0x460   :  { %6831 = vmatprep.subr.bf16.mxu0 %v7860_v5  ;;  %v7939_v5 = vcombine.low %v3294_v54, %v3298_v56  ;;  %v3418_v6 = vld [vmem:[%s11882_s5 + $0x678] sm:$0xff]  ;;  %v7932_v26 = vcombine.high %v3286_v0, %v3290_v2 }
 0x461   :  { %6871 = vmatpush1.bf16.msra.mxu1 %v7995_v32  ;;  %v3414_v32 = vld [vmem:[%s11882_s5 + $0x658] sm:$0xff] }
 0x462   :  { %6872 = vmatprep.subr.bf16.mxu1 %v7988_v8  ;;  %v8067_v8 = vcombine.low %v3422_v59, %v3426_v61  ;;  %v3282_v11 = vld [vmem:[%s11882_s5 + $0x238] sm:$0xff]  ;;  %v8060_v12 = vcombine.high %v3414_v32, %v3418_v6 }
 0x463   :  { %6832 = vmatpush1.bf16.msra.mxu0 %v7859_v9  ;;  %v3278_v9 = vld [vmem:[%s11882_s5 + $0x218] sm:$0xff] }
 0x464   :  { %6833 = vmatprep.subr.bf16.mxu0 %v7980_v13  ;;  %v7931_v13 = vcombine.low %v3286_v0, %v3290_v2  ;;  %v3410_v15 = vld [vmem:[%s11882_s5 + $0x638] sm:$0xff]  ;;  %v7924_v17 = vcombine.high %v3278_v9, %v3282_v11 }
 0x465   :  { %6873 = vmatpush1.bf16.msra.mxu1 %v7987_v29  ;;  %v3406_v29 = vld [vmem:[%s11882_s5 + $0x618] sm:$0xff] }
 0x466   :  { %6874 = vmatprep.subr.bf16.mxu1 %v8108_v18  ;;  %v8059_v18 = vcombine.low %v3414_v32, %v3418_v6  ;;  %v3530_v21 = vld [vmem:[%s11882_s5 + $0x9f8] sm:$0xff]  ;;  %v8052_v23 = vcombine.high %v3406_v29, %v3410_v15 }
 0x467   :  { %6834 = vmatpush2.bf16.msra.mxu0 %v7979_v20  ;;  %v3526_v20 = vld [vmem:[%s11882_s5 + $0x9d8] sm:$0xff] }
 0x468   :  { %6835 = vmatprep.subr.bf16.mxu0 %v7972_v55  ;;  %v7923_v55 = vcombine.low %v3278_v9, %v3282_v11  ;;  %v3658_v28 = vld [vmem:[%s11882_s5 + $0xdf8] sm:$0xff]  ;;  %v8172_v48 = vcombine.high %v3526_v20, %v3530_v21 }
 0x469   :  { %6875 = vmatpush2.bf16.msra.mxu1 %v8107_v25  ;;  %v3654_v25 = vld [vmem:[%s11882_s5 + $0xdd8] sm:$0xff] }
 0x46a   :  { %6876 = vmatprep.subr.bf16.mxu1 %v8100_v7  ;;  %v8051_v7 = vcombine.low %v3406_v29, %v3410_v15  ;;  %v3522_v10 = vld [vmem:[%s11882_s5 + $0x9b8] sm:$0xff]  ;;  %v8300_v53 = vcombine.high %v3654_v25, %v3658_v28 }
 0x46b   :  { %6836 = vmatpush2.bf16.msra.mxu0 %v7971_v33  ;;  %v3518_v33 = vld [vmem:[%s11882_s5 + $0x998] sm:$0xff] }
 0x46c   :  { %6837 = vmatprep.subr.bf16.mxu0 %v7964_v35  ;;  %v8171_v35 = vcombine.low %v3526_v20, %v3530_v21  ;;  %v3650_v60 = vld [vmem:[%s11882_s5 + $0xdb8] sm:$0xff]  ;;  %v8164_v30 = vcombine.high %v3518_v33, %v3522_v10  ;;  %v8163_v38 = vcombine.low %v3518_v33, %v3522_v10 }
 0x46d   :  { %6877 = vmatpush2.bf16.msra.mxu1 %v8099_v36  ;;  %v3646_v36 = vld [vmem:[%s11882_s5 + $0xd98] sm:$0xff] }
 0x46e   :  { %6878 = vmatprep.subr.bf16.mxu1 %v8092_v37  ;;  %v8299_v37 = vcombine.low %v3654_v25, %v3658_v28  ;;  %v3514_v62 = vld [vmem:[%s11882_s5 + $0x978] sm:$0xff] }
 0x46f   :  { %6838 = vmatpush2.bf16.msra.mxu0 %v7963_v39  ;;  %v3510_v39 = vld [vmem:[%s11882_s5 + $0x958] sm:$0xff] }
 0x470   :  { %6839 = vmatprep.subr.bf16.mxu0 %v7956_v24  ;;  %v8292_v24 = vcombine.high %v3646_v36, %v3650_v60  ;;  %v3638_v42 = vld [vmem:[%s11882_s5 + $0xd58] sm:$0xff] }
 0x471   :  { %6879 = vmatpush2.bf16.msra.mxu1 %v8091_v41  ;;  %v3494_v0 = vld [vmem:[%s11882_s5 + $0x8d8] sm:$0xff] }
 0x472   :  { %6880 = vmatprep.subr.bf16.mxu1 %v8084_v43  ;;  %v3642_v43 = vld [vmem:[%s11882_s5 + $0xd78] sm:$0xff] }
 0x473   :  { %6840 = vmatpush2.bf16.msra.mxu0 %v7955_v45  ;;  %v8284_v56 = vcombine.high %v3638_v42, %v3642_v43  ;;  %v3498_v2 = vld [vmem:[%s11882_s5 + $0x8f8] sm:$0xff] }
 0x474   :  { %6841 = vmatprep.subr.bf16.mxu0 %v7948_v49  ;;  %v3502_v49 = vld [vmem:[%s11882_s5 + $0x918] sm:$0xff]  ;;  %v8139_v29 = vcombine.low %v3494_v0, %v3498_v2 }
 0x475   :  { %6881 = vmatpush2.bf16.msra.mxu1 %v8083_v50  ;;  %v3506_v50 = vld [vmem:[%s11882_s5 + $0x938] sm:$0xff] }
 0x476   :  { %6882 = vmatprep.subr.bf16.mxu1 %v8076_v57  ;;  %v8147_v32 = vcombine.low %v3502_v49, %v3506_v50  ;;  %v3622_v6 = vld [vmem:[%s11882_s5 + $0xcd8] sm:$0xff] }
 0x477   :  { %6842 = vmatpush2.bf16.msra.mxu0 %v7947_v16  ;;  %v3634_v16 = vld [vmem:[%s11882_s5 + $0xd38] sm:$0xff] }
 0x478   :  { %6843 = vmatprep.subr.bf16.mxu0 %v7940_v63  ;;  %v8148_v63 = vcombine.high %v3502_v49, %v3506_v50  ;;  %v3486_v11 = vld [vmem:[%s11882_s5 + $0x898] sm:$0xff] }
 0x479   :  { %6883 = vmatpush2.bf16.msra.mxu1 %v8075_v40  ;;  %v8283_v40 = vcombine.low %v3638_v42, %v3642_v43  ;;  %v3614_v15 = vld [vmem:[%s11882_s5 + $0xc98] sm:$0xff] }
 0x47a   :  { %6884 = vmatprep.subr.bf16.mxu1 %v8068_v3  ;;  %v3478_v21 = vld [vmem:[%s11882_s5 + $0x858] sm:$0xff] }
 0x47b   :  { %6844 = vmatpush2.bf16.msra.mxu0 %v7939_v5  ;;  %v3606_v28 = vld [vmem:[%s11882_s5 + $0xc58] sm:$0xff] }
 0x47c   :  { %6845 = vmatprep.subr.bf16.mxu0 %v7932_v26  ;;  %v3626_v26 = vld [vmem:[%s11882_s5 + $0xcf8] sm:$0xff] }
 0x47d   :  { %6885 = vmatpush2.bf16.msra.mxu1 %v8067_v8  ;;  %v8140_v8 = vcombine.high %v3494_v0, %v3498_v2  ;;  %v8267_v20 = vcombine.low %v3622_v6, %v3626_v26  ;;  %v3470_v10 = vld [vmem:[%s11882_s5 + $0x818] sm:$0xff] }
 0x47e   :  { %6886 = vmatprep.subr.bf16.mxu1 %v8060_v12  ;;  %v3490_v12 = vld [vmem:[%s11882_s5 + $0x8b8] sm:$0xff] }
 0x47f   :  { %6846 = vmatpush2.bf16.msra.mxu0 %v7931_v13  ;;  %v8268_v13 = vcombine.high %v3622_v6, %v3626_v26  ;;  %v8131_v25 = vcombine.low %v3486_v11, %v3490_v12  ;;  %v3722_v42 = vld [vmem:[%s11882_s5 + $0xff8] sm:$0xff] }
 0x480   :  { %6847 = vmatprep.subr.bf16.mxu0 %v7924_v17  ;;  %v3618_v17 = vld [vmem:[%s11882_s5 + $0xcb8] sm:$0xff] }
 0x481   :  { %6887 = vmatpush2.bf16.msra.mxu1 %v8059_v18  ;;  %v8132_v18 = vcombine.high %v3486_v11, %v3490_v12  ;;  %v8259_v33 = vcombine.low %v3614_v15, %v3618_v17  ;;  %v3710_v49 = vld [vmem:[%s11882_s5 + $0xf98] sm:$0xff] }
 0x482   :  { %6888 = vmatprep.subr.bf16.mxu1 %v8052_v23  ;;  %v3482_v23 = vld [vmem:[%s11882_s5 + $0x878] sm:$0xff] }
 0x483   :  { %6848 = vmatpush2.bf16.msra.mxu0 %v7923_v55  ;;  %v8260_v55 = vcombine.high %v3614_v15, %v3618_v17  ;;  %v3714_v50 = vld [vmem:[%s11882_s5 + $0xfb8] sm:$0xff] }
 0x484   :  { %6899 = vmatprep.subr.bf16.mxu0 %v8172_v48  ;;  %v3610_v48 = vld [vmem:[%s11882_s5 + $0xc78] sm:$0xff] }
 0x485   :  { %6889 = vmatpush2.bf16.msra.mxu1 %v8051_v7  ;;  %v8124_v7 = vcombine.high %v3478_v21, %v3482_v23  ;;  %v3566_v0 = vld [vmem:[%s11882_s5 + $0xb18] sm:$0xff] }
 0x486   :  { %v6605_v19 = vpop.f32.mrf.mxu0  ;;  %6850 = vmatmul.mubr.bf16.vlgmr.msra.gmra.mxu0 %v10239_v31  ;;  %6940 = vmatprep.subr.bf16.mxu1 %v8300_v53  ;;  %v8156_v31 = vcombine.high %v3510_v39, %v3514_v62  ;;  %v3474_v53 = vld [vmem:[%s11882_s5 + $0x838] sm:$0xff] }
 0x487   :  { %v6606_v41 = vadd.f32 %v6605_v19, %v11285_v14  ;;  %6900 = vmatpush1.bf16.msra.mxu0 %v8171_v35  ;;  %6931 = vmatprep.mubr.bf16.mxu0 %v10273_v44  ;;  %v8291_v44 = vcombine.low %v3646_v36, %v3650_v60  ;;  %v8252_v35 = vcombine.high %v3606_v28, %v3610_v48  ;;  %v3598_v60 = vld [vmem:[%s11882_s5 + $0xc18] sm:$0xff] }
 0x488   :  { %v6607_v45 = vpop.f32.mrf.mxu0  ;;  %v6646_v46 = vpop.f32.mrf.mxu1  ;;  %6891 = vmatmul.mubr.bf16.vlgmr.msra.gmra.mxu1 %v10251_v34  ;;  %6901 = vmatprep.subr.bf16.mxu0 %v8164_v30  ;;  %v8123_v36 = vcombine.low %v3478_v21, %v3482_v23  ;;  %v3602_v30 = vld [vmem:[%s11882_s5 + $0xc38] sm:$0xff] }
 0x489   :  { %v6608_v14 = vadd.f32 %v6607_v45, %v11294_v22  ;;  %v11487_v47 = vadd.f32 %v6646_v46, %v6606_v41  ;;  %6941 = vmatpush1.bf16.msra.mxu1 %v8299_v37  ;;  %6972 = vmatprep.mubr.bf16.mxu1 %v10284_v51  ;;  %v8155_v22 = vcombine.low %v3510_v39, %v3514_v62  ;;  %v3630_v51 = vld [vmem:[%s11882_s5 + $0xd18] sm:$0xff] }
 0x48a   :  { %v6609_v54 = vpop.f32.mrf.mxu0  ;;  %v6648_v34 = vpop.f32.mrf.mxu1  ;;  %6942 = vmatprep.subr.bf16.mxu1 %v8292_v24  ;;  %v8276_v5 = vcombine.high %v3630_v51, %v3634_v16  ;;  %v8275_v9 = vcombine.low %v3630_v51, %v3634_v16  ;;  %v8116_v37 = vcombine.high %v3470_v10, %v3474_v53  ;;  %v8251_v39 = vcombine.low %v3606_v28, %v3610_v48  ;;  %v3590_v62 = vld [vmem:[%s11882_s5 + $0xbd8] sm:$0xff] }
 0x48b   :  { %v11496_v57 = vadd.f32 %v6648_v34, %v6608_v14  ;;  %6902 = vmatpush1.bf16.msra.mxu0 %v8163_v38  ;;  %v3594_v19 = vld [vmem:[%s11882_s5 + $0xbf8] sm:$0xff]  ;;  %v8244_v24 = vcombine.high %v3598_v60, %v3602_v30  ;;  %v8115_v41 = vcombine.low %v3470_v10, %v3474_v53  ;;  %v8243_v45 = vcombine.low %v3598_v60, %v3602_v30 }
 0x48c   :  { %v6610_v59 = vpop.f32.mrf.mxu0  ;;  %v6650_v61 = vpop.f32.mrf.mxu1  ;;  %6903 = vmatprep.subr.bf16.mxu0 %v8156_v31  ;;  %v3718_v38 = vld [vmem:[%s11882_s5 + $0xfd8] sm:$0xff]  ;;  %v8236_v43 = vcombine.high %v3590_v62, %v3594_v19  ;;  %v8356_v51 = vcombine.high %v3710_v49, %v3714_v50 }
 0x48d   :  { %6943 = vmatpush1.bf16.msra.mxu1 %v8291_v44  ;;  %v3582_v46 = vld [vmem:[%s11882_s5 + $0xb98] sm:$0xff]  ;;  %v8364_v14 = vcombine.high %v3718_v38, %v3722_v42  ;;  %v8235_v44 = vcombine.low %v3590_v62, %v3594_v19  ;;  %v8363_v34 = vcombine.low %v3718_v38, %v3722_v42 }
 0x48e   :  { %v6651_v3 = vpop.f32.mrf.mxu1  ;;  %6944 = vmatprep.subr.bf16.mxu1 %v8284_v56  ;;  %v3586_v31 = vld [vmem:[%s11882_s5 + $0xbb8] sm:$0xff] }
 0x48f   :  { %6904 = vmatpush1.bf16.msra.mxu0 %v8155_v22  ;;  %v8228_v54 = vcombine.high %v3582_v46, %v3586_v31  ;;  %v3574_v56 = vld [vmem:[%s11882_s5 + $0xb58] sm:$0xff]  ;;  %v8227_v16 = vcombine.low %v3582_v46, %v3586_v31 }
 0x490   :  { %6905 = vmatprep.subr.bf16.mxu0 %v8148_v63  ;;  %v3578_v22 = vld [vmem:[%s11882_s5 + $0xb78] sm:$0xff] }
 0x491   :  { %6945 = vmatpush1.bf16.msra.mxu1 %v8283_v40  ;;  %v3702_v59 = vld [vmem:[%s11882_s5 + $0xf58] sm:$0xff]  ;;  %v8220_v63 = vcombine.high %v3574_v56, %v3578_v22  ;;  %v8355_v40 = vcombine.low %v3710_v49, %v3714_v50 }
 0x492   :  { %6946 = vmatprep.subr.bf16.mxu1 %v8276_v5  ;;  %v3706_v61 = vld [vmem:[%s11882_s5 + $0xf78] sm:$0xff]  ;;  %v8219_v5 = vcombine.low %v3574_v56, %v3578_v22  ;;  %v9059_v22 = vld [vmem:[%s11884_s7 + $0x170] sm:$0xff]  }
 0x493   :  { %6906 = vmatpush1.bf16.msra.mxu0 %v8147_v32  ;;  %v3570_v2 = vld [vmem:[%s11882_s5 + $0xb38] sm:$0xff]  ;;  %v8348_v3 = vcombine.high %v3702_v59, %v3706_v61 }
 0x494   :  { %6907 = vmatprep.subr.bf16.mxu0 %v8140_v8  ;;  %v3694_v32 = vld [vmem:[%s11882_s5 + $0xf18] sm:$0xff]  ;;  %v8212_v26 = vcombine.high %v3566_v0, %v3570_v2  ;;  %v8347_v8 = vcombine.low %v3702_v59, %v3706_v61  ;;  %v9061_v61 = vld [vmem:[%s11884_s7 + $0x130] sm:$0xff]  }
 0x495   :  { %6947 = vmatpush1.bf16.msra.mxu1 %v8275_v9  ;;  %v3698_v6 = vld [vmem:[%s11882_s5 + $0xf38] sm:$0xff] }
 0x496   :  { %6948 = vmatprep.subr.bf16.mxu1 %v8268_v13  ;;  %v3558_v9 = vld [vmem:[%s11882_s5 + $0xad8] sm:$0xff]  ;;  %v8340_v12 = vcombine.high %v3694_v32, %v3698_v6  ;;  %v8211_v13 = vcombine.low %v3566_v0, %v3570_v2  ;;  %v9063_v0 = vld [vmem:[%s11884_s7 + $0x168] sm:$0xff]  }
 0x497   :  { %6908 = vmatpush1.bf16.msra.mxu0 %v8139_v29  ;;  %v3562_v11 = vld [vmem:[%s11882_s5 + $0xaf8] sm:$0xff] }
 0x498   :  { %6909 = vmatprep.subr.bf16.mxu0 %v8132_v18  ;;  %v3686_v29 = vld [vmem:[%s11882_s5 + $0xed8] sm:$0xff]  ;;  %v8204_v17 = vcombine.high %v3558_v9, %v3562_v11  ;;  %v8339_v18 = vcombine.low %v3694_v32, %v3698_v6  ;;  %v9065_v32 = vld [vmem:[%s11884_s7 + $0x128] sm:$0xff]  }
 0x499   :  { %6949 = vmatpush1.bf16.msra.mxu1 %v8267_v20  ;;  %v3690_v15 = vld [vmem:[%s11882_s5 + $0xef8] sm:$0xff] }
 0x49a   :  { %6950 = vmatprep.subr.bf16.mxu1 %v8260_v55  ;;  %v3550_v20 = vld [vmem:[%s11882_s5 + $0xa98] sm:$0xff]  ;;  %v8332_v23 = vcombine.high %v3686_v29, %v3690_v15  ;;  %v8203_v55 = vcombine.low %v3558_v9, %v3562_v11  ;;  %v9069_v11 = vld [vmem:[%s11884_s7 + $0x120] sm:$0xff]  }
 0x49b   :  { %6910 = vmatpush1.bf16.msra.mxu0 %v8131_v25  ;;  %v3554_v21 = vld [vmem:[%s11882_s5 + $0xab8] sm:$0xff] }
 0x49c   :  { %6911 = vmatprep.subr.bf16.mxu0 %v8124_v7  ;;  %v3678_v25 = vld [vmem:[%s11882_s5 + $0xe98] sm:$0xff]  ;;  %v8196_v48 = vcombine.high %v3550_v20, %v3554_v21  ;;  %v8331_v7 = vcombine.low %v3686_v29, %v3690_v15  ;;  %v9042_v29 = vld [vmem:[%s11884_s7 + $0x50] sm:$0xff]  }
 0x49d   :  { %6951 = vmatpush1.bf16.msra.mxu1 %v8259_v33  ;;  %v3682_v28 = vld [vmem:[%s11882_s5 + $0xeb8] sm:$0xff] }
 0x49e   :  { %6952 = vmatprep.subr.bf16.mxu1 %v8252_v35  ;;  %v3542_v33 = vld [vmem:[%s11882_s5 + $0xa58] sm:$0xff]  ;;  %v8324_v53 = vcombine.high %v3678_v25, %v3682_v28  ;;  %v8195_v35 = vcombine.low %v3550_v20, %v3554_v21  ;;  %v9044_v20 = vld [vmem:[%s11884_s7 + $0x48] sm:$0xff]   ;;  %v9075_v21 = vld [vmem:[%s11884_s7 + $0x110] sm:$0xff]  }
 0x49f   :  { %6912 = vmatpush1.bf16.msra.mxu0 %v8123_v36  ;;  %v3546_v10 = vld [vmem:[%s11882_s5 + $0xa78] sm:$0xff] }
 0x4a0   :  { %6913 = vmatprep.subr.bf16.mxu0 %v8116_v37  ;;  %v3670_v36 = vld [vmem:[%s11882_s5 + $0xe58] sm:$0xff]  ;;  %v8188_v30 = vcombine.high %v3542_v33, %v3546_v10  ;;  %v8323_v37 = vcombine.low %v3678_v25, %v3682_v28  ;;  %v9046_v25 = vld [vmem:[%s11884_s7 + $0x40] sm:$0xff]   ;;  %v9077_v28 = vld [vmem:[%s11884_s7 + $0x108] sm:$0xff]  }
 0x4a1   :  { %6953 = vmatpush1.bf16.msra.mxu1 %v8251_v39  ;;  %v3674_v60 = vld [vmem:[%s11882_s5 + $0xe78] sm:$0xff] }
 0x4a2   :  { %6954 = vmatprep.subr.bf16.mxu1 %v8244_v24  ;;  %v3534_v39 = vld [vmem:[%s11882_s5 + $0xa18] sm:$0xff]  ;;  %v8316_v19 = vcombine.high %v3670_v36, %v3674_v60  ;;  %v8187_v24 = vcombine.low %v3542_v33, %v3546_v10  ;;  %v6981_v33 = vmax.f32 %v11081_v27, 0.0  ;;  %v9050_v27 = vld [vmem:[%s11884_s7 + $0xf0] sm:$0xff]  }
 0x4a3   :  { %6914 = vmatpush1.bf16.msra.mxu0 %v8115_v41  ;;  %v3538_v62 = vld [vmem:[%s11882_s5 + $0xa38] sm:$0xff] }
 0x4a4   :  { %6915 = vmatprep.subr.bf16.mxu0 %v8236_v43  ;;  %v3662_v41 = vld [vmem:[%s11882_s5 + $0xe18] sm:$0xff]  ;;  %v8180_v42 = vcombine.high %v3534_v39, %v3538_v62  ;;  %v8315_v43 = vcombine.low %v3670_v36, %v3674_v60  ;;  %v8179_v46 = vcombine.low %v3534_v39, %v3538_v62  ;;  %v6989_v60 = vpack.c.bf16 %v6981_v33, %v6981_v33  ;;  %v9053_v39 = vld [vmem:[%s11884_s7 + $0xa8] sm:$0xff]   ;;  %v9054_v62 = vld [vmem:[%s11884_s7 + $0xe0] sm:$0xff]  }
 0x4a5   :  { %6955 = vmatpush1.bf16.msra.mxu1 %v8243_v45  ;;  %v3666_v38 = vld [vmem:[%s11882_s5 + $0xe38] sm:$0xff]  ;;  %v9095_v33 = vld [vmem:[%s11884_s7 + $0x180] sm:$0xff]  }
 0x4a6   :  { %6956 = vmatprep.subr.bf16.mxu1 %v8364_v14  ;;  %v8308_v45 = vcombine.high %v3662_v41, %v3666_v38  ;;  %v9032_v31 = vld [vmem:[%s11884_s7 + $0x78] sm:$0xff]   ;;  %v6982_v14 = vmax.f32 %v11090_v4, 0.0 }
 0x4a7   :  { %6916 = vmatpush2.bf16.msra.mxu0 %v8235_v44  ;;  %v8307_v44 = vcombine.low %v3662_v41, %v3666_v38  ;;  %v9055_v49 = vld [vmem:[%s11884_s7 + $0x178] sm:$0xff]   ;;  %v9062_v38 = vld [vmem:[%s11884_s7 + $0xd0] sm:$0xff]  }
 0x4a8   :  { %6917 = vmatprep.subr.bf16.mxu0 %v8228_v54  ;;  %v9033_v50 = vld [vmem:[%s11884_s7 + $0x38] sm:$0xff]   ;;  %v9034_v54 = vld [vmem:[%s11884_s7 + $0x70] sm:$0xff]  }
 0x4a9   :  { %6957 = vmatpush2.bf16.msra.mxu1 %v8363_v34  ;;  %v6990_v34 = vpack.c.bf16 %v6982_v14, %v6982_v14  ;;  %v9057_v4 = vld [vmem:[%s11884_s7 + $0x138] sm:$0xff]   ;;  %v9070_v14 = vld [vmem:[%s11884_s7 + $0xc0] sm:$0xff]  }
 0x4aa   :  { %6958 = vmatprep.subr.bf16.mxu1 %v8356_v51  ;;  %v9035_v51 = vld [vmem:[%s11884_s7 + $0x30] sm:$0xff]   ;;  %v9040_v9 = vld [vmem:[%s11884_s7 + $0x58] sm:$0xff]  }
 0x4ab   :  { %6918 = vmatpush2.bf16.msra.mxu0 %v8227_v16  ;;  %v9073_v15 = vld [vmem:[%s11884_s7 + $0x118] sm:$0xff]  }
 0x4ac   :  { %6919 = vmatprep.subr.bf16.mxu0 %v8220_v63  ;;  %v9048_v10 = vld [vmem:[%s11884_s7 + $0xf8] sm:$0xff]  }
 0x4ad   :  { %6959 = vmatpush2.bf16.msra.mxu1 %v8355_v40  ;;  %v9049_v36 = vld [vmem:[%s11884_s7 + $0xb8] sm:$0xff]  }
 0x4ae   :  { %6960 = vmatprep.subr.bf16.mxu1 %v8348_v3  ;;  %v9060_v41 = vld [vmem:[%s11884_s7 + $0x98] sm:$0xff]  }
 0x4af   :  { %6920 = vmatpush2.bf16.msra.mxu0 %v8219_v5  ;;  %v9038_v5 = vld [vmem:[%s11884_s7 + $0x60] sm:$0xff]  }
 0x4b0   :  { %6921 = vmatprep.subr.bf16.mxu0 %v8212_v26  ;;  %v9067_v26 = vld [vmem:[%s11884_s7 + $0x160] sm:$0xff]  }
 0x4b1   :  { %6961 = vmatpush2.bf16.msra.mxu1 %v8347_v8  ;;  %v9039_v8 = vld [vmem:[%s11884_s7 + $0x20] sm:$0xff]  }
 0x4b2   :  { %6962 = vmatprep.subr.bf16.mxu1 %v8340_v12  ;;  %v9071_v12 = vld [vmem:[%s11884_s7 + $0x158] sm:$0xff]  }
 0x4b3   :  { %6922 = vmatpush2.bf16.msra.mxu0 %v8211_v13  ;;  %v9041_v13 = vld [vmem:[%s11884_s7 + $0x18] sm:$0xff]  }
 0x4b4   :  { %6923 = vmatprep.subr.bf16.mxu0 %v8204_v17  ;;  %v9074_v17 = vld [vmem:[%s11884_s7 + $0x150] sm:$0xff]  }
 0x4b5   :  { %6963 = vmatpush2.bf16.msra.mxu1 %v8339_v18  ;;  %v9043_v18 = vld [vmem:[%s11884_s7 + $0x10] sm:$0xff]  }
 0x4b6   :  { %6964 = vmatprep.subr.bf16.mxu1 %v8332_v23  ;;  %v9076_v23 = vld [vmem:[%s11884_s7 + $0x148] sm:$0xff]  }
 0x4b7   :  { %6924 = vmatpush2.bf16.msra.mxu0 %v8203_v55  ;;  %v9045_v55 = vld [vmem:[%s11884_s7 + $0x8] sm:$0xff]  }
 0x4b8   :  { %6925 = vmatprep.subr.bf16.mxu0 %v8196_v48  ;;  %v9078_v48 = vld [vmem:[%s11884_s7 + $0x140] sm:$0xff]  }
 0x4b9   :  { %6965 = vmatpush2.bf16.msra.mxu1 %v8331_v7  ;;  %v9047_v7 = vld [vmem:[%s11884_s7] sm:$0xff]  }
 0x4ba   :  { %6966 = vmatprep.subr.bf16.mxu1 %v8324_v53  ;;  %v6984_v53 = vmax.f32 %v11496_v57, 0.0  ;;  %v9051_v57 = vld [vmem:[%s11884_s7 + $0xb0] sm:$0xff]  }
 0x4bb   :  { %6926 = vmatpush2.bf16.msra.mxu0 %v8195_v35  ;;  %v9079_v35 = vld [vmem:[%s11884_s7 + $0x100] sm:$0xff]  }
 0x4bc   :  { %6927 = vmatprep.subr.bf16.mxu0 %v8188_v30  ;;  %v6992_v30 = vpack.c.bf16 %v6984_v53, %v6984_v53 }
 0x4bd   :  { %6967 = vmatpush2.bf16.msra.mxu1 %v8323_v37  ;;  %v9052_v37 = vld [vmem:[%s11884_s7 + $0xe8] sm:$0xff]  }
 0x4be   :  { %6968 = vmatprep.subr.bf16.mxu1 %v8316_v19  ;;  %v9056_v19 = vld [vmem:[%s11884_s7 + $0xa0] sm:$0xff]  }
 0x4bf   :  { %6928 = vmatpush2.bf16.msra.mxu0 %v8187_v24  ;;  %v9058_v24 = vld [vmem:[%s11884_s7 + $0xd8] sm:$0xff]  }
 0x4c0   :  { %6929 = vmatprep.subr.bf16.mxu0 %v8180_v42  ;;  %v9064_v42 = vld [vmem:[%s11884_s7 + $0x90] sm:$0xff]  }
 0x4c1   :  { %6969 = vmatpush2.bf16.msra.mxu1 %v8315_v43  ;;  %v9066_v43 = vld [vmem:[%s11884_s7 + $0xc8] sm:$0xff]  }
 0x4c2   :  { %6970 = vmatprep.subr.bf16.mxu1 %v8308_v45  ;;  %v3743_v45 = vsub.s32 4, %v10219_v1 }
 0x4c3   :  { %6930 = vmatpush2.bf16.msra.mxu0 %v8179_v46  ;;  %v3747_v46 = vsub.s32 5, %v10219_v1 }
 0x4c4   :  { %8582 = vmatprep.subr.bf16.mxu0 %v9032_v31  ;;  %v9068_v31 = vld [vmem:[%s11884_s7 + $0x88] sm:$0xff]  }
 0x4c5   :  { %6971 = vmatpush2.bf16.msra.mxu1 %v8307_v44  ;;  %v11807_v44 = vld [vmem:[%s11883_s6] sm:$0xff] }
 0x4c6   :  { %v11664_v56 = vpop.f32.mrf.mxu0  ;;  %6932 = vmatmul.mubr.bf16.vlgmr.msra.gmra.mxu0 %v10457_v52  ;;  %8626 = vmatprep.subr.bf16.mxu1 %v9055_v49  ;;  %v9036_v52 = vld [vmem:[%s11884_s7 + $0x68] sm:$0xff]   ;;  %v3744_v49 = vrot.slane %v11807_v44, %v3743_v45 }
 0x4c7   :  { %8583 = vmatpush3.bf16.msra.mxu0 %v9033_v50  ;;  %7548 = vmatprep.mubr.bf16.mxu0 %v6990_v34  ;;  %v3748_v50 = vrot.slane %v11807_v44, %v3747_v46  ;;  %v6983_v34 = vmax.f32 %v11487_v47, 0.0  ;;  %v9082_v47 = vld [vmem:[%s11884_s7 + $0x1f0] sm:$0xff]  }
 0x4c8   :  { %v11673_v16 = vpop.f32.mrf.mxu0  ;;  %v11675_v59 = vpop.f32.mrf.mxu1  ;;  %6973 = vmatmul.mubr.bf16.vlgmr.msra.gmra.mxu1 %v10468_v58  ;;  %8584 = vmatprep.subr.bf16.mxu0 %v9034_v54  ;;  %v9037_v58 = vld [vmem:[%s11884_s7 + $0x28] sm:$0xff]   ;;  %v9072_v54 = vld [vmem:[%s11884_s7 + $0x80] sm:$0xff]  }
 0x4c9   :  { %8627 = vmatpush3.bf16.msra.mxu1 %v9057_v4  ;;  %v9080_v4 = vld [vmem:[%s11884_s7 + $0x1f8] sm:$0xff]  }
 0x4ca   :  { %v6691_v63 = vpop.f32.mrf.mxu0  ;;  %v11684_v40 = vpop.f32.mrf.mxu1  ;;  %8628 = vmatprep.subr.bf16.mxu1 %v9059_v22  ;;  %v6688_v22 = vadd.f32 %v11664_v56, %v3744_v49 }
 0x4cb   :  { %8585 = vmatpush3.bf16.msra.mxu0 %v9035_v51  ;;  %v6690_v51 = vadd.f32 %v11673_v16, %v3748_v50  ;;  %v9083_v16 = vld [vmem:[%s11884_s7 + $0x1b0] sm:$0xff]  }
 0x4cc   :  { %v6692_v2 = vpop.f32.mrf.mxu0  ;;  %v6732_v3 = vpop.f32.mrf.mxu1  ;;  %8586 = vmatprep.subr.bf16.mxu0 %v9036_v52  ;;  %v9081_v52 = vld [vmem:[%s11884_s7 + $0x1b8] sm:$0xff]   ;;  %v6729_v63 = vadd.f32 %v11675_v59, %v6688_v22 }
 0x4cd   :  { %8629 = vmatpush3.bf16.msra.mxu1 %v9061_v61  ;;  %v6991_v61 = vpack.c.bf16 %v6983_v34, %v6983_v34 }
 0x4ce   :  { %v6733_v6 = vpop.f32.mrf.mxu1  ;;  %8630 = vmatprep.subr.bf16.mxu1 %v9063_v0 }
 0x4cf   :  { %8587 = vmatpush3.bf16.msra.mxu0 %v9037_v58  ;;  %v6731_v58 = vadd.f32 %v11684_v40, %v6690_v51  ;;  %v9085_v40 = vld [vmem:[%s11884_s7 + $0x1a8] sm:$0xff]  }
 0x4d0   :  { %8588 = vmatprep.subr.bf16.mxu0 %v9038_v5  ;;  %v9084_v5 = vld [vmem:[%s11884_s7 + $0x1e8] sm:$0xff]  }
 0x4d1   :  { %8631 = vmatpush3.bf16.msra.mxu1 %v9065_v32 }
 0x4d2   :  { %8632 = vmatprep.subr.bf16.mxu1 %v9067_v26 }
 0x4d3   :  { %8589 = vmatpush3.bf16.msra.mxu0 %v9039_v8 }
 0x4d4   :  { %8590 = vmatprep.subr.bf16.mxu0 %v9040_v9 }
 0x4d5   :  { %8633 = vmatpush3.bf16.msra.mxu1 %v9069_v11 }
 0x4d6   :  { %8634 = vmatprep.subr.bf16.mxu1 %v9071_v12 }
 0x4d7   :  { %8591 = vmatpush3.bf16.msra.mxu0 %v9041_v13  ;;  %v9086_v13 = vld [vmem:[%s11884_s7 + $0x1e0] sm:$0xff]  }
 0x4d8   :  { %8592 = vmatprep.subr.bf16.mxu0 %v9042_v29 }
 0x4d9   :  { %8635 = vmatpush3.bf16.msra.mxu1 %v9073_v15 }
 0x4da   :  { %8636 = vmatprep.subr.bf16.mxu1 %v9074_v17 }
 0x4db   :  { %8593 = vmatpush3.bf16.msra.mxu0 %v9043_v18  ;;  %v9087_v18 = vld [vmem:[%s11884_s7 + $0x1a0] sm:$0xff]  }
 0x4dc   :  { %8594 = vmatprep.subr.bf16.mxu0 %v9044_v20 }
 0x4dd   :  { %8637 = vmatpush3.bf16.msra.mxu1 %v9075_v21  ;;  %v9088_v21 = vld [vmem:[%s11884_s7 + $0x1d8] sm:$0xff]  }
 0x4de   :  { %8638 = vmatprep.subr.bf16.mxu1 %v9076_v23  ;;  %v9089_v23 = vld [vmem:[%s11884_s7 + $0x198] sm:$0xff]  }
 0x4df   :  { %8595 = vmatpush3.bf16.msra.mxu0 %v9045_v55  ;;  %v9090_v55 = vld [vmem:[%s11884_s7 + $0x1d0] sm:$0xff]  }
 0x4e0   :  { %8596 = vmatprep.subr.bf16.mxu0 %v9046_v25  ;;  %v9091_v25 = vld [vmem:[%s11884_s7 + $0x190] sm:$0xff]  }
 0x4e1   :  { %8639 = vmatpush3.bf16.msra.mxu1 %v9077_v28  ;;  %v9092_v28 = vld [vmem:[%s11884_s7 + $0x1c8] sm:$0xff]  }
 0x4e2   :  { %8640 = vmatprep.subr.bf16.mxu1 %v9078_v48  ;;  %v9093_v48 = vld [vmem:[%s11884_s7 + $0x188] sm:$0xff]  }
 0x4e3   :  { %8597 = vmatpush3.bf16.msra.mxu0 %v9047_v7  ;;  %v9094_v7 = vld [vmem:[%s11884_s7 + $0x1c0] sm:$0xff]  }
 0x4e4   :  { %8604 = vmatprep.subr.bf16.mxu0 %v9048_v10 }
 0x4e5   :  { %8641 = vmatpush3.bf16.msra.mxu1 %v9079_v35 }
 0x4e6   :  { %7549 = vmatmul.mubr.bf16.vlgmr.msra.gmra.mxu0 %v6989_v60 }
 0x4e7   :  { %8605 = vmatpush3.bf16.msra.mxu0 %v9049_v36  ;;  %7588 = vmatprep.mubr.bf16.mxu0 %v6992_v30 }
 0x4e8   :  { %8606 = vmatprep.subr.bf16.mxu0 %v9050_v27 }
 0x4eb   :  { %8607 = vmatpush3.bf16.msra.mxu0 %v9051_v57 }
 0x4ec   :  { %8608 = vmatprep.subr.bf16.mxu0 %v9052_v37  ;;  %v3751_v37 = vsub.s32 6, %v10219_v1 }
 0x4ef   :  { %8609 = vmatpush3.bf16.msra.mxu0 %v9053_v39  ;;  %v3755_v39 = vsub.s32 7, %v10219_v1 }
 0x4f0   :  { %8610 = vmatprep.subr.bf16.mxu0 %v9054_v62  ;;  %v3752_v62 = vrot.slane %v11807_v44, %v3751_v37 }
 0x4f3   :  { %8611 = vmatpush3.bf16.msra.mxu0 %v9056_v19  ;;  %v3756_v19 = vrot.slane %v11807_v44, %v3755_v39 }
 0x4f4   :  { %8612 = vmatprep.subr.bf16.mxu0 %v9058_v24 }
 0x4f7   :  { %8613 = vmatpush3.bf16.msra.mxu0 %v9060_v41 }
 0x4f8   :  { %8614 = vmatprep.subr.bf16.mxu0 %v9062_v38 }
 0x4fb   :  { %8615 = vmatpush3.bf16.msra.mxu0 %v9064_v42 }
 0x4fc   :  { %8616 = vmatprep.subr.bf16.mxu0 %v9066_v43 }
 0x4ff   :  { %8617 = vmatpush3.bf16.msra.mxu0 %v9068_v31 }
 0x500   :  { %8618 = vmatprep.subr.bf16.mxu0 %v9070_v14 }
 0x503   :  { %8619 = vmatpush3.bf16.msra.mxu0 %v9072_v54 }
 0x504   :  { %8648 = vmatprep.subr.bf16.mxu0 %v9080_v4 }
 0x506   :  { %v6769_v0 = vpop.f32.mrf.mxu0  ;;  %7589 = vmatmul.mubr.bf16.vlgmr.msra.gmra.mxu0 %v6991_v61 }
 0x507   :  { %v6770_v56 = vadd.f32 %v6769_v0, %v6729_v63  ;;  %8649 = vmatpush3.bf16.msra.mxu0 %v9081_v52 }
 0x508   :  { %v6771_v2 = vpop.f32.mrf.mxu0  ;;  %v6810_v3 = vpop.f32.mrf.mxu1  ;;  %8650 = vmatprep.subr.bf16.mxu0 %v9082_v47 }
 0x509   :  { %v6772_v32 = vadd.f32 %v6771_v2, %v6731_v58  ;;  %v6811_v6 = vadd.f32 %v6810_v3, %v6770_v56 }
 0x50a   :  { %v6773_v59 = vpop.f32.mrf.mxu0  ;;  %v6812_v26 = vpop.f32.mrf.mxu1 }
 0x50b   :  { %v6813_v8 = vadd.f32 %v6812_v26, %v6772_v32  ;;  %8651 = vmatpush3.bf16.msra.mxu0 %v9083_v16  ;;  %v6985_v9 = vmax.f32 %v6811_v6, 0.0  ;;  %v8365_v16 = vld [vmem:[%s11885_s8] ss:$0 sm:$0xff]  ;;  %s9098_s8 = scalar_lea.vmem %s7684_s14, 32 }
 0x50c   :  { %v6774_v11 = vpop.f32.mrf.mxu0  ;;  %v6814_v12 = vpop.f32.mrf.mxu1  ;;  %8652 = vmatprep.subr.bf16.mxu0 %v9084_v5  ;;  %p9099_p0 = scmp.ne.s32.totalorder %s7684_s14, %s9098_s8  ;;  %p9104_p2 = scmp.lt.s32.totalorder %s9098_s8, %s9098_s8 }
 0x50d   :  { %v6986_v29 = vmax.f32 %v6813_v8, 0.0  ;;  %v6993_v20 = vpack.c.bf16 %v6985_v9, %v6985_v9 }
 0x50e   :  { %v6815_v15 = vpop.f32.mrf.mxu1  ;;  %p9105_p3 = por %p9104_p2, %p9103_p1 }
 0x50f   :  { %v6994_v17 = vpack.c.bf16 %v6986_v29, %v6986_v29  ;;  %8653 = vmatpush3.bf16.msra.mxu0 %v9085_v40 }
 0x510   :  { %8654 = vmatprep.subr.bf16.mxu0 %v9086_v13  ;;  %p9106_p4 = pnand %p9105_p3, %p9099_p0 }
 0x511   :  { %7628 = vmatprep.mubr.bf16.mxu1 %v6994_v17 }
 0x512   :  { %7629 = vmatmul.mubr.bf16.vlgmr.msra.gmra.mxu1 %v6993_v20 }
 0x513   :  { %8655 = vmatpush3.bf16.msra.mxu0 %v9087_v18 }
 0x514   :  { %8656 = vmatprep.subr.bf16.mxu0 %v9088_v21 }
 0x517   :  { %8657 = vmatpush3.bf16.msra.mxu0 %v9089_v23 }
 0x518   :  { %8658 = vmatprep.subr.bf16.mxu0 %v9090_v55 }
 0x51b   :  { %8659 = vmatpush3.bf16.msra.mxu0 %v9091_v25 }
 0x51c   :  { %8660 = vmatprep.subr.bf16.mxu0 %v9092_v28 }
 0x51f   :  { %8661 = vmatpush3.bf16.msra.mxu0 %v9093_v48 }
 0x520   :  { %8662 = vmatprep.subr.bf16.mxu0 %v9094_v7 }
 0x523   :  { %8663 = vmatpush3.bf16.msra.mxu0 %v9095_v33 }
 0x546   :  { %v6851_v10 = vpop.f32.mrf.mxu0 }
 0x547   :  { %v6852_v24 = vadd.f32 %v6851_v10, %v3752_v62 }
 0x548   :  { %v6853_v53 = vpop.f32.mrf.mxu0  ;;  %v6892_v35 = vpop.f32.mrf.mxu1 }
 0x549   :  { %v6854_v41 = vadd.f32 %v6853_v53, %v3756_v19  ;;  %v6893_v38 = vadd.f32 %v6892_v35, %v6852_v24 }
 0x54a   :  { %v6855_v36 = vpop.f32.mrf.mxu0  ;;  %v6894_v60 = vpop.f32.mrf.mxu1 }
 0x54b   :  { %v6895_v43 = vadd.f32 %v6894_v60, %v6854_v41 }
 0x54c   :  { %v6856_v27 = vpop.f32.mrf.mxu0  ;;  %v6896_v30 = vpop.f32.mrf.mxu1 }
 0x54e   :  { %v6897_v57 = vpop.f32.mrf.mxu1 }
 0x586   :  { %v6933_v42 = vpop.f32.mrf.mxu0 }
 0x587   :  { %v6934_v45 = vadd.f32 %v6933_v42, %v6893_v38 }
 0x588   :  { %v6935_v46 = vpop.f32.mrf.mxu0  ;;  %v6974_v31 = vpop.f32.mrf.mxu1 }
 0x589   :  { %v6936_v14 = vadd.f32 %v6935_v46, %v6895_v43  ;;  %v6975_v49 = vadd.f32 %v6974_v31, %v6934_v45 }
 0x58a   :  { %v6937_v50 = vpop.f32.mrf.mxu0  ;;  %v6976_v54 = vpop.f32.mrf.mxu1 }
 0x58b   :  { %v6977_v34 = vadd.f32 %v6976_v54, %v6936_v14  ;;  %v6987_v4 = vmax.f32 %v6975_v49, 0.0 }
 0x58c   :  { %v6938_v22 = vpop.f32.mrf.mxu0  ;;  %v6978_v1 = vpop.f32.mrf.mxu1 }
 0x58d   :  { %v6988_v51 = vmax.f32 %v6977_v34, 0.0  ;;  %v6995_v44 = vpack.c.bf16 %v6987_v4, %v6987_v4 }
 0x58e   :  { %v6979_v52 = vpop.f32.mrf.mxu1 }
 0x58f   :  { %v6996_v61 = vpack.c.bf16 %v6988_v51, %v6988_v51 }
 0x591   :  { %7668 = vmatprep.mubr.bf16.mxu0 %v6996_v61 }
 0x592   :  { %7669 = vmatmul.mubr.bf16.vlgmr.msra.gmra.mxu0 %v6995_v44 }
 0x5a6   :  { %v8598_v47 = vpop.f32.mrf.mxu0 }
 0x5a8   :  { %v8599_v63 = vpop.f32.mrf.mxu0 }
 0x5a9   :  { %v8600_v0 = vadd.f32 %v8599_v63, %v8598_v47 }
 0x5aa   :  { %v8601_v58 = vpop.f32.mrf.mxu0 }
 0x5ab   :  { %v7551_v5 = vadd.f32 %v8600_v0, %v8365_v16 }
 0x5ac   :  { %v8602_v56 = vpop.f32.mrf.mxu0 }
 0x5c6   :  { %v8620_v2 = vpop.f32.mrf.mxu0 }
 0x5c8   :  { %v8621_v3 = vpop.f32.mrf.mxu0 }
 0x5c9   :  { %v8622_v32 = vadd.f32 %v8621_v3, %v8620_v2 }
 0x5ca   :  { %v8623_v6 = vpop.f32.mrf.mxu0 }
 0x5cb   :  { %v7591_v59 = vadd.f32 %v8622_v32, %v7551_v5 }
 0x5cc   :  { %v8624_v26 = vpop.f32.mrf.mxu0 }
 0x5d2   :  { %v8642_v8 = vpop.f32.mrf.mxu1 }
 0x5d4   :  { %v8643_v40 = vpop.f32.mrf.mxu1 }
 0x5d5   :  { %v8644_v9 = vadd.f32 %v8643_v40, %v8642_v8 }
 0x5d6   :  { %v8645_v11 = vpop.f32.mrf.mxu1 }
 0x5d7   :  { %v7631_v12 = vadd.f32 %v8644_v9, %v7591_v59 }
 0x5d8   :  { %v8646_v13 = vpop.f32.mrf.mxu1 }
 0x652   :  { %v8664_v29 = vpop.f32.mrf.mxu0 }
 0x654   :  { %v8665_v15 = vpop.f32.mrf.mxu0 }
 0x655   :  { %v8666_v17 = vadd.f32 %v8665_v15, %v8664_v29 }
 0x656   :  { %v8667_v18 = vpop.f32.mrf.mxu0 }
 0x657   :  { %v7671_v20 = vadd.f32 %v8666_v17, %v7631_v12 }
 0x658   :  { %v8668_v21 = vpop.f32.mrf.mxu0 }
 0x659   :  { %7676 = vst [vmem:[#allocation5] sm:$0x3] %v7671_v20 }
 0x65a   :  { %9109 = shalt.err (!%p9106_p4)
}
 0x65b   :  { %7686 = dma.vmem_to_hbm [thread:$0]  %s7684_s14, 32, %s11886_s9, [#allocation6]  }
 0x65c   :  { %9118 = dma.done.wait [#allocation6], 32  }
 0x65d   :  { %9119 = vsyncadd [#allocation6], 4294967264 }
 0x65e   :  { %7690 = vsyncpa [#allocation6], 1 }

</bundles_post_ra>
